<compile_context>
chip_gen: v6e
topology: v6e:2x2x1
jax: 0.10.0
libtpu: 0.0.40
codegen_flags: <defaults>
</compile_context>

<pallas_src>
import jax
import jax.numpy as jnp
from jax.experimental import pallas as pl
from jax.experimental.pallas import tpu as pltpu


# ----------------------------------------------------------------------------
# Kernel 1: fused conv1 + conv2 + full 2x2 maxpool for one image.
# ----------------------------------------------------------------------------
def _make_conv_pool_kernel(H, W):
    HW = H * W
    Hp, Wp = H // 2, W // 2
    HpW = Hp * W
    HpWp = Hp * Wp

    def kernel(p1_ref, w1_ref, b1_ref, w2_ref, b2_ref, o_ref):
        # p1_ref: (1, HW, K1p) bf16   conv1 im2col patches (rows = y*W + x),
        #                             K zero-padded to K1p (=32)
        # w1_ref: (K1p, C1) bf16      conv1 weights as im2col matrix (padded)
        # b1_ref: (1, C1) f32
        # w2_ref: (9, C1, C2) bf16    conv2 weights, tap-major
        # b2_ref: (1, C2) f32
        # o_ref : (1, Hp*Wp, C2) bf16 fully pooled conv2 output (rows = py*Wp+px)
        C1 = w1_ref.shape[1]
        C2 = w2_ref.shape[2]

        # ---- conv1: one im2col matmul (K = K1p) + bias + ReLU ----
        h1 = jnp.dot(p1_ref[0], w1_ref[...],
                     preferred_element_type=jnp.float32)          # (HW, C1) f32
        h1 = jnp.maximum(h1 + b1_ref[...], 0.0)

        # ---- hoisted x-border predicates (reused by the 6 ox != 0 taps) ----
        xcoord = jax.lax.broadcasted_iota(jnp.int32, (HW, C1), 0) % W
        x_ok_left = xcoord >= 1            # tap reads x-1  (ox = -1)
        x_ok_right = xcoord < (W - 1)      # tap reads x+1  (ox = +1)

        # ---- conv2: 9 accumulated MXU dots (no patches2 materialization) ---
        # For tap (dy,dx) the needed value at output row f=y*W+x is
        # h1[f + (dy-1)*W + (dx-1)] (0 outside the image).  A zero-fill shift
        # along the flat row axis handles the y border automatically; only the
        # x wrap-around needs the precomputed masks above.
        acc = jnp.zeros((HW, C2), jnp.float32)
        for dy in range(3):
            for dx in range(3):
                oy, ox = dy - 1, dx - 1
                d = oy * W + ox
                if d > 0:
                    tap = jnp.concatenate(
                        [h1[d:, :], jnp.zeros((d, C1), jnp.float32)], axis=0)
                elif d < 0:
                    tap = jnp.concatenate(
                        [jnp.zeros((-d, C1), jnp.float32), h1[:HW + d, :]],
                        axis=0)
                else:
                    tap = h1
                if ox == -1:
                    tap = jnp.where(x_ok_left, tap, 0.0)
                elif ox == 1:
                    tap = jnp.where(x_ok_right, tap, 0.0)
                acc = acc + jnp.dot(tap.astype(jnp.bfloat16),
                                    w2_ref[dy * 3 + dx],
                                    preferred_element_type=jnp.float32)
        h2 = jnp.maximum(acc + b2_ref[...], 0.0)                  # (HW, C2) f32

        # ---- 2x2 max pool, finished in-kernel ----
        # y-direction: rows y*W+x with y=2*py+ry -> tile-aligned view, max ry.
        t = h2.reshape(Hp, 2, W, C2)
        yp = jnp.maximum(t[:, 0], t[:, 1]).reshape(HpW, C2)       # (Hp*W, C2)
        # x-direction: max each row with the next row (zero-fill shift by 1);
        # the pooled value sits at even rows.
        dn = jnp.concatenate(
            [yp[1:, :], jnp.zeros((1, C2), jnp.float32)], axis=0)
        xm = jnp.maximum(yp, dn).astype(jnp.bfloat16)             # (Hp*W, C2)
        # Even-row selection with a 0/1 matmul (exact: picks xm[2q, :]).
        q_idx = jax.lax.broadcasted_iota(jnp.int32, (HpWp, HpW), 0)
        k_idx = jax.lax.broadcasted_iota(jnp.int32, (HpWp, HpW), 1)
        sel = jnp.where(k_idx == 2 * q_idx, 1.0, 0.0).astype(jnp.bfloat16)
        pooled = jnp.dot(sel, xm, preferred_element_type=jnp.float32)
        o_ref[0] = pooled.astype(o_ref.dtype)                     # (Hp*Wp, C2)

    return kernel


# ----------------------------------------------------------------------------
# Kernel 2: MLP head, single grid step: linear1 + ReLU + linear2.
# ----------------------------------------------------------------------------
def _mlp_kernel(x_ref, w1_ref, b1_ref, w2_ref, b2_ref, o_ref):
    # x_ref: (N, F) bf16, w1_ref: (F, HID) bf16, b1_ref: (1, HID) f32
    # w2_ref: (HID, OUT) bf16, b2_ref: (1, OUT) f32, o_ref: (N, OUT) f32
    h = jnp.dot(x_ref[...], w1_ref[...], preferred_element_type=jnp.float32)
    h = jnp.maximum(h + b1_ref[...], 0.0)
    o_ref[...] = (jnp.dot(h.astype(jnp.bfloat16), w2_ref[...],
                          preferred_element_type=jnp.float32) + b2_ref[...])


# ----------------------------------------------------------------------------
# One-time weight preparation (hoisted out of the jitted forward).
# ----------------------------------------------------------------------------
def prepare_params(wc1, bc1, wc2, bc2, wl1, bl1, wl2, bl2, H, W):
    Cin, C1 = wc1.shape[2], wc1.shape[3]
    C2 = wc2.shape[3]
    HID, OUT = wl1.shape[1], wl2.shape[1]
    Hp, Wp = H // 2, W // 2
    K1 = 9 * Cin
    K1p = ((K1 + 31) // 32) * 32            # pad 27 -> 32 for aligned lanes/DMA

    w1col = jnp.pad(wc1.reshape(K1, C1),
                    ((0, K1p - K1), (0, 0))).astype(jnp.bfloat16)
    w2t = wc2.reshape(9, C1, C2).astype(jnp.bfloat16)   # tap-major (dy*3+dx)

    # torch flattens NCHW: feature index = c*Hp*Wp + p.  The conv kernel
    # produces (p, c) order, so permute linear1's rows once here.
    w1p = (wl1.reshape(C2, Hp * Wp, HID).transpose(1, 0, 2)
           .reshape(Hp * Wp * C2, HID).astype(jnp.bfloat16))

    return dict(
        w1col=w1col,
        b1=bc1.reshape(1, C1).astype(jnp.float32),
        w2t=w2t,
        b2=bc2.reshape(1, C2).astype(jnp.float32),
        w1p=w1p,
        bl1=bl1.reshape(1, HID).astype(jnp.float32),
        wl2=wl2.astype(jnp.bfloat16),
        bl2=bl2.reshape(1, OUT).astype(jnp.float32),
    )


# ----------------------------------------------------------------------------
# Forward pass: two pallas_calls + thin (free) layout glue.
# ----------------------------------------------------------------------------
def forward(x_nchw, params):
    N, Cin, H, W = x_nchw.shape
    assert H % 2 == 0 and W % 2 == 0
    w1col, b1 = params["w1col"], params["b1"]
    w2t, b2 = params["w2t"], params["b2"]
    w1p, bl1 = params["w1p"], params["bl1"]
    wl2, bl2 = params["wl2"], params["bl2"]
    K1p, C1 = w1col.shape
    C2 = w2t.shape[2]
    HID, OUT = wl2.shape
    Hp, Wp = H // 2, W // 2
    F = Hp * Wp * C2

    # Input im2col (pure layout packing; K zero-padded to K1p).
    x = jnp.transpose(x_nchw, (0, 2, 3, 1))
    xp = jnp.pad(x, ((0, 0), (1, 1), (1, 1), (0, 0)))
    cols = [xp[:, dy:dy + H, dx:dx + W, :]
            for dy in range(3) for dx in range(3)]
    patches1 = jnp.concatenate(cols, axis=-1).reshape(N, H * W, 9 * Cin)
    patches1 = jnp.pad(
        patches1, ((0, 0), (0, 0), (0, K1p - 9 * Cin))).astype(jnp.bfloat16)

    pooled = pl.pallas_call(
        _make_conv_pool_kernel(H, W),
        out_shape=jax.ShapeDtypeStruct((N, Hp * Wp, C2), jnp.bfloat16),
        grid_spec=pltpu.PrefetchScalarGridSpec(
            num_scalar_prefetch=0,
            grid=(N,),
            in_specs=[
                pl.BlockSpec((1, H * W, K1p), lambda n: (n, 0, 0)),
                pl.BlockSpec((K1p, C1), lambda n: (0, 0)),
                pl.BlockSpec((1, C1), lambda n: (0, 0)),
                pl.BlockSpec((9, C1, C2), lambda n: (0, 0, 0)),
                pl.BlockSpec((1, C2), lambda n: (0, 0)),
            ],
            out_specs=pl.BlockSpec((1, Hp * Wp, C2), lambda n: (n, 0, 0)),
        ),
        compiler_params=pltpu.CompilerParams(
            dimension_semantics=("parallel",)),
    )(patches1, w1col, b1, w2t, b2)

    # Row-major reshape: (N, Hp*Wp, C2) -> (N, F); free (bitcast), no gather.
    flat = pooled.reshape(N, F)

    out = pl.pallas_call(
        _mlp_kernel,
        out_shape=jax.ShapeDtypeStruct((N, OUT), jnp.float32),
        grid_spec=pltpu.PrefetchScalarGridSpec(
            num_scalar_prefetch=0,
            grid=(1,),
            in_specs=[
                pl.BlockSpec((N, F), lambda i: (0, 0)),
                pl.BlockSpec((F, HID), lambda i: (0, 0)),
                pl.BlockSpec((1, HID), lambda i: (0, 0)),
                pl.BlockSpec((HID, OUT), lambda i: (0, 0)),
                pl.BlockSpec((1, OUT), lambda i: (0, 0)),
            ],
            out_specs=pl.BlockSpec((N, OUT), lambda i: (0, 0)),
        ),
        compiler_params=pltpu.CompilerParams(
            dimension_semantics=("arbitrary",)),
    )(flat, w1p, bl1, wl2, bl2)
    return out


# ----------------------------------------------------------------------------
# Pure-JAX f32 reference (torch semantics: NCHW conv, NCHW flatten).
# ----------------------------------------------------------------------------
def reference_forward(x_nchw, wc1, bc1, wc2, bc2, wl1, bl1, wl2, bl2):
    HI = jax.lax.Precision.HIGHEST

    def conv(x, w, b):
        y = jax.lax.conv_general_dilated(
            x, w, window_strides=(1, 1), padding="SAME",
            dimension_numbers=("NCHW", "HWIO", "NCHW"), precision=HI)
        return jax.nn.relu(y + b[None, :, None, None])

    h = conv(x_nchw, wc1, bc1)
    h = conv(h, wc2, bc2)
    h = jax.lax.reduce_window(h, -jnp.inf, jax.lax.max,
                              (1, 1, 2, 2), (1, 1, 2, 2), "VALID")
    flat = h.reshape(h.shape[0], -1)
    hid = jax.nn.relu(jnp.dot(flat, wl1, precision=HI) + bl1)
    return jnp.dot(hid, wl2, precision=HI) + bl2


if __name__ == "__main__":
    N, Cin, H, W = 2, 3, 16, 16
    C1, C2 = 64, 128
    F = C2 * (H // 2) * (W // 2)      # 8192 (small-shape analogue of 1605632)
    HID, OUT = 128, 4

    key = jax.random.PRNGKey(0)
    ks = jax.random.split(key, 9)
    x_nchw = jax.random.normal(ks[0], (N, Cin, H, W), jnp.float32)

    wc1 = jax.random.normal(ks[1], (3, 3, Cin, C1), jnp.float32) * 0.10
    bc1 = jax.random.normal(ks[2], (C1,), jnp.float32) * 0.10
    wc2 = jax.random.normal(ks[3], (3, 3, C1, C2), jnp.float32) * 0.05
    bc2 = jax.random.normal(ks[4], (C2,), jnp.float32) * 0.05
    wl1 = jax.random.normal(ks[5], (F, HID), jnp.float32) * 0.01
    bl1 = jax.random.normal(ks[6], (HID,), jnp.float32) * 0.01
    wl2 = jax.random.normal(ks[7], (HID, OUT), jnp.float32) * 0.05
    bl2 = jax.random.normal(ks[8], (OUT,), jnp.float32) * 0.05

    # One-time weight preparation (NOT part of the per-call forward).
    params = prepare_params(wc1, bc1, wc2, bc2, wl1, bl1, wl2, bl2, H, W)
    params = jax.tree_util.tree_map(jax.block_until_ready, params)

    fwd = jax.jit(forward)
    out = fwd(x_nchw, params)
    out = jax.block_until_ready(out)

    ref = reference_forward(x_nchw, wc1, bc1, wc2, bc2, wl1, bl1, wl2, bl2)
    assert out.shape == (N, OUT), out.shape
    # Tolerance covers bf16 MXU-operand rounding (kernel) vs. the f32 HIGHEST
    # reference; measured error is a few 1e-3 on O(0.3) outputs.
    assert jnp.allclose(out, ref, rtol=3e-2, atol=3e-2), (out, ref)

    print("KERNEL_OK")
</pallas_src>

<mosaic_0001>
module attributes {stable_mosaic.version = 11 : i64} {
  func.func @kernel(%arg0: i32, %arg1: memref<1x256x32xbf16, #tpu.memory_space<vmem>>, %arg2: memref<32x64xbf16, #tpu.memory_space<vmem>>, %arg3: memref<1x64xf32, #tpu.memory_space<vmem>>, %arg4: memref<9x64x128xbf16, #tpu.memory_space<vmem>>, %arg5: memref<1x128xf32, #tpu.memory_space<vmem>>, %arg6: memref<1x64x128xbf16, #tpu.memory_space<vmem>>) attributes {dimension_semantics = [#tpu.dimension_semantics<parallel>], iteration_bounds = array<i64: 2>, scalar_prefetch = 0 : i64, scratch_operands = 0 : i64, tpu.core_type = #tpu.core_type<tc>, window_params = [{transform_indices = @transform_0, window_bounds = array<i64: 1, 256, 32>}, {pipeline_mode = #tpu.pipeline_mode<synchronous>, transform_indices = @transform_1, window_bounds = array<i64: 32, 64>}, {pipeline_mode = #tpu.pipeline_mode<synchronous>, transform_indices = @transform_2, window_bounds = array<i64: 1, 64>}, {pipeline_mode = #tpu.pipeline_mode<synchronous>, transform_indices = @transform_3, window_bounds = array<i64: 9, 64, 128>}, {pipeline_mode = #tpu.pipeline_mode<synchronous>, transform_indices = @transform_4, window_bounds = array<i64: 1, 128>}, {transform_indices = @transform_5, window_bounds = array<i64: 1, 64, 128>}]} {
    %c0 = arith.constant 0 : index
    %c0_0 = arith.constant 0 : index
    %c0_1 = arith.constant 0 : index
    %0 = vector.load %arg1[%c0, %c0_0, %c0_1] : memref<1x256x32xbf16, #tpu.memory_space<vmem>>, vector<1x256x32xbf16>
    %1 = vector.shape_cast %0 : vector<1x256x32xbf16> to vector<256x32xbf16>
    %c0_2 = arith.constant 0 : index
    %c0_3 = arith.constant 0 : index
    %2 = vector.load %arg2[%c0_2, %c0_3] : memref<32x64xbf16, #tpu.memory_space<vmem>>, vector<32x64xbf16>
    %cst = arith.constant dense<0.000000e+00> : vector<256x64xf32>
    %3 = tpu.matmul %1, %2, %cst {dimension_numbers = #tpu.dot_dimension_numbers<[1], [0], [0], [1], [0, 0, 1, 1], [], []>} : vector<256x32xbf16>, vector<32x64xbf16>, vector<256x64xf32> -> vector<256x64xf32>
    %c0_4 = arith.constant 0 : index
    %c0_5 = arith.constant 0 : index
    %4 = vector.load %arg3[%c0_4, %c0_5] : memref<1x64xf32, #tpu.memory_space<vmem>>, vector<1x64xf32>
    %5 = vector.broadcast %4 : vector<1x64xf32> to vector<256x64xf32>
    %6 = arith.addf %3, %5 : vector<256x64xf32>
    %cst_6 = arith.constant 0.000000e+00 : f32
    %7 = vector.broadcast %cst_6 : f32 to vector<256x64xf32>
    %8 = arith.maximumf %6, %7 : vector<256x64xf32>
    %9 = tpu.iota {dimensions = array<i32: 0>} : vector<256x64xi32>
    %c16_i32 = arith.constant 16 : i32
    %c0_i32 = arith.constant 0 : i32
    %10 = arith.cmpi eq, %c16_i32, %c0_i32 : i32
    %c1_i32 = arith.constant 1 : i32
    %11 = arith.select %10, %c1_i32, %c16_i32 : i32
    %12 = vector.broadcast %11 : i32 to vector<256x64xi32>
    %13 = arith.remsi %9, %12 : vector<256x64xi32>
    %c0_i32_7 = arith.constant 0 : i32
    %14 = vector.broadcast %c0_i32_7 : i32 to vector<256x64xi32>
    %15 = arith.cmpi ne, %13, %14 : vector<256x64xi32>
    %c0_i32_8 = arith.constant 0 : i32
    %16 = vector.broadcast %c0_i32_8 : i32 to vector<256x64xi32>
    %17 = arith.cmpi slt, %13, %16 : vector<256x64xi32>
    %c0_i32_9 = arith.constant 0 : i32
    %18 = arith.cmpi slt, %11, %c0_i32_9 : i32
    %19 = vector.broadcast %18 : i1 to vector<256x64xi1>
    %20 = vector.broadcast %19 : vector<256x64xi1> to vector<256x64xi1>
    %21 = arith.xori %17, %20 : vector<256x64xi1>
    %22 = arith.andi %21, %15 : vector<256x64xi1>
    %23 = vector.broadcast %11 : i32 to vector<256x64xi32>
    %24 = arith.addi %13, %23 : vector<256x64xi32>
    %25 = arith.select %22, %24, %13 : vector<256x64xi1>, vector<256x64xi32>
    %c1_i32_10 = arith.constant 1 : i32
    %26 = vector.broadcast %c1_i32_10 : i32 to vector<256x64xi32>
    %27 = arith.cmpi sge, %25, %26 : vector<256x64xi32>
    %c15_i32 = arith.constant 15 : i32
    %28 = vector.broadcast %c15_i32 : i32 to vector<256x64xi32>
    %29 = arith.cmpi slt, %25, %28 : vector<256x64xi32>
    %cst_11 = arith.constant 0.000000e+00 : f32
    %30 = vector.broadcast %cst_11 : f32 to vector<256x128xf32>
    %cst_12 = arith.constant 0.000000e+00 : f32
    %31 = vector.broadcast %cst_12 : f32 to vector<17x64xf32>
    %32 = vector.extract_strided_slice %8 {offsets = [0, 0], sizes = [239, 64], strides = [1, 1]} : vector<256x64xf32> to vector<239x64xf32>
    %33 = tpu.concatenate %31, %32 in 0 : vector<17x64xf32>, vector<239x64xf32> -> vector<256x64xf32>
    %cst_13 = arith.constant 0.000000e+00 : f32
    %34 = vector.broadcast %cst_13 : f32 to vector<256x64xf32>
    %35 = arith.select %27, %33, %34 : vector<256x64xi1>, vector<256x64xf32>
    %36 = arith.truncf %35 : vector<256x64xf32> to vector<256x64xbf16>
    %c0_14 = arith.constant 0 : index
    %c0_15 = arith.constant 0 : index
    %c0_16 = arith.constant 0 : index
    %37 = vector.load %arg4[%c0_14, %c0_15, %c0_16] : memref<9x64x128xbf16, #tpu.memory_space<vmem>>, vector<1x64x128xbf16>
    %38 = vector.shape_cast %37 : vector<1x64x128xbf16> to vector<64x128xbf16>
    %cst_17 = arith.constant dense<0.000000e+00> : vector<256x128xf32>
    %39 = tpu.matmul %36, %38, %cst_17 {dimension_numbers = #tpu.dot_dimension_numbers<[1], [0], [0], [1], [0, 0, 1, 1], [], []>} : vector<256x64xbf16>, vector<64x128xbf16>, vector<256x128xf32> -> vector<256x128xf32>
    %40 = arith.addf %30, %39 : vector<256x128xf32>
    %cst_18 = arith.constant 0.000000e+00 : f32
    %41 = vector.broadcast %cst_18 : f32 to vector<16x64xf32>
    %42 = vector.extract_strided_slice %8 {offsets = [0, 0], sizes = [240, 64], strides = [1, 1]} : vector<256x64xf32> to vector<240x64xf32>
    %43 = tpu.concatenate %41, %42 in 0 : vector<16x64xf32>, vector<240x64xf32> -> vector<256x64xf32>
    %44 = arith.truncf %43 : vector<256x64xf32> to vector<256x64xbf16>
    %c1 = arith.constant 1 : index
    %c0_19 = arith.constant 0 : index
    %c0_20 = arith.constant 0 : index
    %45 = vector.load %arg4[%c1, %c0_19, %c0_20] : memref<9x64x128xbf16, #tpu.memory_space<vmem>>, vector<1x64x128xbf16>
    %46 = vector.shape_cast %45 : vector<1x64x128xbf16> to vector<64x128xbf16>
    %cst_21 = arith.constant dense<0.000000e+00> : vector<256x128xf32>
    %47 = tpu.matmul %44, %46, %cst_21 {dimension_numbers = #tpu.dot_dimension_numbers<[1], [0], [0], [1], [0, 0, 1, 1], [], []>} : vector<256x64xbf16>, vector<64x128xbf16>, vector<256x128xf32> -> vector<256x128xf32>
    %48 = arith.addf %40, %47 : vector<256x128xf32>
    %cst_22 = arith.constant 0.000000e+00 : f32
    %49 = vector.broadcast %cst_22 : f32 to vector<15x64xf32>
    %50 = vector.extract_strided_slice %8 {offsets = [0, 0], sizes = [241, 64], strides = [1, 1]} : vector<256x64xf32> to vector<241x64xf32>
    %51 = tpu.concatenate %49, %50 in 0 : vector<15x64xf32>, vector<241x64xf32> -> vector<256x64xf32>
    %cst_23 = arith.constant 0.000000e+00 : f32
    %52 = vector.broadcast %cst_23 : f32 to vector<256x64xf32>
    %53 = arith.select %29, %51, %52 : vector<256x64xi1>, vector<256x64xf32>
    %54 = arith.truncf %53 : vector<256x64xf32> to vector<256x64xbf16>
    %c2 = arith.constant 2 : index
    %c0_24 = arith.constant 0 : index
    %c0_25 = arith.constant 0 : index
    %55 = vector.load %arg4[%c2, %c0_24, %c0_25] : memref<9x64x128xbf16, #tpu.memory_space<vmem>>, vector<1x64x128xbf16>
    %56 = vector.shape_cast %55 : vector<1x64x128xbf16> to vector<64x128xbf16>
    %cst_26 = arith.constant dense<0.000000e+00> : vector<256x128xf32>
    %57 = tpu.matmul %54, %56, %cst_26 {dimension_numbers = #tpu.dot_dimension_numbers<[1], [0], [0], [1], [0, 0, 1, 1], [], []>} : vector<256x64xbf16>, vector<64x128xbf16>, vector<256x128xf32> -> vector<256x128xf32>
    %58 = arith.addf %48, %57 : vector<256x128xf32>
    %cst_27 = arith.constant 0.000000e+00 : f32
    %59 = vector.broadcast %cst_27 : f32 to vector<1x64xf32>
    %60 = vector.extract_strided_slice %8 {offsets = [0, 0], sizes = [255, 64], strides = [1, 1]} : vector<256x64xf32> to vector<255x64xf32>
    %61 = tpu.concatenate %59, %60 in 0 : vector<1x64xf32>, vector<255x64xf32> -> vector<256x64xf32>
    %cst_28 = arith.constant 0.000000e+00 : f32
    %62 = vector.broadcast %cst_28 : f32 to vector<256x64xf32>
    %63 = arith.select %27, %61, %62 : vector<256x64xi1>, vector<256x64xf32>
    %64 = arith.truncf %63 : vector<256x64xf32> to vector<256x64xbf16>
    %c3 = arith.constant 3 : index
    %c0_29 = arith.constant 0 : index
    %c0_30 = arith.constant 0 : index
    %65 = vector.load %arg4[%c3, %c0_29, %c0_30] : memref<9x64x128xbf16, #tpu.memory_space<vmem>>, vector<1x64x128xbf16>
    %66 = vector.shape_cast %65 : vector<1x64x128xbf16> to vector<64x128xbf16>
    %cst_31 = arith.constant dense<0.000000e+00> : vector<256x128xf32>
    %67 = tpu.matmul %64, %66, %cst_31 {dimension_numbers = #tpu.dot_dimension_numbers<[1], [0], [0], [1], [0, 0, 1, 1], [], []>} : vector<256x64xbf16>, vector<64x128xbf16>, vector<256x128xf32> -> vector<256x128xf32>
    %68 = arith.addf %58, %67 : vector<256x128xf32>
    %69 = arith.truncf %8 : vector<256x64xf32> to vector<256x64xbf16>
    %c4 = arith.constant 4 : index
    %c0_32 = arith.constant 0 : index
    %c0_33 = arith.constant 0 : index
    %70 = vector.load %arg4[%c4, %c0_32, %c0_33] : memref<9x64x128xbf16, #tpu.memory_space<vmem>>, vector<1x64x128xbf16>
    %71 = vector.shape_cast %70 : vector<1x64x128xbf16> to vector<64x128xbf16>
    %cst_34 = arith.constant dense<0.000000e+00> : vector<256x128xf32>
    %72 = tpu.matmul %69, %71, %cst_34 {dimension_numbers = #tpu.dot_dimension_numbers<[1], [0], [0], [1], [0, 0, 1, 1], [], []>} : vector<256x64xbf16>, vector<64x128xbf16>, vector<256x128xf32> -> vector<256x128xf32>
    %73 = arith.addf %68, %72 : vector<256x128xf32>
    %74 = vector.extract_strided_slice %8 {offsets = [1, 0], sizes = [255, 64], strides = [1, 1]} : vector<256x64xf32> to vector<255x64xf32>
    %cst_35 = arith.constant 0.000000e+00 : f32
    %75 = vector.broadcast %cst_35 : f32 to vector<1x64xf32>
    %76 = tpu.concatenate %74, %75 in 0 : vector<255x64xf32>, vector<1x64xf32> -> vector<256x64xf32>
    %cst_36 = arith.constant 0.000000e+00 : f32
    %77 = vector.broadcast %cst_36 : f32 to vector<256x64xf32>
    %78 = arith.select %29, %76, %77 : vector<256x64xi1>, vector<256x64xf32>
    %79 = arith.truncf %78 : vector<256x64xf32> to vector<256x64xbf16>
    %c5 = arith.constant 5 : index
    %c0_37 = arith.constant 0 : index
    %c0_38 = arith.constant 0 : index
    %80 = vector.load %arg4[%c5, %c0_37, %c0_38] : memref<9x64x128xbf16, #tpu.memory_space<vmem>>, vector<1x64x128xbf16>
    %81 = vector.shape_cast %80 : vector<1x64x128xbf16> to vector<64x128xbf16>
    %cst_39 = arith.constant dense<0.000000e+00> : vector<256x128xf32>
    %82 = tpu.matmul %79, %81, %cst_39 {dimension_numbers = #tpu.dot_dimension_numbers<[1], [0], [0], [1], [0, 0, 1, 1], [], []>} : vector<256x64xbf16>, vector<64x128xbf16>, vector<256x128xf32> -> vector<256x128xf32>
    %83 = arith.addf %73, %82 : vector<256x128xf32>
    %84 = vector.extract_strided_slice %8 {offsets = [15, 0], sizes = [241, 64], strides = [1, 1]} : vector<256x64xf32> to vector<241x64xf32>
    %cst_40 = arith.constant 0.000000e+00 : f32
    %85 = vector.broadcast %cst_40 : f32 to vector<15x64xf32>
    %86 = tpu.concatenate %84, %85 in 0 : vector<241x64xf32>, vector<15x64xf32> -> vector<256x64xf32>
    %cst_41 = arith.constant 0.000000e+00 : f32
    %87 = vector.broadcast %cst_41 : f32 to vector<256x64xf32>
    %88 = arith.select %27, %86, %87 : vector<256x64xi1>, vector<256x64xf32>
    %89 = arith.truncf %88 : vector<256x64xf32> to vector<256x64xbf16>
    %c6 = arith.constant 6 : index
    %c0_42 = arith.constant 0 : index
    %c0_43 = arith.constant 0 : index
    %90 = vector.load %arg4[%c6, %c0_42, %c0_43] : memref<9x64x128xbf16, #tpu.memory_space<vmem>>, vector<1x64x128xbf16>
    %91 = vector.shape_cast %90 : vector<1x64x128xbf16> to vector<64x128xbf16>
    %cst_44 = arith.constant dense<0.000000e+00> : vector<256x128xf32>
    %92 = tpu.matmul %89, %91, %cst_44 {dimension_numbers = #tpu.dot_dimension_numbers<[1], [0], [0], [1], [0, 0, 1, 1], [], []>} : vector<256x64xbf16>, vector<64x128xbf16>, vector<256x128xf32> -> vector<256x128xf32>
    %93 = arith.addf %83, %92 : vector<256x128xf32>
    %94 = vector.extract_strided_slice %8 {offsets = [16, 0], sizes = [240, 64], strides = [1, 1]} : vector<256x64xf32> to vector<240x64xf32>
    %cst_45 = arith.constant 0.000000e+00 : f32
    %95 = vector.broadcast %cst_45 : f32 to vector<16x64xf32>
    %96 = tpu.concatenate %94, %95 in 0 : vector<240x64xf32>, vector<16x64xf32> -> vector<256x64xf32>
    %97 = arith.truncf %96 : vector<256x64xf32> to vector<256x64xbf16>
    %c7 = arith.constant 7 : index
    %c0_46 = arith.constant 0 : index
    %c0_47 = arith.constant 0 : index
    %98 = vector.load %arg4[%c7, %c0_46, %c0_47] : memref<9x64x128xbf16, #tpu.memory_space<vmem>>, vector<1x64x128xbf16>
    %99 = vector.shape_cast %98 : vector<1x64x128xbf16> to vector<64x128xbf16>
    %cst_48 = arith.constant dense<0.000000e+00> : vector<256x128xf32>
    %100 = tpu.matmul %97, %99, %cst_48 {dimension_numbers = #tpu.dot_dimension_numbers<[1], [0], [0], [1], [0, 0, 1, 1], [], []>} : vector<256x64xbf16>, vector<64x128xbf16>, vector<256x128xf32> -> vector<256x128xf32>
    %101 = arith.addf %93, %100 : vector<256x128xf32>
    %102 = vector.extract_strided_slice %8 {offsets = [17, 0], sizes = [239, 64], strides = [1, 1]} : vector<256x64xf32> to vector<239x64xf32>
    %cst_49 = arith.constant 0.000000e+00 : f32
    %103 = vector.broadcast %cst_49 : f32 to vector<17x64xf32>
    %104 = tpu.concatenate %102, %103 in 0 : vector<239x64xf32>, vector<17x64xf32> -> vector<256x64xf32>
    %cst_50 = arith.constant 0.000000e+00 : f32
    %105 = vector.broadcast %cst_50 : f32 to vector<256x64xf32>
    %106 = arith.select %29, %104, %105 : vector<256x64xi1>, vector<256x64xf32>
    %107 = arith.truncf %106 : vector<256x64xf32> to vector<256x64xbf16>
    %c8 = arith.constant 8 : index
    %c0_51 = arith.constant 0 : index
    %c0_52 = arith.constant 0 : index
    %108 = vector.load %arg4[%c8, %c0_51, %c0_52] : memref<9x64x128xbf16, #tpu.memory_space<vmem>>, vector<1x64x128xbf16>
    %109 = vector.shape_cast %108 : vector<1x64x128xbf16> to vector<64x128xbf16>
    %cst_53 = arith.constant dense<0.000000e+00> : vector<256x128xf32>
    %110 = tpu.matmul %107, %109, %cst_53 {dimension_numbers = #tpu.dot_dimension_numbers<[1], [0], [0], [1], [0, 0, 1, 1], [], []>} : vector<256x64xbf16>, vector<64x128xbf16>, vector<256x128xf32> -> vector<256x128xf32>
    %111 = arith.addf %101, %110 : vector<256x128xf32>
    %c0_54 = arith.constant 0 : index
    %c0_55 = arith.constant 0 : index
    %112 = vector.load %arg5[%c0_54, %c0_55] : memref<1x128xf32, #tpu.memory_space<vmem>>, vector<1x128xf32>
    %113 = vector.broadcast %112 : vector<1x128xf32> to vector<256x128xf32>
    %114 = arith.addf %111, %113 : vector<256x128xf32>
    %cst_56 = arith.constant 0.000000e+00 : f32
    %115 = vector.broadcast %cst_56 : f32 to vector<256x128xf32>
    %116 = arith.maximumf %114, %115 : vector<256x128xf32>
    %117 = vector.shape_cast %116 : vector<256x128xf32> to vector<8x2x16x128xf32>
    %118 = vector.extract_strided_slice %117 {offsets = [0, 0, 0, 0], sizes = [8, 1, 16, 128], strides = [1, 1, 1, 1]} : vector<8x2x16x128xf32> to vector<8x1x16x128xf32>
    %119 = vector.shape_cast %118 : vector<8x1x16x128xf32> to vector<8x16x128xf32>
    %120 = vector.extract_strided_slice %117 {offsets = [0, 1, 0, 0], sizes = [8, 1, 16, 128], strides = [1, 1, 1, 1]} : vector<8x2x16x128xf32> to vector<8x1x16x128xf32>
    %121 = vector.shape_cast %120 : vector<8x1x16x128xf32> to vector<8x16x128xf32>
    %122 = arith.maximumf %119, %121 : vector<8x16x128xf32>
    %123 = vector.shape_cast %122 : vector<8x16x128xf32> to vector<128x128xf32>
    %124 = vector.extract_strided_slice %123 {offsets = [1, 0], sizes = [127, 128], strides = [1, 1]} : vector<128x128xf32> to vector<127x128xf32>
    %cst_57 = arith.constant 0.000000e+00 : f32
    %125 = vector.broadcast %cst_57 : f32 to vector<1x128xf32>
    %126 = tpu.concatenate %124, %125 in 0 : vector<127x128xf32>, vector<1x128xf32> -> vector<128x128xf32>
    %127 = arith.maximumf %123, %126 : vector<128x128xf32>
    %128 = arith.truncf %127 : vector<128x128xf32> to vector<128x128xbf16>
    %129 = tpu.iota {dimensions = array<i32: 0>} : vector<64x128xi32>
    %130 = tpu.iota {dimensions = array<i32: 1>} : vector<64x128xi32>
    %c2_i32 = arith.constant 2 : i32
    %131 = vector.broadcast %c2_i32 : i32 to vector<64x128xi32>
    %132 = arith.muli %131, %129 : vector<64x128xi32>
    %133 = arith.cmpi eq, %130, %132 : vector<64x128xi32>
    %cst_58 = arith.constant 1.000000e+00 : f32
    %cst_59 = arith.constant 0.000000e+00 : f32
    %134 = vector.broadcast %cst_58 : f32 to vector<64x128xf32>
    %135 = vector.broadcast %cst_59 : f32 to vector<64x128xf32>
    %136 = arith.select %133, %134, %135 : vector<64x128xi1>, vector<64x128xf32>
    %137 = arith.truncf %136 : vector<64x128xf32> to vector<64x128xbf16>
    %cst_60 = arith.constant dense<0.000000e+00> : vector<64x128xf32>
    %138 = tpu.matmul %137, %128, %cst_60 {dimension_numbers = #tpu.dot_dimension_numbers<[1], [0], [0], [1], [0, 0, 1, 1], [], []>} : vector<64x128xbf16>, vector<128x128xbf16>, vector<64x128xf32> -> vector<64x128xf32>
    %139 = arith.truncf %138 : vector<64x128xf32> to vector<64x128xbf16>
    %c0_61 = arith.constant 0 : index
    %c0_62 = arith.constant 0 : index
    %c0_63 = arith.constant 0 : index
    %140 = vector.load %arg6[%c0_61, %c0_62, %c0_63] : memref<1x64x128xbf16, #tpu.memory_space<vmem>>, vector<1x64x128xbf16>
    %141 = vector.shape_cast %140 : vector<1x64x128xbf16> to vector<64x128xbf16>
    %142 = vector.shape_cast %139 : vector<64x128xbf16> to vector<1x64x128xbf16>
    tpu.vector_store %arg6[%c0_61, %c0_62, %c0_63], %142 {strides = array<i32>} : memref<1x64x128xbf16, #tpu.memory_space<vmem>>, vector<1x64x128xbf16>,
    return
  }
  func.func @transform_0(%arg0: i32) -> (i32, i32, i32) {
    %c0_i32 = arith.constant 0 : i32
    %c0_i32_0 = arith.constant 0 : i32
    %c0_i32_1 = arith.constant 0 : i32
    return %arg0, %c0_i32, %c0_i32_0 : i32, i32, i32
  }
  func.func @transform_1(%arg0: i32) -> (i32, i32) {
    %c0_i32 = arith.constant 0 : i32
    %c0_i32_0 = arith.constant 0 : i32
    %c0_i32_1 = arith.constant 0 : i32
    return %c0_i32, %c0_i32_0 : i32, i32
  }
  func.func @transform_2(%arg0: i32) -> (i32, i32) {
    %c0_i32 = arith.constant 0 : i32
    %c0_i32_0 = arith.constant 0 : i32
    %c0_i32_1 = arith.constant 0 : i32
    return %c0_i32, %c0_i32_0 : i32, i32
  }
  func.func @transform_3(%arg0: i32) -> (i32, i32, i32) {
    %c0_i32 = arith.constant 0 : i32
    %c0_i32_0 = arith.constant 0 : i32
    %c0_i32_1 = arith.constant 0 : i32
    %c0_i32_2 = arith.constant 0 : i32
    return %c0_i32, %c0_i32_0, %c0_i32_1 : i32, i32, i32
  }
  func.func @transform_4(%arg0: i32) -> (i32, i32) {
    %c0_i32 = arith.constant 0 : i32
    %c0_i32_0 = arith.constant 0 : i32
    %c0_i32_1 = arith.constant 0 : i32
    return %c0_i32, %c0_i32_0 : i32, i32
  }
  func.func @transform_5(%arg0: i32) -> (i32, i32, i32) {
    %c0_i32 = arith.constant 0 : i32
    %c0_i32_0 = arith.constant 0 : i32
    %c0_i32_1 = arith.constant 0 : i32
    return %arg0, %c0_i32, %c0_i32_0 : i32, i32, i32
  }
}

module attributes {stable_mosaic.version = 11 : i64} {
  func.func @_mlp_kernel(%arg0: i32, %arg1: memref<2x8192xbf16, #tpu.memory_space<vmem>>, %arg2: memref<8192x128xbf16, #tpu.memory_space<vmem>>, %arg3: memref<1x128xf32, #tpu.memory_space<vmem>>, %arg4: memref<128x4xbf16, #tpu.memory_space<vmem>>, %arg5: memref<1x4xf32, #tpu.memory_space<vmem>>, %arg6: memref<2x4xf32, #tpu.memory_space<vmem>>) attributes {dimension_semantics = [#tpu.dimension_semantics<arbitrary>], iteration_bounds = array<i64: 1>, scalar_prefetch = 0 : i64, scratch_operands = 0 : i64, tpu.core_type = #tpu.core_type<tc>, window_params = [{pipeline_mode = #tpu.pipeline_mode<synchronous>, transform_indices = @transform_0, window_bounds = array<i64: 2, 8192>}, {pipeline_mode = #tpu.pipeline_mode<synchronous>, transform_indices = @transform_1, window_bounds = array<i64: 8192, 128>}, {pipeline_mode = #tpu.pipeline_mode<synchronous>, transform_indices = @transform_2, window_bounds = array<i64: 1, 128>}, {pipeline_mode = #tpu.pipeline_mode<synchronous>, transform_indices = @transform_3, window_bounds = array<i64: 128, 4>}, {pipeline_mode = #tpu.pipeline_mode<synchronous>, transform_indices = @transform_4, window_bounds = array<i64: 1, 4>}, {pipeline_mode = #tpu.pipeline_mode<synchronous>, transform_indices = @transform_5, window_bounds = array<i64: 2, 4>}]} {
    %c0 = arith.constant 0 : index
    %c0_0 = arith.constant 0 : index
    %0 = vector.load %arg1[%c0, %c0_0] : memref<2x8192xbf16, #tpu.memory_space<vmem>>, vector<2x8192xbf16>
    %c0_1 = arith.constant 0 : index
    %c0_2 = arith.constant 0 : index
    %1 = vector.load %arg2[%c0_1, %c0_2] : memref<8192x128xbf16, #tpu.memory_space<vmem>>, vector<8192x128xbf16>
    %cst = arith.constant dense<0.000000e+00> : vector<2x128xf32>
    %2 = tpu.matmul %0, %1, %cst {dimension_numbers = #tpu.dot_dimension_numbers<[1], [0], [0], [1], [0, 0, 1, 1], [], []>} : vector<2x8192xbf16>, vector<8192x128xbf16>, vector<2x128xf32> -> vector<2x128xf32>
    %c0_3 = arith.constant 0 : index
    %c0_4 = arith.constant 0 : index
    %3 = vector.load %arg3[%c0_3, %c0_4] : memref<1x128xf32, #tpu.memory_space<vmem>>, vector<1x128xf32>
    %4 = vector.broadcast %3 : vector<1x128xf32> to vector<2x128xf32>
    %5 = arith.addf %2, %4 : vector<2x128xf32>
    %cst_5 = arith.constant 0.000000e+00 : f32
    %6 = vector.broadcast %cst_5 : f32 to vector<2x128xf32>
    %7 = arith.maximumf %5, %6 : vector<2x128xf32>
    %8 = arith.truncf %7 : vector<2x128xf32> to vector<2x128xbf16>
    %c0_6 = arith.constant 0 : index
    %c0_7 = arith.constant 0 : index
    %9 = vector.load %arg4[%c0_6, %c0_7] : memref<128x4xbf16, #tpu.memory_space<vmem>>, vector<128x4xbf16>
    %cst_8 = arith.constant dense<0.000000e+00> : vector<2x4xf32>
    %10 = tpu.matmul %8, %9, %cst_8 {dimension_numbers = #tpu.dot_dimension_numbers<[1], [0], [0], [1], [0, 0, 1, 1], [], []>} : vector<2x128xbf16>, vector<128x4xbf16>, vector<2x4xf32> -> vector<2x4xf32>
    %c0_9 = arith.constant 0 : index
    %c0_10 = arith.constant 0 : index
    %11 = vector.load %arg5[%c0_9, %c0_10] : memref<1x4xf32, #tpu.memory_space<vmem>>, vector<1x4xf32>
    %12 = vector.broadcast %11 : vector<1x4xf32> to vector<2x4xf32>
    %13 = arith.addf %10, %12 : vector<2x4xf32>
    %c0_11 = arith.constant 0 : index
    %c0_12 = arith.constant 0 : index
    %14 = vector.load %arg6[%c0_11, %c0_12] : memref<2x4xf32, #tpu.memory_space<vmem>>, vector<2x4xf32>
    tpu.vector_store %arg6[%c0_11, %c0_12], %13 {strides = array<i32>} : memref<2x4xf32, #tpu.memory_space<vmem>>, vector<2x4xf32>,
    return
  }
  func.func @transform_0(%arg0: i32) -> (i32, i32) {
    %c0_i32 = arith.constant 0 : i32
    %c0_i32_0 = arith.constant 0 : i32
    %c0_i32_1 = arith.constant 0 : i32
    return %c0_i32, %c0_i32_0 : i32, i32
  }
  func.func @transform_1(%arg0: i32) -> (i32, i32) {
    %c0_i32 = arith.constant 0 : i32
    %c0_i32_0 = arith.constant 0 : i32
    %c0_i32_1 = arith.constant 0 : i32
    return %c0_i32, %c0_i32_0 : i32, i32
  }
  func.func @transform_2(%arg0: i32) -> (i32, i32) {
    %c0_i32 = arith.constant 0 : i32
    %c0_i32_0 = arith.constant 0 : i32
    %c0_i32_1 = arith.constant 0 : i32
    return %c0_i32, %c0_i32_0 : i32, i32
  }
  func.func @transform_3(%arg0: i32) -> (i32, i32) {
    %c0_i32 = arith.constant 0 : i32
    %c0_i32_0 = arith.constant 0 : i32
    %c0_i32_1 = arith.constant 0 : i32
    return %c0_i32, %c0_i32_0 : i32, i32
  }
  func.func @transform_4(%arg0: i32) -> (i32, i32) {
    %c0_i32 = arith.constant 0 : i32
    %c0_i32_0 = arith.constant 0 : i32
    %c0_i32_1 = arith.constant 0 : i32
    return %c0_i32, %c0_i32_0 : i32, i32
  }
  func.func @transform_5(%arg0: i32) -> (i32, i32) {
    %c0_i32 = arith.constant 0 : i32
    %c0_i32_0 = arith.constant 0 : i32
    %c0_i32_1 = arith.constant 0 : i32
    return %c0_i32, %c0_i32_0 : i32, i32
  }
}

</mosaic_0001>

<bundles_post_ra>
// kernel: forward.2
= control target key start
LH: loop header
LB: loop body
LE: loop exit
PB: predicated region body
PF: predicated region fallthrough
CT: control target
= control target key end

     0   :  { %10 = vsyncpa [#allocation3], 0  ;;  %s7804_s0 = inlined_call_operand.vmem [shape: bf16[2,256,32], index: 0, kind: input, shape index: {}]   ;;  %s7805_s1 = inlined_call_operand.hbm [shape: bf16[32,64], index: 1, kind: input, shape index: {}]   ;;  %s7806_s2 = inlined_call_operand.hbm [shape: f32[1,64], index: 2, kind: input, shape index: {}]   ;;  %s7807_s3 = inlined_call_operand.hbm [shape: bf16[9,64,128], index: 3, kind: input, shape index: {}]   ;;  %s7808_s4 = inlined_call_operand.hbm [shape: f32[1,128], index: 4, kind: input, shape index: {}]   ;;  %s7809_s5 = inlined_call_operand.vmem [shape: bf16[2,64,128], index: 5, kind: output, shape index: {}]  }
   0x1   :  { %11 = vsyncpa [#allocation5], 0 }
   0x2   :  { %12 = vsyncpa [#allocation8], 0  ;;  %s5556_s18 = smov 0  }
   0x3 LB: > { %s5517_s19 = smov [#allocation4]   ;;  %s5562_s21 = sadd.s32 4294967295, %s5515_s18   ;;  %s5515_s18 = sphi %s5556_s18, %s18_s18  }
   0x4   : > { %s185_s20 = sshll.u32 %s5517_s19, 4  ;;  %p4377_p0 = scmp.ge.s32.totalorder %s5515_s18, 1  ;;  %s186_s20 = int_to_ptr.vmem [resolvable:$true] %s185_s20 }
   0x5   : > { %p159_p1 = scmp.lt.s32.totalorder %s5515_s18, 3  ;;  %p5314_p2 = scmp.eq.s32.totalorder %s5562_s21, 0 }
   0x6   : > { %s5518_s23 = smov [#allocation2]   ;;  %s5519_s26 = smov [#allocation6]  }
   0x7   : > { %p5567_p3 = pnand %p4377_p0, %p159_p1  ;;  %s171_s24 = sshll.u32 %s5518_s23, 4  ;;  %s5573_s24 = int_to_ptr.vmem [resolvable:$true] %s171_s24 }
   0x8   : > { %s195_s27 = sshll.u32 %s5519_s26, 4  ;;  %s5520_s28 = smov [#allocation7]   ;;  %s5581_s27 = int_to_ptr.vmem [resolvable:$true] %s195_s27 }
   0x9   : > { %p5301_p4 = pneg %p5567_p3  ;;  %s5583_s29 = sshll.u32 %s5520_s28, 4  ;;  %s210_s29 = int_to_ptr.vmem [resolvable:$true] %s5583_s29 }
   0xa   : > { %s5404_s30 = scalar_lea.vmem %s186_s20, 16  ;;  %s5411_s6 = scalar_lea.vmem %s186_s20, 32 }
   0xb   : > { %p5577_p5 = pnand %p5314_p2, %p5301_p4  ;;  %p5405_p7 = scmp.ne.s32.totalorder %s186_s20, %s5404_s30 }
   0xc   : > { %p5412_p10 = scmp.lt.s32.totalorder %s186_s20, %s186_s20  ;;  %p5413_p11 = scmp.lt.s32.totalorder %s5411_s6, %s5404_s30 }
   0xd   : > { %p5395_p6 = pneg %p5577_p5 }
   0xe   : > { %p5414_p12 = por %p5413_p11, %p5412_p10 }
   0xf   : > { %p5407_p8 = pnand %p5405_p7, %p5395_p6 }
  0x11   : > { %p5408_p9 = pneg %p5407_p8 }
  0x13   : > { %p5415_p13 = pnand %p5414_p12, %p5408_p9 }
  0x15   : > { %5418 = shalt.err (!%p5415_p13)
}
  0x16   : > { %5307 = dma.hbm_to_vmem [thread:$0]  (!%p5577_p5), %s7806_s2, 16, %s186_s20, [#allocation5]  }
  0x17   : > { %s5430_s9 = scalar_lea.vmem %s5573_s24, 256  ;;  %p5438_p7 = scmp.lt.s32.totalorder %s5573_s24, %s5573_s24 }
  0x18   : > { %p5431_p0 = scmp.ne.s32.totalorder %s5573_s24, %s5430_s9  ;;  %p5439_p8 = scmp.lt.s32.totalorder %s5430_s9, %s5430_s9 }
  0x1a   : > { %p5433_p1 = pnand %p5431_p0, %p5395_p6  ;;  %p5440_p9 = por %p5439_p8, %p5438_p7 }
  0x1c   : > { %p5434_p4 = pneg %p5433_p1 }
  0x1e   : > { %p5441_p10 = pnand %p5440_p9, %p5434_p4 }
  0x20   : > { %5444 = shalt.err (!%p5441_p10)
}
  0x21   : > { %s5521_s10 = smov 64   ;;  %s5522_s11 = smov 4  }
  0x22   : > { %5304 = dma.hbm_to_vmem [thread:$0]  (!%p5577_p5), %s7805_s1, 256, %s5573_s24, [#allocation3], %s5521_s10, %s5521_s10, %s5522_s11  }
  0x23   : > { %s5456_s14 = scalar_lea.vmem %s5581_s27, 4608  ;;  %p5464_p0 = scmp.lt.s32.totalorder %s5581_s27, %s5581_s27 }
  0x24   : > { %p5457_p11 = scmp.ne.s32.totalorder %s5581_s27, %s5456_s14  ;;  %p5465_p1 = scmp.lt.s32.totalorder %s5456_s14, %s5456_s14 }
  0x26   : > { %p5459_p12 = pnand %p5457_p11, %p5395_p6  ;;  %p5466_p4 = por %p5465_p1, %p5464_p0 }
  0x28   : > { %p5460_p13 = pneg %p5459_p12 }
  0x2a   : > { %p5467_p7 = pnand %p5466_p4, %p5460_p13 }
  0x2c   : > { %5470 = shalt.err (!%p5467_p7)
}
  0x2d   : > { %5310 = dma.hbm_to_vmem [thread:$0]  (!%p5577_p5), %s7807_s3, 4608, %s5581_s27, [#allocation5], %s5521_s10, %s5521_s10, %s5522_s11  }
  0x2e   : > { %s5482_s17 = scalar_lea.vmem %s210_s29, 16  ;;  %s5489_s19 = scalar_lea.vmem %s210_s29, 32 }
  0x2f   : > { %p5483_p8 = scmp.ne.s32.totalorder %s210_s29, %s5482_s17  ;;  %p5490_p11 = scmp.lt.s32.totalorder %s210_s29, %s210_s29 }
  0x30   : > { %p5491_p12 = scmp.lt.s32.totalorder %s5489_s19, %s5482_s17 }
  0x31   : > { %p5485_p9 = pnand %p5483_p8, %p5395_p6 }
  0x32   : > { %p5492_p13 = por %p5491_p12, %p5490_p11 }
  0x33   : > { %p5486_p10 = pneg %p5485_p9 }
  0x35   : > { %p5493_p0 = pnand %p5492_p13, %p5486_p10 }
  0x37   : > { %5496 = shalt.err (!%p5493_p0)
}
  0x38   : > { %5313 = dma.hbm_to_vmem [thread:$0]  (!%p5577_p5), %s7808_s4, 16, %s210_s29, [#allocation8]  }
  0x39   : > { %230 = sbr.rel (%p5567_p3) target bundleno = 1081 (0x439), region = 40 }
  0x3e   : > { %5502 = dma.done.wait (%p5314_p2), [#allocation3], 256  }
  0x3f   : > { %5504 = vsyncadd (%p5314_p2), [#allocation3], 4294967040 }
  0x40   : > { %5506 = dma.done.wait (%p5314_p2), [#allocation5], 4624  }
  0x41   : > { %5508 = vsyncadd (%p5314_p2), [#allocation5], 4294962672 }
  0x42   : > { %5510 = dma.done.wait (%p5314_p2), [#allocation8], 16  }
  0x43   : > { %5512 = vsyncadd (%p5314_p2), [#allocation8], 4294967280  ;;  %p270_p3 = scmp.lt.s32.totalorder %s5562_s21, 1  ;;  %v5339_v0 = vld [vmem:[#allocation2 + $0x8] sm:$0xff]   ;;  %v5340_v1 = vld [vmem:[#allocation2] sm:$0xff]   ;;  %vm416_vm0 = vcmask 261120   ;;  %v7810_v29 = vlaneseq }
  0x44   : > { %4865 = vmatprep.subr.bf16.mxu0 %v5339_v0  ;;  %v5357_v7 = vld [vmem:[#allocation6 + $0x38] sm:$0xff]   ;;  %v5359_v20 = vld [vmem:[#allocation6 + $0x30] sm:$0xff]   ;;  %v5361_v22 = vld [vmem:[#allocation6 + $0x28] sm:$0xff]   ;;  %v7811_v26 = vmov 0.0|0.0   ;;  %vm7879_vm2 = vcmask 1040384   ;;  %vm7871_vm3 = vcmask 523264  }
  0x45   : > { %s8593_s21 = smov (!%p270_p3, %s5562_s21), 1  ;;  %4866 = vmatpush3.bf16.msra.mxu0 %v5339_v0  ;;  %4901 = vmatprep.subr.bf16.mxu1 %v5357_v7  ;;  %v5358_v19 = vld [vmem:[#allocation6 + $0x18] sm:$0xff]   ;;  %v5360_v21 = vld [vmem:[#allocation6 + $0x10] sm:$0xff]   ;;  %v5362_v23 = vld [vmem:[#allocation6 + $0x8] sm:$0xff]   ;;  %v5695_v30 = vshrl.u32 %v7810_v29, 7  ;;  %v8025_v63 = vmov 0 }
  0x46   : > { %s4622_s22 = sshll.u32 %s8593_s21, 7  ;;  %4867 = vmatprep.subr.bf16.mxu0 %v5340_v1  ;;  %4902 = vmatpush3.bf16.msra.mxu1 %v5357_v7  ;;  %v5363_v24 = vld [vmem:[#allocation6 + $0x20] sm:$0xff]   ;;  %v5688_v27 = vld [vmem:[#allocation6 + $0x58] sm:$0xff]   ;;  %vm7873_vm11 = vcmask 1046528   ;;  %s4623_s27 = sshll.u32 %s8593_s21, 5 }
  0x47   : > { %s5652_s26 = scalar_lea.vmem %s7804_s0, %s4622_s22  ;;  %4903 = vmatprep.subr.bf16.mxu1 %v5359_v20  ;;  %v5364_v25 = vld [vmem:[#allocation6] sm:$0xff]   ;;  %4909 = vmatprep.mubr.bf16.mxu1 %v7811_v26  ;;  %v5691_v28 = vld [vmem:[#allocation6 + $0x78] sm:$0xff]   ;;  %8015 = vst [vmem:[#allocation12_spill] sm:$0xff] %v5695_v30  ;;  %v5698_v31 = vadd.s32 16, %v5695_v30  ;;  %v5702_v34 = vadd.s32 32, %v5695_v30  ;;  %v5707_v37 = vadd.s32 24, %v5695_v30  ;;  %s279_s30 = scalar_lea.vmem %s7809_s5, %s4623_s27 }
  0x48   : > { %v5341_v2 = vld [vmem:[%s5652_s26] sm:$0xff]   ;;  %v5342_v3 = vld [vmem:[%s5652_s26 + $0x8] sm:$0xff]   ;;  %v5343_v4 = vld [vmem:[%s5652_s26 + $0x10] sm:$0xff]   ;;  %v5715_v40 = vadd.s32 48, %v5695_v30  ;;  %v667_v43 = vadd.s32 64, %v5695_v30  ;;  %v5720_v44 = vadd.s32 8, %v5695_v30 }
  0x49   : > { %4869 = vmatprep.mubr.msk.bf16.mxu0 %vm416_vm0, %v5341_v2  ;;  %4868 = vmatpush3.bf16.msra.mxu0 %v5340_v1  ;;  %v5344_v5 = vld [vmem:[%s5652_s26 + $0x18] sm:$0xff]   ;;  %v5345_v6 = vld [vmem:[%s5652_s26 + $0x20] sm:$0xff]   ;;  %v5346_v8 = vld [vmem:[%s5652_s26 + $0x28] sm:$0xff]   ;;  %8016 = vst [vmem:[#allocation13_spill] sm:$0xff] %v5698_v31  ;;  %v709_v32 = vand.u32 15, %v5698_v31  ;;  %v723_v42 = vand.u32 15, %v5702_v34 }
  0x4a   : > { %v5347_v9 = vld [vmem:[%s5652_s26 + $0x30] sm:$0xff]   ;;  %v5348_v10 = vld [vmem:[%s5652_s26 + $0x38] sm:$0xff]   ;;  %v5349_v11 = vld [vmem:[%s5652_s26 + $0x40] sm:$0xff]   ;;  %4941 = vmatprep.subr.bf16.mxu0 %v5358_v19  ;;  %4904 = vmatpush3.bf16.msra.mxu1 %v5359_v20  ;;  %8017 = vst [vmem:[#allocation14_spill] sm:$0xff] %v5702_v34  ;;  %v5723_v45 = vadd.s32 40, %v5695_v30  ;;  %v5729_v48 = vadd.s32 80, %v5695_v30 }
  0x4b   : > { %v5350_v12 = vld [vmem:[%s5652_s26 + $0x48] sm:$0xff]   ;;  %v5351_v13 = vld [vmem:[%s5652_s26 + $0x50] sm:$0xff]   ;;  %v5352_v14 = vld [vmem:[%s5652_s26 + $0x58] sm:$0xff]   ;;  %4905 = vmatprep.subr.bf16.mxu1 %v5361_v22  ;;  %8018 = vst [vmem:[#allocation15_spill] sm:$0xff] %v5707_v37  ;;  %vm5710_vm1 = vcmp.ge.s32.totalorder %v709_v32, 1  ;;  %v5732_v49 = vadd.s32 96, %v5695_v30 }
  0x4c   : > { %4870 = vmatmul.mubr.msk.bf16.vlgmr.msra.gmra.mxu0 %vm416_vm0, %v5342_v3  ;;  %v5353_v15 = vld [vmem:[%s5652_s26 + $0x60] sm:$0xff]   ;;  %v5354_v16 = vld [vmem:[%s5652_s26 + $0x68] sm:$0xff]   ;;  %v5355_v17 = vld [vmem:[%s5652_s26 + $0x70] sm:$0xff]   ;;  %8021 = vst [vmem:[#allocation16_spill] sm:$0xff] %v5715_v40  ;;  %v5736_v52 = vadd.s32 112, %v5695_v30  ;;  %v5739_v53 = vadd.s32 56, %v5695_v30 }
  0x4d   : > { %4873 = vmatprep.mubr.msk.bf16.mxu0 %vm416_vm0, %v5343_v4  ;;  %v5356_v18 = vld [vmem:[%s5652_s26 + $0x78] sm:$0xff]   ;;  %4942 = vmatpush3.bf16.msra.mxu0 %v5358_v19  ;;  %v5704_v35 = vld [vmem:[#allocation4] ss:$0 sm:$0xff]  ;;  %8022 = vst [vmem:[#allocation17_spill] sm:$0xff] %v5720_v44  ;;  %8023 = vst [vmem:[#allocation18_spill] sm:$0xff] %v5723_v45  ;;  %v737_v57 = vand.u32 15, %v5715_v40 }
  0x4e   : > { %4943 = vmatprep.subr.bf16.mxu0 %v5360_v21  ;;  %4906 = vmatpush3.bf16.msra.mxu1 %v5361_v22  ;;  %8024 = vst [vmem:[#allocation19_spill] sm:$0xff] %v5739_v53  ;;  %vm5750_vm4 = vcmp.ge.s32.totalorder %v723_v42, 1  ;;  %v751_v0 = vand.u32 15, %v667_v43  ;;  %v765_v1 = vand.u32 15, %v5729_v48  ;;  %v779_v2 = vand.u32 15, %v5732_v49  ;;  %v5929_v40 = vld [vmem:[#allocation6 + $0x98] sm:$0xff]  }
  0x4f   : > { %4907 = vmatprep.subr.bf16.mxu1 %v5363_v24  ;;  %v8026_v63 = vsel %vm5750_vm4, 4294967295, %v8025_v63  ;;  %vm5769_vm5 = vcmp.ge.s32.totalorder %v737_v57, 1  ;;  %v5793_v22 = vadd.s32 160, %v5695_v30  ;;  %v5804_v32 = vadd.s32 176, %v5695_v30  ;;  %v5369_v57 = vld [vmem:[#allocation6 + $0x48] sm:$0xff]   ;;  %8051 = vst [vmem:[#allocation36_spill] sm:$0xff] %v5929_v40 }
  0x50   : > { %8027 = vst [vmem:[#allocation20_spill] sm:$0xff] %v8026_v63  ;;  %vm5815_vm6 = vcmp.ge.s32.totalorder %v751_v0, 1  ;;  %v8033_v43 = vmov 0  ;;  %vm5839_vm7 = vcmp.ge.s32.totalorder %v765_v1, 1  ;;  %v5850_v29 = vadd.s32 208, %v5695_v30 }
  0x51   : > { %4944 = vmatpush3.bf16.msra.mxu0 %v5360_v21  ;;  %v8034_v43 = vsel %vm5815_vm6, 4294967295, %v8033_v43  ;;  %v5853_v1 = vadd.s32 88, %v5695_v30  ;;  %vm5875_vm8 = vcmp.ge.s32.totalorder %v779_v2, 1  ;;  %v5937_v31 = vadd.s32 120, %v5695_v30 }
  0x52   : > { %4945 = vmatprep.subr.bf16.mxu0 %v5362_v23  ;;  %4908 = vmatpush3.bf16.msra.mxu1 %v5363_v24  ;;  %8035 = vst [vmem:[#allocation24_spill] sm:$0xff] %v8034_v43  ;;  %v8054_v43 = vand.u32 15, %v5736_v52 }
  0x53   : > { %4981 = vmatprep.subr.bf16.mxu1 %v5688_v27 }
  0x54   : > { %4874 = vmatmul.mubr.msk.bf16.gmra.mxu0 %vm416_vm0, %v5344_v5  ;;  %v5914_v5 = vadd.s32 224, %v5695_v30  ;;  %vm5948_vm9 = vcmp.ge.s32.totalorder %v8054_v43, 1  ;;  %v8061_v43 = vmov 0 }
  0x55   : > { %4877 = vmatprep.mubr.msk.bf16.mxu0 %vm416_vm0, %v5345_v6  ;;  %4946 = vmatpush3.bf16.msra.mxu0 %v5362_v23  ;;  %v5760_v6 = vadd.s32 128, %v5695_v30 }
  0x56   : > { %4947 = vmatprep.subr.bf16.mxu0 %v5364_v25 }
  0x57   : > { %v8060_v52 = vand.u32 15, %v5760_v6 }
  0x59   : > { %4948 = vmatpush3.bf16.msra.mxu0 %v5364_v25  ;;  %vm5964_vm10 = vcmp.ge.s32.totalorder %v8060_v52, 1  ;;  %v6017_v52 = vadd.s32 168, %v5695_v30 }
  0x5a   : > { %5021 = vmatprep.subr.bf16.mxu0 %v5691_v28  ;;  %v8062_v43 = vsel %vm5964_vm10, 4294967295, %v8061_v43 }
  0x5b   : > { %8063 = vst [vmem:[#allocation42_spill] sm:$0xff] %v8062_v43  ;;  %8069 = vst [vmem:[#allocation48_spill] sm:$0xff] %v6017_v52 }
  0x5c   : > { %4878 = vmatmul.mubr.msk.bf16.gmra.mxu0 %vm416_vm0, %v5346_v8 }
  0x5d   : > { %4881 = vmatprep.mubr.msk.bf16.mxu0 %vm416_vm0, %v5347_v9 }
  0x64   : > { %4882 = vmatmul.mubr.msk.bf16.gmra.mxu0 %vm416_vm0, %v5348_v10 }
  0x65   : > { %4885 = vmatprep.mubr.msk.bf16.mxu0 %vm416_vm0, %v5349_v11  ;;  %v8028_v11 = vmov 0 }
  0x66   : > { %v8029_v11 = vsel %vm5769_vm5, 4294967295, %v8028_v11 }
  0x67   : > { %8030 = vst [vmem:[#allocation21_spill] sm:$0xff] %v8029_v11 }
  0x6c   : > { %4886 = vmatmul.mubr.msk.bf16.gmra.mxu0 %vm416_vm0, %v5350_v12  ;;  %v5774_v12 = vadd.s32 144, %v5695_v30 }
  0x6d   : > { %4889 = vmatprep.mubr.msk.bf16.mxu0 %vm416_vm0, %v5351_v13 }
  0x74   : > { %4890 = vmatmul.mubr.msk.bf16.gmra.mxu0 %vm416_vm0, %v5352_v14 }
  0x75   : > { %4893 = vmatprep.mubr.msk.bf16.mxu0 %vm416_vm0, %v5353_v15 }
  0x7c   : > { %4894 = vmatmul.mubr.msk.bf16.gmra.mxu0 %vm416_vm0, %v5354_v16 }
  0x7d   : > { %4897 = vmatprep.mubr.msk.bf16.mxu0 %vm416_vm0, %v5355_v17  ;;  %v5366_v17 = vld [vmem:[#allocation6 + $0x50] sm:$0xff]  }
  0x84   : > { %4898 = vmatmul.mubr.msk.bf16.gmra.mxu0 %vm416_vm0, %v5356_v18  ;;  %v5783_v18 = vadd.s32 72, %v5695_v30 }
  0x85   : > { %4949 = vmatprep.mubr.bf16.mxu0 %v7811_v26 }
 0x10c   : > { %v4871_v33 = vpop.f32.mrf.mxu0 }
 0x10d   : > { %v508_v54 = vadd.f32 %v4871_v33, %v5704_v35  ;;  %v5807_v33 = vadd.s32 192, %v5695_v30 }
 0x10e   : > { %v499_v36 = vpop.f32.mrf.mxu0 }
 0x10f   : > { %v500_v38 = vadd.f32 %v5704_v35, %v499_v36  ;;  %v5763_v8 = vmax.f32 %v508_v54, 0.0 }
 0x110   : > { %v4872_v41 = vpop.f32.mrf.mxu0 }
 0x111   : > { %v5725_v46 = vmax.f32 %v500_v38, 0.0  ;;  %v511_v47 = vadd.f32 %v4872_v41, %v5704_v35  ;;  %v1173_v36 = vrot.slane %v5763_v8, 7 }
 0x112   : > { %v502_v50 = vpop.f32.mrf.mxu0 }
 0x113   : > { %v1170_v55 = vrot.slane %v5725_v46, 7  ;;  %v503_v56 = vadd.f32 %v5704_v35, %v502_v50  ;;  %v5748_v62 = vmax.f32 %v511_v47, 0.0  ;;  %v5368_v47 = vld [vmem:[#allocation6 + $0x70] sm:$0xff]  }
 0x114   : > { %v4875_v58 = vpop.f32.mrf.mxu0 }
 0x115   : > { %v5756_v3 = vmax.f32 %v503_v56, 0.0  ;;  %v5766_v9 = vsel %vm7879_vm2, 0.0, %v1170_v55  ;;  %v524_v15 = vadd.f32 %v4875_v58, %v5704_v35  ;;  %v5787_v19 = vpack.c.bf16 %v5748_v62, %v5763_v8  ;;  %v5371_v56 = vld [vmem:[#allocation6 + $0x40] sm:$0xff]  }
 0x116   : > { %v515_v4 = vpop.f32.mrf.mxu0  ;;  %v1260_v23 = vsel %vm5710_vm1, %v5766_v9, 0.0  ;;  %v1175_v38 = vrot.slane %v5748_v62, 7 }
 0x117   : > { %v516_v10 = vadd.f32 %v5704_v35, %v515_v4  ;;  %v1171_v13 = vrot.slane %v5756_v3, 7  ;;  %v5779_v14 = vpack.c.bf16 %v5756_v3, %v5725_v46  ;;  %8032 = vst [vmem:[#allocation23_spill] sm:$0xff] %v5787_v19  ;;  %v5820_v48 = vmax.f32 %v524_v15, 0.0 }
 0x118   : > { %v4876_v16 = vpop.f32.mrf.mxu0  ;;  %v5857_v26 = vsel %vm7879_vm2, %v1173_v36, %v1175_v38 }
 0x119   : > { %8031 = vst [vmem:[#allocation22_spill] sm:$0xff] %v5779_v14  ;;  %v5789_v20 = vmax.f32 %v516_v10, 0.0  ;;  %v527_v21 = vadd.f32 %v4876_v16, %v5704_v35  ;;  %v5799_v24 = vsel %vm7879_vm2, %v1170_v55, %v1171_v13  ;;  %4910 = vmatmul.mubr.msk.bf16.vlgmr.msra.gmra.mxu1 %vm7871_vm3, %v5779_v14  ;;  %8036 = vst [vmem:[#allocation25_spill] sm:$0xff] %v5820_v48  ;;  %v8091_v43 = vrot.slane %v5820_v48, 1 }
 0x11a   : > { %v518_v25 = vpop.f32.mrf.mxu0  ;;  %v1291_v41 = vpack.c.bf16 %v5799_v24, %v1260_v23  ;;  %4913 = vmatprep.mubr.msk.bf16.mxu1 %vm7871_vm3, %v5787_v19  ;;  %4982 = vmatpush3.bf16.msra.mxu1 %v5688_v27  ;;  %v5832_v27 = vsel %vm7879_vm2, %v1171_v13, %v1173_v36  ;;  %v8038_v23 = vmov 0  ;;  %8041 = vst [vmem:[#allocation28_spill] sm:$0xff] %v5857_v26 }
 0x11b   : > { %v1177_v42 = vrot.slane %v5789_v20, 7  ;;  %v519_v50 = vadd.f32 %v5704_v35, %v518_v25  ;;  %4983 = vmatprep.subr.bf16.mxu1 %v5366_v17  ;;  %v5828_v0 = vmax.f32 %v527_v21, 0.0  ;;  %8037 = vst [vmem:[#allocation26_spill] sm:$0xff] %v5832_v27  ;;  %v8039_v23 = vsel %vm5839_vm7, 4294967295, %v8038_v23 }
 0x11c   : > { %v4879_v54 = vpop.f32.mrf.mxu0  ;;  %4950 = vmatmul.mubr.msk.bf16.vlgmr.msra.gmra.mxu0 %vm7871_vm3, %v1291_v41  ;;  %8040 = vst [vmem:[#allocation27_spill] sm:$0xff] %v8039_v23  ;;  %v5978_v23 = vadd.s32 136, %v5695_v30 }
 0x11d   : > { %v5826_v58 = vsel %vm7879_vm2, %v1175_v38, %v1177_v42  ;;  %v540_v15 = vadd.f32 %v4879_v54, %v5704_v35  ;;  %5022 = vmatpush3.bf16.msra.mxu0 %v5691_v28  ;;  %v5846_v13 = vmax.f32 %v519_v50, 0.0  ;;  %v1181_v54 = vrot.slane %v5820_v48, 7 }
 0x11e   : > { %v3108_v10 = vsel %vm5710_vm1, %v5826_v58, 0.0  ;;  %v531_v16 = vpop.f32.mrf.mxu0  ;;  %4984 = vmatpush3.bf16.msra.mxu1 %v5366_v17  ;;  %5023 = vmatprep.subr.bf16.mxu0 %v5368_v47  ;;  %v1262_v28 = vsel %vm5750_vm4, %v5832_v27, 0.0  ;;  %v1183_v17 = vrot.slane %v5828_v0, 7  ;;  %v5866_v7 = vpack.c.bf16 %v5828_v0, %v5820_v48  ;;  %8066 = vst [vmem:[#allocation45_spill] sm:$0xff] %v5978_v23 }
 0x11f   : > { %v532_v50 = vadd.f32 %v5704_v35, %v531_v16  ;;  %4985 = vmatprep.subr.bf16.mxu1 %v5369_v57  ;;  %v1179_v61 = vrot.slane %v5846_v13, 7  ;;  %v5871_v36 = vpack.c.bf16 %v5846_v13, %v5789_v20  ;;  %v8044_v38 = vmov 0  ;;  %v5370_v16 = vld [vmem:[#allocation6 + $0x68] sm:$0xff]  }
 0x120   : > { %v4880_v4 = vpop.f32.mrf.mxu0  ;;  %8042 = vst [vmem:[#allocation29_spill] sm:$0xff] %v5866_v7  ;;  %v8045_v38 = vsel %vm5875_vm8, 4294967295, %v8044_v38  ;;  %v5879_v60 = vmax.f32 %v540_v15, 0.0  ;;  %v1292_v41 = vpack.c.bf16 %v5857_v26, %v1262_v28  ;;  %v1264_v21 = vsel %vm5769_vm5, %v5826_v58, 0.0 }
 0x121   : > { %8043 = vst [vmem:[#allocation30_spill] sm:$0xff] %v5871_v36  ;;  %8046 = vst [vmem:[#allocation31_spill] sm:$0xff] %v8045_v38  ;;  %v5882_v25 = vmax.f32 %v532_v50, 0.0  ;;  %5024 = vmatpush3.bf16.msra.mxu0 %v5368_v47  ;;  %v543_v49 = vadd.f32 %v4880_v4, %v5704_v35  ;;  %4914 = vmatmul.mubr.msk.bf16.gmra.mxu1 %vm7871_vm3, %v5871_v36  ;;  %v5892_v15 = vsel %vm7879_vm2, %v1177_v42, %v1179_v61 }
 0x122   : > { %v534_v59 = vpop.f32.mrf.mxu0  ;;  %8047 = vst [vmem:[#allocation32_spill] sm:$0xff] %v5892_v15  ;;  %v5895_v28 = vsel %vm7879_vm2, %v1179_v61, %v1181_v54  ;;  %4953 = vmatprep.mubr.msk.bf16.mxu0 %vm7871_vm3, %v1292_v41  ;;  %4917 = vmatprep.mubr.msk.bf16.mxu1 %vm7871_vm3, %v5866_v7  ;;  %v1293_v4 = vpack.c.bf16 %v5892_v15, %v1264_v21  ;;  %v5911_v41 = vadd.s32 240, %v5695_v30  ;;  %v5927_v42 = vadd.s32 104, %v5695_v30 }
 0x123   : > { %v535_v2 = vadd.f32 %v5704_v35, %v534_v59  ;;  %8048 = vst [vmem:[#allocation33_spill] sm:$0xff] %v5895_v28  ;;  %v1185_v50 = vrot.slane %v5882_v25, 7  ;;  %v5903_v51 = vpack.c.bf16 %v5892_v15, %v3108_v10  ;;  %v5372_v59 = vld [vmem:[#allocation6 + $0x60] sm:$0xff]   ;;  %v5906_v55 = vmax.f32 %v543_v49, 0.0  ;;  %4986 = vmatpush3.bf16.msra.mxu1 %v5369_v57  ;;  %5025 = vmatprep.subr.bf16.mxu0 %v5370_v16 }
 0x124   : > { %v4883_v47 = vpop.f32.mrf.mxu0  ;;  %4954 = vmatmul.mubr.msk.bf16.gmra.mxu0 %vm7871_vm3, %v1293_v4  ;;  %v1266_v10 = vsel %vm5815_vm6, %v5895_v28, 0.0  ;;  %4987 = vmatprep.subr.bf16.mxu1 %v5371_v56  ;;  %v1189_v57 = vrot.slane %v5879_v60, 7  ;;  %v5934_v4 = vsel %vm7879_vm2, %v1181_v54, %v1183_v17  ;;  %v8055_v54 = vmov 0 }
 0x125   : > { %8049 = vst [vmem:[#allocation34_spill] sm:$0xff] %v5903_v51  ;;  %v5908_v61 = vmax.f32 %v535_v2, 0.0  ;;  %v5917_v21 = vsel %vm7879_vm2, %v1183_v17, %v1185_v50  ;;  %v5924_v2 = vadd.s32 248, %v5695_v30  ;;  %8052 = vst [vmem:[#allocation37_spill] sm:$0xff] %v5934_v4  ;;  %5026 = vmatpush3.bf16.msra.mxu0 %v5370_v16  ;;  %v1191_v51 = vrot.slane %v5906_v55, 7  ;;  %v5952_v17 = vld [vmem:[#allocation6 + $0xb8] sm:$0xff]  }
 0x126   : > { %8050 = vst [vmem:[#allocation35_spill] sm:$0xff] %v5917_v21  ;;  %v547_v49 = vpop.f32.mrf.mxu0  ;;  %v556_v36 = vadd.f32 %v4883_v47, %v5704_v35  ;;  %v1294_v19 = vpack.c.bf16 %v5934_v4, %v1266_v10  ;;  %v8056_v54 = vsel %vm5948_vm9, 4294967295, %v8055_v54  ;;  %5027 = vmatprep.subr.bf16.mxu0 %v5372_v59  ;;  %8058 = vst [vmem:[#allocation40_spill] sm:$0xff] %v5952_v17  ;;  %v1268_v47 = vsel %vm5839_vm7, %v5917_v21, 0.0  ;;  %v8213_v63 = vld [vmem:[#allocation45_spill] sm:$0xff] }
 0x127   : > { %v1187_v34 = vrot.slane %v5908_v61, 7  ;;  %v5942_v7 = vpack.c.bf16 %v5908_v61, %v5882_v25  ;;  %8057 = vst [vmem:[#allocation39_spill] sm:$0xff] %v8056_v54  ;;  %v548_v16 = vadd.f32 %v5704_v35, %v547_v49  ;;  %4988 = vmatpush3.bf16.msra.mxu1 %v5371_v56  ;;  %v5970_v10 = vpack.c.bf16 %v5906_v55, %v5879_v60 }
 0x128   : > { %v4884_v14 = vpop.f32.mrf.mxu0  ;;  %4957 = vmatprep.mubr.msk.bf16.mxu0 %vm7871_vm3, %v1294_v19  ;;  %5061 = vmatprep.subr.bf16.mxu1 %v5929_v40  ;;  %v8081_v21 = vmov 0 }
 0x129   : > { %8053 = vst [vmem:[#allocation38_spill] sm:$0xff] %v5942_v7  ;;  %v559_v11 = vadd.f32 %v4884_v14, %v5704_v35  ;;  %v5957_v28 = vsel %vm7879_vm2, %v1185_v50, %v1187_v34  ;;  %8064 = vst [vmem:[#allocation43_spill] sm:$0xff] %v5970_v10  ;;  %v5975_v49 = vsel %vm7879_vm2, %v1187_v34, %v1189_v57  ;;  %v5981_v6 = vmax.f32 %v548_v16, 0.0 }
 0x12a   : > { %8059 = vst [vmem:[#allocation41_spill] sm:$0xff] %v5957_v28  ;;  %v550_v14 = vpop.f32.mrf.mxu0  ;;  %v1295_v50 = vpack.c.bf16 %v5957_v28, %v1268_v47  ;;  %8065 = vst [vmem:[#allocation44_spill] sm:$0xff] %v5975_v49  ;;  %4918 = vmatmul.mubr.msk.bf16.gmra.mxu1 %vm7871_vm3, %v5942_v7  ;;  %5028 = vmatpush3.bf16.msra.mxu0 %v5372_v59  ;;  %v5988_v47 = vmax.f32 %v556_v36, 0.0  ;;  %v1270_v16 = vsel %vm5875_vm8, %v5975_v49, 0.0  ;;  %v8080_v49 = vand.u32 15, %v5793_v22 }
 0x12b   : > { %v551_v56 = vadd.f32 %v5704_v35, %v550_v14  ;;  %4921 = vmatprep.mubr.msk.bf16.mxu1 %vm7871_vm3, %v5970_v10  ;;  %5101 = vmatprep.subr.bf16.mxu0 %v5952_v17  ;;  %v1193_v14 = vrot.slane %v5981_v6, 7  ;;  %v5999_v59 = vmax.f32 %v559_v11, 0.0  ;;  %v6002_v36 = vsel %vm7879_vm2, %v1189_v57, %v1191_v51 }
 0x12c   : > { %v4887_v34 = vpop.f32.mrf.mxu0  ;;  %8067 = vst [vmem:[#allocation46_spill] sm:$0xff] %v6002_v36  ;;  %4958 = vmatmul.mubr.msk.bf16.gmra.mxu0 %vm7871_vm3, %v1295_v50  ;;  %v1296_v28 = vpack.c.bf16 %v6002_v36, %v1270_v16  ;;  %v6014_v57 = vadd.s32 152, %v5695_v30  ;;  %v8071_v50 = vmov 0  ;;  %v1197_v16 = vrot.slane %v5988_v47, 7 }
 0x12d   : > { %v6005_v19 = vmax.f32 %v551_v56, 0.0  ;;  %v572_v17 = vadd.f32 %v4887_v34, %v5704_v35  ;;  %v8070_v56 = vand.u32 15, %v5707_v37  ;;  %v6027_v38 = vsel %vm7879_vm2, %v1191_v51, %v1193_v14 }
 0x12e   : > { %v563_v10 = vpop.f32.mrf.mxu0  ;;  %8068 = vst [vmem:[#allocation47_spill] sm:$0xff] %v6014_v57  ;;  %8074 = vst [vmem:[#allocation50_spill] sm:$0xff] %v6027_v38  ;;  %4961 = vmatprep.mubr.msk.bf16.mxu0 %vm7871_vm3, %v1296_v28  ;;  %v8076_v37 = vand.u32 15, %v5774_v12  ;;  %v1199_v36 = vrot.slane %v5999_v59, 7  ;;  %vm6047_vm14 = vcmp.ge.s32.totalorder %v8080_v49, 1  ;;  %v6052_v28 = vadd.s32 184, %v5695_v30 }
 0x12f   : > { %v564_v11 = vadd.f32 %v5704_v35, %v563_v10  ;;  %vm6021_vm12 = vcmp.lt.s32.totalorder %v8070_v56, 15  ;;  %v1195_v34 = vrot.slane %v6005_v19, 7  ;;  %v6032_v10 = vpack.c.bf16 %v6005_v19, %v5981_v6 }
 0x130   : > { %v8072_v50 = vsel %vm6021_vm12, 4294967295, %v8071_v50  ;;  %v4888_v7 = vpop.f32.mrf.mxu0  ;;  %vm6037_vm13 = vcmp.ge.s32.totalorder %v8076_v37, 1  ;;  %v8077_v56 = vmov 0  ;;  %v8082_v21 = vsel %vm6047_vm14, 4294967295, %v8081_v21  ;;  %8084 = vst [vmem:[#allocation54_spill] sm:$0xff] %v6052_v28 }
 0x131   : > { %8073 = vst [vmem:[#allocation49_spill] sm:$0xff] %v8072_v50  ;;  %8075 = vst [vmem:[#allocation51_spill] sm:$0xff] %v6032_v10  ;;  %v8078_v56 = vsel %vm6037_vm13, 4294967295, %v8077_v56  ;;  %v6042_v40 = vmax.f32 %v564_v11, 0.0  ;;  %v575_v51 = vadd.f32 %v4888_v7, %v5704_v35  ;;  %v1813_v37 = vrot.slane %v5846_v13, 1 }
 0x132   : > { %8079 = vst [vmem:[#allocation52_spill] sm:$0xff] %v8078_v56  ;;  %8083 = vst [vmem:[#allocation53_spill] sm:$0xff] %v8082_v21  ;;  %v6057_v12 = vpack.c.bf16 %v5999_v59, %v5988_v47  ;;  %v566_v4 = vpop.f32.mrf.mxu0  ;;  %v6060_v11 = vsel %vm7879_vm2, %v1193_v14, %v1195_v34  ;;  %v6063_v7 = vsel %vm7879_vm2, %v1195_v34, %v1197_v16  ;;  %v6065_v22 = vmax.f32 %v572_v17, 0.0 }
 0x133   : > { %8086 = vst [vmem:[#allocation56_spill] sm:$0xff] %v6060_v11  ;;  %8087 = vst [vmem:[#allocation57_spill] sm:$0xff] %v6063_v7  ;;  %4922 = vmatmul.mubr.msk.bf16.gmra.mxu1 %vm7871_vm3, %v6032_v10  ;;  %v567_v49 = vadd.f32 %v5704_v35, %v566_v4  ;;  %v1272_v13 = vsel %vm5948_vm9, %v6027_v38, 0.0  ;;  %v1201_v14 = vrot.slane %v6042_v40, 7  ;;  %v1274_v4 = vsel %vm5964_vm10, %v6063_v7, 0.0 }
 0x134   : > { %8085 = vst [vmem:[#allocation55_spill] sm:$0xff] %v6057_v12  ;;  %4925 = vmatprep.mubr.msk.bf16.mxu1 %vm7871_vm3, %v6057_v12  ;;  %v4891_v17 = vpop.f32.mrf.mxu0  ;;  %v1297_v34 = vpack.c.bf16 %v6060_v11, %v1272_v13  ;;  %v6082_v10 = vmax.f32 %v575_v51, 0.0  ;;  %v6085_v54 = vsel %vm7879_vm2, %v1197_v16, %v1199_v36  ;;  %v6097_v51 = vsel %vm7873_vm11, %v1813_v37, %v8091_v43 }
 0x135   : > { %8089 = vst [vmem:[#allocation59_spill] sm:$0xff] %v6085_v54  ;;  %v6090_v57 = vmax.f32 %v567_v49, 0.0  ;;  %v1298_v13 = vpack.c.bf16 %v6085_v54, %v1274_v4  ;;  %8092 = vst [vmem:[#allocation61_spill] sm:$0xff] %v6097_v51  ;;  %v1205_v16 = vrot.slane %v6065_v22, 7  ;;  %v588_v23 = vadd.f32 %v4891_v17, %v5704_v35 }
 0x136   : > { %8088 = vst [vmem:[#allocation58_spill] sm:$0xff] %v6082_v10  ;;  %4962 = vmatmul.mubr.msk.bf16.gmra.mxu0 %vm7871_vm3, %v1297_v34  ;;  %v579_v12 = vpop.f32.mrf.mxu0  ;;  %v8093_v38 = vand.u32 15, %v5720_v44  ;;  %v8094_v49 = vmov 0  ;;  %v6109_v34 = vadd.s32 200, %v5695_v30  ;;  %v6112_v4 = vsel %vm7879_vm2, %v1199_v36, %v1201_v14 }
 0x137   : > { %8090 = vst [vmem:[#allocation60_spill] sm:$0xff] %v6090_v57  ;;  %v580_v15 = vadd.f32 %v5704_v35, %v579_v12  ;;  %8098 = vst [vmem:[#allocation64_spill] sm:$0xff] %v6112_v4  ;;  %v1203_v43 = vrot.slane %v6090_v57, 7  ;;  %v6117_v52 = vpack.c.bf16 %v6090_v57, %v6042_v40  ;;  %4965 = vmatprep.mubr.msk.bf16.mxu0 %vm7871_vm3, %v1298_v13  ;;  %v8101_v17 = vmov 0 }
 0x138   : > { %vm6104_vm15 = vcmp.lt.s32.totalorder %v8093_v38, 15  ;;  %8097 = vst [vmem:[#allocation63_spill] sm:$0xff] %v6109_v34  ;;  %v4892_v12 = vpop.f32.mrf.mxu0  ;;  %v8100_v38 = vand.u32 15, %v5804_v32  ;;  %v8104_v44 = vrot.slane %v5789_v20, 1  ;;  %v1207_v54 = vrot.slane %v6082_v10, 7 }
 0x139   : > { %v8095_v49 = vsel %vm6104_vm15, 4294967295, %v8094_v49  ;;  %8099 = vst [vmem:[#allocation65_spill] sm:$0xff] %v6117_v52  ;;  %v6132_v7 = vmax.f32 %v580_v15, 0.0  ;;  %v591_v11 = vadd.f32 %v4892_v12, %v5704_v35  ;;  %v8106_v13 = vand.u32 15, %v5807_v33 }
 0x13a   : > { %8096 = vst [vmem:[#allocation62_spill] sm:$0xff] %v8095_v49  ;;  %vm6122_vm0 = vcmp.ge.s32.totalorder %v8100_v38, 1  ;;  %v6129_v36 = vsel %vm7873_vm11, %v8104_v44, %v1813_v37  ;;  %v8107_v28 = vmov 0  ;;  %v3656_v32 = vsel %vm6021_vm12, %v6097_v51, 0.0  ;;  %v582_v15 = vpop.f32.mrf.mxu0 }
 0x13b   : > { %v8102_v17 = vsel %vm6122_vm0, 4294967295, %v8101_v17  ;;  %8105 = vst [vmem:[#allocation67_spill] sm:$0xff] %v6129_v36  ;;  %vm6137_vm3 = vcmp.ge.s32.totalorder %v8106_v13, 1  ;;  %v1804_v38 = vrot.slane %v5725_v46, 1  ;;  %v6147_v44 = vpack.c.bf16 %v6082_v10, %v6065_v22 }
 0x13c   : > { %8103 = vst [vmem:[#allocation66_spill] sm:$0xff] %v8102_v17  ;;  %v8108_v28 = vsel %vm6137_vm3, 4294967295, %v8107_v28  ;;  %v6150_v37 = vsel %vm7879_vm2, %v1201_v14, %v1203_v43  ;;  %v6153_v33 = vsel %vm7879_vm2, %v1203_v43, %v1205_v16  ;;  %v1805_v12 = vrot.slane %v5756_v3, 1  ;;  %v4895_v3 = vpop.f32.mrf.mxu0 }
 0x13d   : > { %8109 = vst [vmem:[#allocation68_spill] sm:$0xff] %v8108_v28  ;;  %8110 = vst [vmem:[#allocation69_spill] sm:$0xff] %v6147_v44  ;;  %v6156_v13 = vmax.f32 %v588_v23, 0.0  ;;  %vm8113_vm11 = vcmask 523264   ;;  %v583_v46 = vadd.f32 %v5704_v35, %v582_v15  ;;  %v1276_v48 = vsel %vm6037_vm13, %v6112_v4, 0.0 }
 0x13e   : > { %8111 = vst [vmem:[#allocation70_spill] sm:$0xff] %v6150_v37  ;;  %8112 = vst [vmem:[#allocation71_spill] sm:$0xff] %v6153_v33  ;;  %4926 = vmatmul.mubr.msk.bf16.gmra.mxu1 %vm8113_vm11, %v6117_v52  ;;  %v8114_v57 = vand.u32 15, %v5695_v30  ;;  %v8115_v14 = vmov 0  ;;  %v1209_v43 = vrot.slane %v6132_v7, 7  ;;  %v1299_v23 = vpack.c.bf16 %v6150_v37, %v1276_v48  ;;  %v595_v21 = vpop.f32.mrf.mxu0 }
 0x13f   : > { %vm8118_vm2 = vmmov %vm8113_vm11  ;;  %v1278_v15 = vsel %vm6047_vm14, %v6153_v33, 0.0  ;;  %v6178_v52 = vpack.c.bf16 %v3656_v32, %v6129_v36  ;;  %v6181_v56 = vmax.f32 %v591_v11, 0.0  ;;  %vm8120_vm11 = vcmask 1040384  }
 0x140   : > { %vm6166_vm10 = vcmp.ge.s32.totalorder %v8114_v57, 1  ;;  %4929 = vmatprep.mubr.msk.bf16.mxu1 %vm8118_vm2, %v6147_v44  ;;  %v1807_v57 = vrot.slane %v5763_v8, 1  ;;  %v6184_v4 = vsel %vm8120_vm11, %v1205_v16, %v1207_v54  ;;  %v6187_v44 = vmax.f32 %v583_v46, 0.0  ;;  %4966 = vmatmul.mubr.msk.bf16.gmra.mxu0 %vm8118_vm2, %v1299_v23 }
 0x141   : > { %v8116_v14 = vsel %vm6166_vm10, 4294967295, %v8115_v14  ;;  %8119 = vst [vmem:[#allocation73_spill] sm:$0xff] %v6178_v52  ;;  %8121 = vst [vmem:[#allocation74_spill] sm:$0xff] %v6184_v4  ;;  %v1300_v48 = vpack.c.bf16 %v6184_v4, %v1278_v15  ;;  %v6192_v37 = vadd.s32 216, %v5695_v30  ;;  %v6195_v32 = vadd.s32 232, %v5695_v30  ;;  %v4896_v52 = vpop.f32.mrf.mxu0 }
 0x142   : > { %8117 = vst [vmem:[#allocation72_spill] sm:$0xff] %v8116_v14  ;;  %8122 = vst [vmem:[#allocation75_spill] sm:$0xff] %v6187_v44  ;;  %vm8123_vm14 = vcmask 1046528   ;;  %v1213_v16 = vrot.slane %v6156_v13, 7  ;;  %v596_v46 = vadd.f32 %v5704_v35, %v595_v21  ;;  %v6204_v23 = vsel %vm8120_vm11, %v1207_v54, %v1209_v43 }
 0x143   : > { %v1896_v8 = vsel %vm8123_vm14, 0.0, %v1804_v38  ;;  %vm8124_vm13 = vmmov %vm8123_vm14  ;;  %8126 = vst [vmem:[#allocation77_spill] sm:$0xff] %v6204_v23  ;;  %v1211_v15 = vrot.slane %v6187_v44, 7  ;;  %v6209_v10 = vpack.c.bf16 %v6187_v44, %v6132_v7  ;;  %v604_v30 = vadd.f32 %v4895_v3, %v5704_v35  ;;  %4969 = vmatprep.mubr.msk.bf16.mxu0 %vm8118_vm2, %v1300_v48 }
 0x144   : > { %v6199_v11 = vsel %vm8124_vm13, %v1805_v12, %v1807_v57  ;;  %v8128_v4 = vand.u32 15, %v5850_v29  ;;  %v8129_v34 = vmov 0  ;;  %v1809_v21 = vrot.slane %v5748_v62, 1  ;;  %vm8138_vm2 = vmmov %vm8120_vm11 }
 0x145   : > { %8125 = vst [vmem:[#allocation76_spill] sm:$0xff] %v6199_v11  ;;  %8127 = vst [vmem:[#allocation78_spill] sm:$0xff] %v6209_v10  ;;  %v1215_v54 = vrot.slane %v6181_v56, 7  ;;  %v6221_v33 = vmax.f32 %v596_v46, 0.0  ;;  %v607_v44 = vadd.f32 %v4896_v52, %v5704_v35  ;;  %v8132_v36 = vand.u32 15, %v5914_v5 }
 0x146   : > { %vm6215_vm13 = vcmp.ge.s32.totalorder %v8128_v4, 1  ;;  %v8133_v3 = vmov 0  ;;  %v6232_v29 = vpack.c.bf16 %v6181_v56, %v6156_v13  ;;  %v598_v4 = vpop.f32.mrf.mxu0  ;;  %v6235_v48 = vsel %vm8120_vm11, %v1209_v43, %v1211_v15 }
 0x147   : > { %v8130_v34 = vsel %vm6215_vm13, 4294967295, %v8129_v34  ;;  %vm6226_vm14 = vcmp.ge.s32.totalorder %v8132_v36, 1  ;;  %8137 = vst [vmem:[#allocation82_spill] sm:$0xff] %v6235_v48  ;;  %v6238_v62 = vsel %vm8138_vm2, %v1211_v15, %v1213_v16  ;;  %v1897_v52 = vsel %vm6104_vm15, %v1896_v8, 0.0 }
 0x148   : > { %8131 = vst [vmem:[#allocation79_spill] sm:$0xff] %v8130_v34  ;;  %v8134_v3 = vsel %vm6226_vm14, 4294967295, %v8133_v3  ;;  %8136 = vst [vmem:[#allocation81_spill] sm:$0xff] %v6232_v29  ;;  %vm8140_vm9 = vcmask 1046528   ;;  %v1899_v36 = vsel %vm6021_vm12, %v6199_v11, 0.0  ;;  %vm8142_vm8 = vcmask 523264  }
 0x149   : > { %8135 = vst [vmem:[#allocation80_spill] sm:$0xff] %v8134_v3  ;;  %8139 = vst [vmem:[#allocation83_spill] sm:$0xff] %v6238_v62  ;;  %v6243_v5 = vsel %vm8140_vm9, %v1804_v38, %v1805_v12  ;;  %4930 = vmatmul.mubr.msk.bf16.gmra.mxu1 %vm8142_vm8, %v6209_v10  ;;  %v599_v46 = vadd.f32 %v5704_v35, %v598_v4  ;;  %v1280_v43 = vsel %vm6122_vm0, %v6204_v23, 0.0  ;;  %v6254_v15 = vmax.f32 %v604_v30, 0.0  ;;  %v4899_v38 = vpop.f32.mrf.mxu0  ;;  %v8234_v3 = vld [vmem:[#allocation75_spill] sm:$0xff] }
 0x14a   : > { %8141 = vst [vmem:[#allocation84_spill] sm:$0xff] %v6243_v5  ;;  %v1217_v8 = vrot.slane %v6221_v33, 7  ;;  %vm8143_vm9 = vmmov %vm8142_vm8  ;;  %v1301_v12 = vpack.c.bf16 %v6235_v48, %v1280_v43  ;;  %v1282_v10 = vsel %vm6137_vm3, %v6238_v62, 0.0  ;;  %v6263_v50 = vmax.f32 %v607_v44, 0.0 }
 0x14b   : > { %4933 = vmatprep.mubr.msk.bf16.mxu1 %vm8143_vm9, %v6232_v29  ;;  %vm8144_vm8 = vmmov %vm8138_vm2  ;;  %v6270_v11 = vmax.f32 %v599_v46, 0.0  ;;  %v620_v29 = vadd.f32 %v4899_v38, %v5704_v35  ;;  %v611_v17 = vpop.f32.mrf.mxu0  ;;  %v8147_v28 = vand.u32 15, %v5924_v2  ;;  %v8148_v44 = vmov 0 }
 0x14c   : > { %v6266_v4 = vsel %vm8144_vm8, %v1213_v16, %v1215_v54  ;;  %vm8146_vm11 = vmmov %vm8143_vm9  ;;  %v2225_v16 = vsel %vm6166_vm10, %v5766_v9, 0.0  ;;  %v8151_v46 = vand.u32 15, %v5723_v45  ;;  %v8152_v49 = vmov 0 }
 0x14d   : > { %8145 = vst [vmem:[#allocation85_spill] sm:$0xff] %v6266_v4  ;;  %4970 = vmatmul.mubr.msk.bf16.gmra.mxu0 %vm8146_vm11, %v1301_v12  ;;  %v1302_v43 = vpack.c.bf16 %v6266_v4, %v1282_v10  ;;  %vm6277_vm2 = vcmp.lt.s32.totalorder %v8147_v28, 15  ;;  %v6291_v38 = vpack.c.bf16 %v1899_v36, %v6243_v5  ;;  %v612_v10 = vadd.f32 %v5704_v35, %v611_v17  ;;  %v4900_v17 = vpop.f32.mrf.mxu0 }
 0x14e   : > { %v8149_v44 = vsel %vm6277_vm2, 4294967295, %v8148_v44  ;;  %vm6286_vm9 = vcmp.lt.s32.totalorder %v8151_v46, 15  ;;  %v8155_v2 = vand.u32 15, %v5911_v41  ;;  %v5524_v12 = vmov 0.0  }
 0x14f   : > { %8150 = vst [vmem:[#allocation86_spill] sm:$0xff] %v8149_v44  ;;  %v8153_v49 = vsel %vm6286_vm9, 4294967295, %v8152_v49  ;;  %v6300_v30 = vpack.c.bf16 %v1897_v52, %v5524_v12  ;;  %vm8158_vm11 = vcmask 1046528   ;;  %v1221_v46 = vrot.slane %v6254_v15, 7  ;;  %v614_v4 = vpop.f32.mrf.mxu0 }
 0x150   : > { %8154 = vst [vmem:[#allocation87_spill] sm:$0xff] %v8153_v49  ;;  %vm6296_vm8 = vcmp.ge.s32.totalorder %v8155_v2, 1  ;;  %v6303_v9 = vsel %vm8158_vm11, %v1807_v57, %v1809_v21  ;;  %vm8160_vm10 = vcmask 1040384   ;;  %v1219_v36 = vrot.slane %v6270_v11, 7 }
 0x151   : > { %8159 = vst [vmem:[#allocation88_spill] sm:$0xff] %v6303_v9  ;;  %v6307_v45 = vsel %vm8160_vm10, %v1215_v54, %v1217_v8  ;;  %v6312_v41 = vpack.c.bf16 %v6270_v11, %v6221_v33  ;;  %vm8163_vm12 = vcmask 523264   ;;  %v1223_v52 = vrot.slane %v6263_v50, 7 }
 0x152   : > { %8161 = vst [vmem:[#allocation89_spill] sm:$0xff] %v6307_v45  ;;  %4973 = vmatprep.mubr.msk.bf16.mxu0 %vm8163_vm12, %v1302_v43  ;;  %v6316_v2 = vmax.f32 %v612_v10, 0.0  ;;  %v623_v57 = vadd.f32 %v4900_v17, %v5704_v35  ;;  %v6320_v14 = vpack.c.bf16 %v5799_v24, %v2225_v16  ;;  %v6324_v54 = vpack.c.bf16 %v6263_v50, %v6254_v15  ;;  %vm8167_vm12 = vmmov %vm8160_vm10 }
 0x153   : > { %8162 = vst [vmem:[#allocation90_spill] sm:$0xff] %v6312_v41  ;;  %v6326_v5 = vmax.f32 %v620_v29, 0.0  ;;  %v6329_v62 = vsel %vm8160_vm10, %v1217_v8, %v1219_v36  ;;  %v6332_v43 = vsel %vm8167_vm12, %v1219_v36, %v1221_v46  ;;  %v8169_v10 = vand.u32 15, %v5739_v53 }
 0x154   : > { %8164 = vst [vmem:[#allocation91_spill] sm:$0xff] %v6316_v2  ;;  %8165 = vst [vmem:[#allocation92_spill] sm:$0xff] %v6324_v54  ;;  %v1225_v24 = vrot.slane %v6316_v2, 7  ;;  %v6341_v16 = vmax.f32 %v623_v57, 0.0  ;;  %vm8172_vm15 = vcmask 523264   ;;  %v615_v29 = vadd.f32 %v5704_v35, %v614_v4 }
 0x155   : > { %8166 = vst [vmem:[#allocation93_spill] sm:$0xff] %v6329_v62  ;;  %8168 = vst [vmem:[#allocation94_spill] sm:$0xff] %v6332_v43  ;;  %vm6336_vm11 = vcmp.lt.s32.totalorder %v8169_v10, 15  ;;  %4934 = vmatmul.mubr.msk.bf16.gmra.mxu1 %vm8172_vm15, %v6312_v41  ;;  %v1284_v8 = vsel %vm6215_vm13, %v6307_v45, 0.0  ;;  %v8173_v36 = vrot.slane %v5789_v20, 1  ;;  %vm8174_vm10 = vcmask 1046528  }
 0x156   : > { %vm8176_vm12 = vmmov %vm8172_vm15  ;;  %v1303_v57 = vpack.c.bf16 %v6329_v62, %v1284_v8  ;;  %v1286_v35 = vsel %vm6226_vm14, %v6332_v43, 0.0  ;;  %v8177_v4 = vand.u32 15, %v5783_v18  ;;  %v8178_v41 = vmov 0 }
 0x157   : > { %v6352_v10 = vsel %vm8174_vm10, %v1809_v21, %v8173_v36  ;;  %4937 = vmatprep.mubr.msk.bf16.mxu1 %vm8176_vm12, %v6324_v54  ;;  %v2227_v20 = vsel %vm5710_vm1, %v5832_v27, 0.0  ;;  %v6373_v36 = vpack.c.bf16 %v6341_v16, %v6326_v5  ;;  %vm8182_vm10 = vcmask 1040384  }
 0x158   : > { %8175 = vst [vmem:[#allocation95_spill] sm:$0xff] %v6352_v10  ;;  %vm6363_vm15 = vcmp.lt.s32.totalorder %v8177_v4, 15  ;;  %v6376_v8 = vsel %vm8182_vm10, %v1221_v46, %v1223_v52  ;;  %v7946_v53 = vrot.slane %v6326_v5, 1  ;;  %v2777_v18 = vrot.slane %v6341_v16, 1  ;;  %4974 = vmatmul.mubr.msk.bf16.gmra.mxu0 %vm8176_vm12, %v1303_v57  ;;  %vm8184_vm1 = vmmov %vm8182_vm10 }
 0x159   : > { %v8179_v41 = vsel %vm6363_vm15, 4294967295, %v8178_v41  ;;  %8181 = vst [vmem:[#allocation97_spill] sm:$0xff] %v6373_v36  ;;  %8183 = vst [vmem:[#allocation98_spill] sm:$0xff] %v6376_v8  ;;  %v6380_v4 = vmax.f32 %v615_v29, 0.0  ;;  %v1304_v39 = vpack.c.bf16 %v6376_v8, %v1286_v35  ;;  %v1819_v21 = vrot.slane %v5882_v25, 1 }
 0x15a   : > { %8180 = vst [vmem:[#allocation96_spill] sm:$0xff] %v8179_v41  ;;  %v6387_v54 = vsel %vm8184_vm1, %v1223_v52, %v1225_v24  ;;  %v8186_v46 = vrot.slane %v6341_v16, 7  ;;  %vm8187_vm10 = vmmov %vm8184_vm1  ;;  %vm8188_vm14 = vcmask 1046528   ;;  %v8192_v52 = vand.u32 15, %v5853_v1 }
 0x15b   : > { %8185 = vst [vmem:[#allocation99_spill] sm:$0xff] %v6387_v54  ;;  %v6395_v29 = vsel %vm8188_vm14, %v7946_v53, %v2777_v18  ;;  %vm8190_vm13 = vmmov %vm8188_vm14  ;;  %v7948_v25 = vrot.slane %v6380_v4, 7  ;;  %4977 = vmatprep.mubr.msk.bf16.mxu0 %vm8176_vm12, %v1304_v39  ;;  %v8196_v53 = vmov 0  ;;  %v1901_v1 = vsel %vm6286_vm9, %v6352_v10, 0.0 }
 0x15c   : > { %v3105_v36 = vsel %vm8187_vm10, %v8186_v46, 0.0  ;;  %8189 = vst [vmem:[#allocation100_spill] sm:$0xff] %v6395_v29  ;;  %v6398_v57 = vsel %vm8190_vm13, %v2777_v18, 0.0  ;;  %vm6406_vm1 = vcmp.lt.s32.totalorder %v8192_v52, 15  ;;  %v8195_v46 = vand.u32 15, %v5927_v42  ;;  %vm8202_vm13 = vmmov %vm8187_vm10 }
 0x15d   : > { %8191 = vst [vmem:[#allocation101_spill] sm:$0xff] %v6398_v57  ;;  %v3136_v35 = vsel %vm6296_vm8, %v3105_v36, 0.0  ;;  %v2813_v36 = vsel %vm6277_vm2, %v6398_v57, 0.0  ;;  %v6421_v18 = vpack.c.bf16 %v6380_v4, %v6316_v2  ;;  %v1288_v44 = vsel %vm6296_vm8, %v6387_v54, 0.0 }
 0x15e   : > { %vm6412_vm14 = vcmp.lt.s32.totalorder %v8195_v46, 15  ;;  %v6423_v39 = vpack.c.bf16 %v5524_v12, %v3136_v35  ;;  %v6430_v52 = vpack.c.bf16 %v2813_v36, %v6395_v29  ;;  %v6435_v46 = vsel %vm8202_vm13, %v1225_v24, %v7948_v25  ;;  %vm8206_vm13 = vmmov %vm8176_vm12  ;;  %v8221_v36 = vld [vmem:[#allocation60_spill] sm:$0xff] }
 0x15f   : > { %v8197_v53 = vsel %vm6412_vm14, 4294967295, %v8196_v53  ;;  %8199 = vst [vmem:[#allocation103_spill] sm:$0xff] %v6421_v18  ;;  %8203 = vst [vmem:[#allocation106_spill] sm:$0xff] %v6435_v46  ;;  %v6441_v12 = vpack.c.bf16 %v5857_v26, %v2227_v20  ;;  %v8204_v35 = vrot.slane %v5828_v0, 1  ;;  %vm8205_vm10 = vcmask 1046528   ;;  %4938 = vmatmul.mubr.msk.bf16.gmra.mxu1 %vm8176_vm12, %v6421_v18 }
 0x160   : > { %8198 = vst [vmem:[#allocation102_spill] sm:$0xff] %v8197_v53  ;;  %8200 = vst [vmem:[#allocation104_spill] sm:$0xff] %v6423_v39  ;;  %v1305_v24 = vpack.c.bf16 %v6435_v46, %v1288_v44  ;;  %v1825_v25 = vrot.slane %v5906_v55, 1  ;;  %v1821_v42 = vrot.slane %v5908_v61, 1  ;;  %4989 = vmatprep.mubr.msk.bf16.mxu1 %vm8206_vm13, %v6300_v30  ;;  %v1930_v20 = vpack.c.bf16 %v1901_v1, %v6303_v9  ;;  %v8250_v53 = vld [vmem:[#allocation36_spill] sm:$0xff] }
 0x161   : > { %8201 = vst [vmem:[#allocation105_spill] sm:$0xff] %v6430_v52  ;;  %v6446_v39 = vsel %vm8205_vm10, %v8204_v35, %v1819_v21  ;;  %v2229_v26 = vsel %vm5750_vm4, %v5826_v58, 0.0  ;;  %v1903_v55 = vsel %vm6336_vm11, %v6097_v51, 0.0  ;;  %v8207_v61 = vand.u32 15, %v5937_v31  ;;  %v8212_v58 = vld [vmem:[#allocation32_spill] sm:$0xff] }
 0x162   : > { %v8210_v30 = vrot.slane %v5981_v6, 1  ;;  %vm8211_vm12 = vcmask 1046528   ;;  %v1829_v52 = vrot.slane %v6005_v19, 1  ;;  %4978 = vmatmul.mubr.msk.bf16.gmra.mxu0 %vm8206_vm13, %v1305_v24  ;;  %v2259_v35 = vpack.c.bf16 %v8212_v58, %v2229_v26  ;;  %v8220_v19 = vld [vmem:[#allocation58_spill] sm:$0xff]  ;;  %v8223_v58 = vld [vmem:[#allocation33_spill] sm:$0xff] }
 0x163   : > { %vm6468_vm10 = vcmp.lt.s32.totalorder %v8207_v61, 15  ;;  %v8214_v18 = vand.u32 15, %v8213_v63  ;;  %v8215_v31 = vmov 0  ;;  %v8218_v61 = vrot.slane %v6042_v40, 1  ;;  %5029 = vmatprep.mubr.msk.bf16.mxu0 %vm8206_vm13, %v6320_v14  ;;  %vm8229_vm13 = vmmov %vm8211_vm12 }
 0x164   : > { %v6475_v1 = vsel %vm8211_vm12, %v1825_v25, %v8210_v30  ;;  %v8219_v9 = vrot.slane %v5999_v59, 1  ;;  %v1905_v26 = vsel %vm6363_vm15, %v6446_v39, 0.0  ;;  %v8227_v14 = vrot.slane %v6132_v7, 1  ;;  %vm8233_vm2 = vmmov %vm8211_vm12 }
 0x165   : > { %vm6483_vm4 = vcmp.lt.s32.totalorder %v8214_v18, 15  ;;  %v8222_v18 = vld [vmem:[#allocation67_spill] sm:$0xff]  ;;  %v8228_v57 = vrot.slane %v8220_v19, 1  ;;  %v8230_v63 = vrot.slane %v5828_v0, 1  ;;  %v8256_v43 = vrot.slane %v5879_v60, 1 }
 0x166   : > { %v8216_v31 = vsel %vm6483_vm4, 4294967295, %v8215_v31  ;;  %v6492_v30 = vsel %vm8211_vm12, %v8219_v9, %v8218_v61  ;;  %v1931_v24 = vpack.c.bf16 %v1903_v55, %v8222_v18  ;;  %v2231_v9 = vsel %vm5769_vm5, %v8223_v58, 0.0  ;;  %v8231_v18 = vld [vmem:[#allocation25_spill] sm:$0xff] }
 0x167   : > { %8217 = vst [vmem:[#allocation32_spill] sm:$0xff] %v8216_v31  ;;  %v8225_v61 = vrot.slane %v5879_v60, 1  ;;  %v6517_v41 = vsel %vm8229_vm13, %v8228_v57, %v8227_v14  ;;  %v7984_v55 = vrot.slane %v6181_v56, 1  ;;  %v8232_v58 = vrot.slane %v8231_v18, 1  ;;  %v8236_v57 = vld [vmem:[#allocation37_spill] sm:$0xff]  ;;  %vm8237_vm13 = vmmov %vm8233_vm2  ;;  %v8289_v31 = vld [vmem:[#allocation39_spill] sm:$0xff] }
 0x168   : > { %v6534_v14 = vpack.c.bf16 %v8236_v57, %v2231_v9  ;;  %v6537_v0 = vsel %vm8237_vm13, %v1819_v21, %v1821_v42  ;;  %v1909_v18 = vsel %vm6412_vm14, %v6475_v1, 0.0  ;;  %v8246_v9 = vld [vmem:[#allocation35_spill] sm:$0xff]  ;;  %v8257_v48 = vrot.slane %v5988_v47, 1  ;;  %v5377_v60 = vld [vmem:[#allocation6 + $0x88] sm:$0xff]  }
 0x169   : > { %v6509_v51 = vsel %vm8211_vm12, %v1821_v42, %v8225_v61  ;;  %v6525_v49 = vsel %vm8233_vm2, %v8232_v58, %v8230_v63  ;;  %v5374_v61 = vld [vmem:[#allocation6 + $0x90] sm:$0xff]   ;;  %vm8235_vm12 = vcmask 523264   ;;  %8238 = vst [vmem:[#allocation58_spill] sm:$0xff] %v6537_v0  ;;  %v8239_v58 = vld [vmem:[#allocation47_spill] sm:$0xff]  ;;  %v2233_v34 = vsel %vm5815_vm6, %v8246_v9, 0.0 }
 0x16a   : > { %8226 = vst [vmem:[#allocation45_spill] sm:$0xff] %v6509_v51  ;;  %v1932_v54 = vpack.c.bf16 %v1905_v26, %v6525_v49  ;;  %4990 = vmatmul.mubr.msk.bf16.vlgmr.msra.gmra.mxu1 %vm8235_vm12, %v6291_v38  ;;  %v1907_v63 = vsel %vm6406_vm1, %v6509_v51, 0.0  ;;  %v8240_v46 = vand.u32 15, %v8239_v58  ;;  %v8243_v38 = vrot.slane %v6221_v33, 1  ;;  %vm8244_vm12 = vmmov %vm8237_vm13  ;;  %v8248_v58 = vld [vmem:[#allocation44_spill] sm:$0xff]  ;;  %v8251_v51 = vld [vmem:[#allocation54_spill] sm:$0xff] }
 0x16b   : > { %vm8245_vm13 = vcmask 523264   ;;  %v2235_v57 = vsel %vm5839_vm7, %v8248_v58, 0.0  ;;  %5062 = vmatpush3.bf16.msra.mxu1 %v8250_v53  ;;  %v8252_v8 = vand.u32 15, %v8251_v51  ;;  %v6578_v45 = vsel %vm8244_vm12, %v8256_v43, %v1825_v25  ;;  %v8270_v43 = vld [vmem:[#allocation46_spill] sm:$0xff] }
 0x16c   : > { %vm6547_vm2 = vcmp.lt.s32.totalorder %v8240_v46, 15  ;;  %v6556_v21 = vsel %vm8244_vm12, %v7984_v55, %v8243_v38  ;;  %4993 = vmatprep.mubr.msk.bf16.mxu1 %vm8245_vm13, %v1930_v20  ;;  %v5376_v38 = vld [vmem:[#allocation6 + $0xb0] sm:$0xff]   ;;  %v2219_v55 = vrot.slane %v6326_v5, 7  ;;  %vm8258_vm13 = vmmov %vm8244_vm12  ;;  %v8260_v51 = vand.u32 15, %v6192_v37  ;;  %5063 = vmatprep.subr.bf16.mxu1 %v5374_v61  ;;  %v8271_v46 = vld [vmem:[#allocation40_spill] sm:$0xff] }
 0x16d   : > { %vm6569_vm14 = vcmp.lt.s32.totalorder %v8252_v8, 15  ;;  %v8255_v20 = vld [vmem:[#allocation41_spill] sm:$0xff]  ;;  %v6583_v53 = vsel %vm8258_vm13, %v1829_v52, %v8257_v48  ;;  %v8261_v8 = vmov 0  ;;  %v8263_v23 = vand.u32 15, %v6195_v32 }
 0x16e   : > { %v2261_v42 = vpack.c.bf16 %v8255_v20, %v2233_v34  ;;  %8259 = vst [vmem:[#allocation60_spill] sm:$0xff] %v6583_v53  ;;  %vm6587_vm15 = vcmp.lt.s32.totalorder %v8260_v51, 15  ;;  %v8266_v25 = vrot.slane %v6316_v2, 1  ;;  %v8267_v48 = vrot.slane %v6263_v50, 1  ;;  %v8499_v34 = vld [vmem:[#allocation105_spill] sm:$0xff] }
 0x16f   : > { %v8262_v8 = vsel %vm6587_vm15, 4294967295, %v8261_v8  ;;  %vm6593_vm9 = vcmp.lt.s32.totalorder %v8263_v23, 15  ;;  %vm8268_vm13 = vcmask 523264   ;;  %v6608_v51 = vpack.c.bf16 %v1907_v63, %v6537_v0  ;;  %v8278_v0 = vld [vmem:[#allocation31_spill] sm:$0xff]  ;;  %5064 = vmatpush3.bf16.msra.mxu1 %v5374_v61 }
 0x170   : > { %v6603_v37 = vsel %vm8244_vm12, %v8267_v48, %v8266_v25  ;;  %5030 = vmatmul.mubr.msk.bf16.vlgmr.msra.gmra.mxu0 %vm8268_vm13, %v6441_v12  ;;  %v6611_v32 = vpack.c.bf16 %v1909_v18, %v6578_v45  ;;  %vm8269_vm3 = vmmov %vm8268_vm13  ;;  %v6616_v2 = vpack.c.bf16 %v8270_v43, %v2235_v57  ;;  %v8272_v25 = vrot.slane %v6380_v4, 7  ;;  %v8277_v18 = vld [vmem:[#allocation50_spill] sm:$0xff]  ;;  %5065 = vmatprep.subr.bf16.mxu1 %v5377_v60 }
 0x171   : > { %5033 = vmatprep.mubr.msk.bf16.mxu0 %vm8269_vm3, %v2259_v35  ;;  %5102 = vmatpush3.bf16.msra.mxu0 %v8271_v46  ;;  %vm8273_vm12 = vcmask 1040384   ;;  %v8275_v12 = vrot.slane %v6341_v16, 7  ;;  %vm8279_vm0 = vnez %v8278_v0  ;;  %v8280_v35 = vrot.slane %v5981_v6, 1 }
 0x172   : > { %v6622_v48 = vsel %vm8273_vm12, %v8272_v25, %v2219_v55  ;;  %vm8276_vm13 = vmmov %vm8273_vm12  ;;  %v2237_v23 = vsel %vm8279_vm0, %v8277_v18, 0.0  ;;  %vm8281_vm3 = vcmask 1046528   ;;  %v1911_v46 = vsel %vm6468_vm10, %v6583_v53, 0.0  ;;  %5103 = vmatprep.subr.bf16.mxu0 %v5376_v38 }
 0x173   : > { %8274 = vst [vmem:[#allocation21_spill] sm:$0xff] %v6622_v48  ;;  %v6627_v63 = vsel %vm8276_vm13, %v2219_v55, %v8275_v12  ;;  %v6635_v57 = vsel %vm8281_vm3, %v8280_v35, %v1829_v52  ;;  %v2255_v16 = vsel %vm6296_vm8, %v6622_v48, 0.0  ;;  %v8282_v55 = vld [vmem:[#allocation56_spill] sm:$0xff]  ;;  %v1913_v6 = vsel %vm6483_vm4, %v6492_v30, 0.0  ;;  %vm8287_vm8 = vmmov %vm8281_vm3  ;;  %5066 = vmatpush3.bf16.msra.mxu1 %v5377_v60  ;;  %v6715_v60 = vld [vmem:[#allocation6 + $0xd8] sm:$0xff]  }
 0x174   : > { %v6644_v25 = vpack.c.bf16 %v8282_v55, %v2237_v23  ;;  %v6650_v52 = vpack.c.bf16 %v6627_v63, %v2255_v16  ;;  %v5378_v12 = vld [vmem:[#allocation6 + $0xa8] sm:$0xff]   ;;  %v5379_v35 = vld [vmem:[#allocation6 + $0x80] sm:$0xff]   ;;  %v2789_v61 = vsel %vm6336_vm11, %v6446_v39, 0.0  ;;  %v8285_v28 = vrot.slane %v5999_v59, 1  ;;  %8306 = vst [vmem:[#allocation54_spill] sm:$0xff] %v6715_v60 }
 0x175   : > { %v8286_v53 = vrot.slane %v5988_v47, 1  ;;  %vm8290_vm12 = vnez %v8289_v31  ;;  %v6666_v16 = vpack.c.bf16 %v2789_v61, %v6525_v49  ;;  %vm8292_vm13 = vcmask 523264   ;;  %5104 = vmatpush3.bf16.msra.mxu0 %v5376_v38  ;;  %v5380_v38 = vld [vmem:[#allocation6 + $0xa0] sm:$0xff]   ;;  %5067 = vmatprep.subr.bf16.mxu1 %v5379_v35 }
 0x176   : > { %8283 = vst [vmem:[#allocation25_spill] sm:$0xff] %v6644_v25  ;;  %8284 = vst [vmem:[#allocation75_spill] sm:$0xff] %v6650_v52  ;;  %v8288_v25 = vld [vmem:[#allocation57_spill] sm:$0xff]  ;;  %v2793_v52 = vsel %vm6406_vm1, %v6475_v1, 0.0  ;;  %4994 = vmatmul.mubr.msk.bf16.gmra.mxu1 %vm8292_vm13, %v1931_v24  ;;  %v6673_v59 = vpack.c.bf16 %v1911_v46, %v6635_v57  ;;  %v8293_v47 = vrot.slane %v6326_v5, 1  ;;  %v8298_v5 = vrot.slane %v8220_v19, 1  ;;  %5105 = vmatprep.subr.bf16.mxu0 %v5378_v12 }
 0x177   : > { %v6660_v23 = vsel %vm8287_vm8, %v8286_v53, %v8285_v28  ;;  %v2239_v48 = vsel %vm8290_vm12, %v8288_v25, 0.0  ;;  %8291 = vst [vmem:[#allocation47_spill] sm:$0xff] %v6666_v16  ;;  %v8294_v53 = vrot.slane %v6380_v4, 1  ;;  %v6683_v61 = vpack.c.bf16 %v2793_v52, %v6578_v45  ;;  %vm8296_vm8 = vmmov %vm8292_vm13  ;;  %5068 = vmatpush3.bf16.msra.mxu1 %v5379_v35 }
 0x178   : > { %v2797_v16 = vsel %vm6468_vm10, %v6492_v30, 0.0  ;;  %4997 = vmatprep.mubr.msk.bf16.mxu1 %vm8296_vm8, %v1932_v54  ;;  %v6690_v24 = vpack.c.bf16 %v1913_v6, %v6660_v23  ;;  %v8299_v46 = vrot.slane %v6065_v22, 1  ;;  %vm8300_vm13 = vmmov %vm8281_vm3  ;;  %v8302_v54 = vld [vmem:[#allocation59_spill] sm:$0xff]  ;;  %v8304_v6 = vrot.slane %v6181_v56, 1  ;;  %5034 = vmatmul.mubr.msk.bf16.gmra.mxu0 %vm8296_vm8, %v6534_v14  ;;  %v8313_v14 = vld [vmem:[#allocation64_spill] sm:$0xff] }
 0x179   : > { %v6680_v28 = vsel %vm8281_vm3, %v8294_v53, %v8293_v47  ;;  %8295 = vst [vmem:[#allocation35_spill] sm:$0xff] %v6683_v61  ;;  %v6700_v52 = vpack.c.bf16 %v2797_v16, %v6660_v23  ;;  %v2801_v53 = vsel %vm6547_vm2, %v6517_v41, 0.0  ;;  %v6706_v61 = vpack.c.bf16 %v8302_v54, %v2239_v48  ;;  %5106 = vmatpush3.bf16.msra.mxu0 %v5378_v12  ;;  %v6776_v12 = vld [vmem:[#allocation6 + $0xf8] sm:$0xff]  }
 0x17a   : > { %8297 = vst [vmem:[#allocation24_spill] sm:$0xff] %v6690_v24  ;;  %v6697_v47 = vsel %vm8300_vm13, %v8299_v46, %v8298_v5  ;;  %v8305_v19 = vrot.slane %v6156_v13, 1  ;;  %v2805_v5 = vsel %vm6569_vm14, %v6556_v21, 0.0  ;;  %v8308_v56 = vrot.slane %v6263_v50, 1  ;;  %vm8310_vm13 = vmmov %vm8281_vm3  ;;  %v8314_v50 = vld [vmem:[#allocation42_spill] sm:$0xff]  ;;  %5107 = vmatprep.subr.bf16.mxu0 %v5380_v38  ;;  %5141 = vmatprep.subr.bf16.mxu1 %v6715_v60 }
 0x17b   : > { %8301 = vst [vmem:[#allocation44_spill] sm:$0xff] %v6700_v52  ;;  %8303 = vst [vmem:[#allocation36_spill] sm:$0xff] %v6706_v61  ;;  %v6718_v16 = vpack.c.bf16 %v2801_v53, %v6697_v47  ;;  %v8309_v48 = vrot.slane %v6254_v15, 1  ;;  %v2809_v53 = vsel %vm6587_vm15, %v6603_v37, 0.0  ;;  %v8334_v35 = vrot.slane %v6221_v33, 1 }
 0x17c   : > { %v6713_v24 = vsel %vm8281_vm3, %v8305_v19, %v8304_v6  ;;  %vm8312_vm3 = vmmov %vm8296_vm8  ;;  %vm8315_vm8 = vnez %v8314_v50  ;;  %v8322_v19 = vrot.slane %v8234_v3, 1  ;;  %8328 = vst [vmem:[#allocation50_spill] sm:$0xff] %v6776_v12  ;;  %v8333_v3 = vrot.slane %v6270_v11, 1 }
 0x17d   : > { %8307 = vst [vmem:[#allocation41_spill] sm:$0xff] %v6718_v16  ;;  %v6730_v46 = vsel %vm8310_vm13, %v8309_v48, %v8308_v56  ;;  %v6733_v6 = vpack.c.bf16 %v2805_v5, %v6713_v24  ;;  %5037 = vmatprep.mubr.msk.bf16.mxu0 %vm8312_vm3, %v2261_v42  ;;  %v8316_v56 = vrot.slane %v8221_v36, 1  ;;  %v8317_v48 = vrot.slane %v6042_v40, 1  ;;  %vm8320_vm15 = vmmov %vm8310_vm13  ;;  %5108 = vmatpush3.bf16.msra.mxu0 %v5380_v38 }
 0x17e   : > { %v6760_v42 = vpack.c.bf16 %v2809_v53, %v6730_v46  ;;  %v8323_v16 = vrot.slane %v6132_v7, 1  ;;  %vm8324_vm3 = vmmov %vm8310_vm13  ;;  %v3114_v7 = vsel %vm5815_vm6, %v8248_v58, 0.0  ;;  %v3116_v58 = vsel %vm5839_vm7, %v8277_v18, 0.0  ;;  %5181 = vmatprep.subr.bf16.mxu0 %v6776_v12  ;;  %v8382_v12 = vld [vmem:[#allocation87_spill] sm:$0xff] }
 0x17f   : > { %8311 = vst [vmem:[#allocation46_spill] sm:$0xff] %v6733_v6  ;;  %v6750_v5 = vsel %vm8310_vm13, %v8317_v48, %v8316_v56  ;;  %v8318_v6 = vrot.slane %v6065_v22, 1  ;;  %v8319_v52 = vmov %v8316_v56  ;;  %v8325_v56 = vrot.slane %v6156_v13, 1  ;;  %vm8327_vm13 = vmmov %vm8324_vm3 }
 0x180   : > { %8321 = vst [vmem:[#allocation40_spill] sm:$0xff] %v6760_v42  ;;  %v6767_v40 = vsel %vm8324_vm3, %v8323_v16, %v8322_v19  ;;  %v8326_v22 = vmov %v8322_v19  ;;  %v8329_v16 = vld [vmem:[#allocation48_spill] sm:$0xff]  ;;  %v6795_v53 = vsel %vm8324_vm3, %v8334_v35, %v8333_v3  ;;  %v6802_v10 = vpack.c.bf16 %v8270_v43, %v3114_v7  ;;  %v8350_v7 = vld [vmem:[#allocation77_spill] sm:$0xff] }
 0x181   : > { %v6757_v61 = vsel %vm8320_vm15, %v8319_v52, %v8318_v6  ;;  %v6774_v36 = vsel %vm8327_vm13, %v8326_v22, %v8325_v56  ;;  %v3112_v52 = vsel %vm5769_vm5, %v8246_v9, 0.0  ;;  %v8330_v6 = vand.u32 15, %v8329_v16  ;;  %v8341_v56 = vld [vmem:[#allocation63_spill] sm:$0xff]  ;;  %v8348_v22 = vld [vmem:[#allocation74_spill] sm:$0xff]  ;;  %v8351_v16 = vld [vmem:[#allocation52_spill] sm:$0xff] }
 0x182   : > { %v6799_v29 = vpack.c.bf16 %v8255_v20, %v3112_v52  ;;  %8336 = vst [vmem:[#allocation56_spill] sm:$0xff] %v6802_v10  ;;  %v6808_v19 = vpack.c.bf16 %v8282_v55, %v3116_v58  ;;  %v3118_v33 = vsel %vm8279_vm0, %v8288_v25, 0.0  ;;  %v3120_v48 = vsel %vm8290_vm12, %v8313_v14, 0.0  ;;  %v8339_v20 = vld [vmem:[#allocation71_spill] sm:$0xff]  ;;  %v8346_v25 = vld [vmem:[#allocation70_spill] sm:$0xff]  ;;  %v8357_v3 = vld [vmem:[#allocation53_spill] sm:$0xff] }
 0x183   : > { %vm6786_vm15 = vcmp.lt.s32.totalorder %v8330_v6, 15  ;;  %v3122_v43 = vsel %vm8315_vm8, %v8339_v20, 0.0  ;;  %vm8340_vm5 = vcmask 523264   ;;  %v8342_v18 = vand.u32 15, %v8341_v56  ;;  %v8354_v6 = vld [vmem:[#allocation82_spill] sm:$0xff]  ;;  %v8359_v9 = vld [vmem:[#allocation89_spill] sm:$0xff] }
 0x184   : > { %8335 = vst [vmem:[#allocation31_spill] sm:$0xff] %v6799_v29  ;;  %8338 = vst [vmem:[#allocation57_spill] sm:$0xff] %v6808_v19  ;;  %4998 = vmatmul.mubr.msk.bf16.gmra.mxu1 %vm8340_vm5, %v6608_v51  ;;  %v6828_v0 = vpack.c.bf16 %v8302_v54, %v3118_v33  ;;  %v6831_v31 = vpack.c.bf16 %v8346_v25, %v3120_v48  ;;  %v6834_v52 = vpack.c.bf16 %v8348_v22, %v3122_v43  ;;  %v8356_v54 = vld [vmem:[#allocation83_spill] sm:$0xff]  ;;  %v8360_v58 = vld [vmem:[#allocation66_spill] sm:$0xff] }
 0x185   : > { %vm6823_vm6 = vcmp.lt.s32.totalorder %v8342_v18, 15  ;;  %vm8352_vm7 = vnez %v8351_v16  ;;  %vm8353_vm0 = vmmov %vm8340_vm5  ;;  %vm8358_vm12 = vnez %v8357_v3  ;;  %vm8361_vm13 = vnez %v8360_v58  ;;  %v8362_v48 = vld [vmem:[#allocation94_spill] sm:$0xff]  ;;  %v8363_v43 = vld [vmem:[#allocation68_spill] sm:$0xff] }
 0x186   : > { %8345 = vst [vmem:[#allocation39_spill] sm:$0xff] %v6828_v0  ;;  %8347 = vst [vmem:[#allocation59_spill] sm:$0xff] %v6831_v31  ;;  %v3124_v51 = vsel %vm8352_vm7, %v8350_v7, 0.0  ;;  %5001 = vmatprep.mubr.msk.bf16.mxu1 %vm8353_vm0, %v6611_v32  ;;  %v3126_v35 = vsel %vm8358_vm12, %v8356_v54, 0.0  ;;  %v3128_v33 = vsel %vm8361_vm13, %v8359_v9, 0.0  ;;  %vm8364_vm3 = vnez %v8363_v43  ;;  %v8365_v18 = vld [vmem:[#allocation85_spill] sm:$0xff]  ;;  %5038 = vmatmul.mubr.msk.bf16.gmra.mxu0 %vm8353_vm0, %v6616_v2 }
 0x187   : > { %8349 = vst [vmem:[#allocation64_spill] sm:$0xff] %v6834_v52  ;;  %v6843_v38 = vpack.c.bf16 %v8354_v6, %v3124_v51  ;;  %v3130_v56 = vsel %vm8364_vm3, %v8362_v48, 0.0  ;;  %v6855_v52 = vpack.c.bf16 %v8365_v18, %v3126_v35  ;;  %v8367_v32 = vld [vmem:[#allocation93_spill] sm:$0xff]  ;;  %v8369_v51 = vld [vmem:[#allocation98_spill] sm:$0xff]  ;;  %v8371_v0 = vld [vmem:[#allocation99_spill] sm:$0xff]  ;;  %v8374_v29 = vrot.slane %v6254_v15, 1 }
 0x188   : > { %v6858_v31 = vpack.c.bf16 %v8367_v32, %v3128_v33  ;;  %v8372_v19 = vld [vmem:[#allocation79_spill] sm:$0xff]  ;;  %v8375_v42 = vrot.slane %v6270_v11, 1  ;;  %vm8376_vm3 = vcmask 1046528   ;;  %v8385_v15 = vrot.slane %v6380_v4, 1  ;;  %v8390_v4 = vld [vmem:[#allocation96_spill] sm:$0xff] }
 0x189   : > { %8355 = vst [vmem:[#allocation42_spill] sm:$0xff] %v6843_v38  ;;  %8366 = vst [vmem:[#allocation48_spill] sm:$0xff] %v6855_v52  ;;  %v6861_v38 = vpack.c.bf16 %v8369_v51, %v3130_v56  ;;  %vm8373_vm5 = vnez %v8372_v19  ;;  %v8377_v52 = vld [vmem:[#allocation106_spill] sm:$0xff]  ;;  %v8380_v56 = vld [vmem:[#allocation80_spill] sm:$0xff]  ;;  %v1915_v50 = vsel %vm6547_vm2, %v6757_v61, 0.0  ;;  %v8488_v55 = vsel %vm6593_vm9, %v6680_v28, 0.0 }
 0x18a   : > { %8368 = vst [vmem:[#allocation27_spill] sm:$0xff] %v6858_v31  ;;  %v3132_v10 = vsel %vm8373_vm5, %v8371_v0, 0.0  ;;  %v6873_v35 = vsel %vm8376_vm3, %v8375_v42, %v8374_v29  ;;  %v8379_v31 = vld [vmem:[#allocation21_spill] sm:$0xff]  ;;  %vm8381_vm13 = vnez %v8380_v56  ;;  %vm8383_vm5 = vnez %v8382_v12  ;;  %v8386_v11 = vld [vmem:[#allocation91_spill] sm:$0xff]  ;;  %v8431_v56 = vld [vmem:[#allocation22_spill] sm:$0xff] }
 0x18b   : > { %8370 = vst [vmem:[#allocation71_spill] sm:$0xff] %v6861_v38  ;;  %v6876_v33 = vpack.c.bf16 %v8377_v52, %v3132_v10  ;;  %v3134_v38 = vsel %vm8381_vm13, %v8379_v31, 0.0  ;;  %v3658_v60 = vsel %vm8383_vm5, %v6446_v39, 0.0  ;;  %v8384_v0 = vld [vmem:[#allocation25_spill] sm:$0xff]  ;;  %v8387_v2 = vrot.slane %v8386_v11, 1  ;;  %v8392_v11 = vld [vmem:[#allocation60_spill] sm:$0xff] }
 0x18c   : > { %5041 = vmatprep.mubr.msk.bf16.mxu0 %vm8353_vm0, %v8384_v0  ;;  %v6894_v29 = vpack.c.bf16 %v6627_v63, %v3134_v38  ;;  %v6897_v10 = vpack.c.bf16 %v3658_v60, %v6525_v49  ;;  %v8388_v31 = vld [vmem:[#allocation45_spill] sm:$0xff]  ;;  %vm8391_vm0 = vnez %v8390_v4  ;;  %v8393_v63 = vld [vmem:[#allocation102_spill] sm:$0xff]  ;;  %v8457_v4 = vld [vmem:[#allocation43_spill] sm:$0xff] }
 0x18d   : > { %8378 = vst [vmem:[#allocation63_spill] sm:$0xff] %v6876_v33  ;;  %v6891_v42 = vsel %vm8376_vm3, %v8387_v2, %v8385_v15  ;;  %v3660_v39 = vsel %vm6336_vm11, %v8388_v31, 0.0  ;;  %v8389_v33 = vld [vmem:[#allocation58_spill] sm:$0xff]  ;;  %v3662_v0 = vsel %vm8391_vm0, %v6475_v1, 0.0  ;;  %v3664_v15 = vsel %vm6406_vm1, %v8392_v11, 0.0 }
 0x18e   : > { %v6903_v12 = vpack.c.bf16 %v3660_v39, %v8389_v33  ;;  %vm8394_vm3 = vnez %v8393_v63  ;;  %v6915_v60 = vpack.c.bf16 %v3662_v0, %v6578_v45  ;;  %v6918_v17 = vpack.c.bf16 %v3664_v15, %v6635_v57  ;;  %v8464_v63 = vld [vmem:[#allocation55_spill] sm:$0xff] }
 0x18f   : > { %v3666_v49 = vsel %vm8394_vm3, %v6492_v30, 0.0  ;;  %v3668_v1 = vsel %vm6468_vm10, %v6757_v61, 0.0  ;;  %v3670_v30 = vsel %vm6483_vm4, %v6517_v41, 0.0  ;;  %v3672_v45 = vsel %vm6547_vm2, %v6774_v36, 0.0 }
 0x190   : > { %v6921_v38 = vpack.c.bf16 %v3666_v49, %v6660_v23  ;;  %v6927_v27 = vpack.c.bf16 %v3668_v1, %v6750_v5  ;;  %v3674_v23 = vsel %vm6786_vm15, %v6556_v21, 0.0  ;;  %vm8397_vm11 = vcmask 523264   ;;  %v8401_v49 = vld [vmem:[#allocation24_spill] sm:$0xff] }
 0x191   : > { %5002 = vmatmul.mubr.msk.bf16.gmra.mxu1 %vm8397_vm11, %v6673_v59  ;;  %v6941_v44 = vpack.c.bf16 %v3670_v30, %v6697_v47  ;;  %v6944_v39 = vpack.c.bf16 %v3672_v45, %v6767_v40  ;;  %v6947_v0 = vpack.c.bf16 %v3674_v23, %v6713_v24  ;;  %v3676_v15 = vsel %vm6569_vm14, %v6873_v35, 0.0  ;;  %vm8402_vm1 = vmmov %vm8397_vm11  ;;  %v8405_v45 = vld [vmem:[#allocation101_spill] sm:$0xff] }
 0x192   : > { %8395 = vst [vmem:[#allocation70_spill] sm:$0xff] %v6927_v27  ;;  %5005 = vmatprep.mubr.msk.bf16.mxu1 %vm8402_vm1, %v8401_v49  ;;  %v6955_v1 = vpack.c.bf16 %v3676_v15, %v6795_v53  ;;  %v3678_v59 = vsel %vm6823_vm6, %v6603_v37, 0.0  ;;  %vm8404_vm10 = vnez %v8262_v8  ;;  %v3682_v23 = vsel %vm6593_vm9, %v8405_v45, 0.0  ;;  %v8408_v27 = vld [vmem:[#allocation36_spill] sm:$0xff]  ;;  %vm8409_vm11 = vmmov %vm8402_vm1  ;;  %v8434_v45 = vld [vmem:[#allocation75_spill] sm:$0xff] }
 0x193   : > { %8398 = vst [vmem:[#allocation74_spill] sm:$0xff] %v6941_v44  ;;  %8399 = vst [vmem:[#allocation77_spill] sm:$0xff] %v6944_v39  ;;  %v3680_v30 = vsel %vm8404_vm10, %v6680_v28, 0.0  ;;  %v6972_v15 = vpack.c.bf16 %v3678_v59, %v6730_v46  ;;  %v8407_v39 = vld [vmem:[#allocation100_spill] sm:$0xff]  ;;  %5042 = vmatmul.mubr.msk.bf16.gmra.mxu0 %vm8409_vm11, %v8408_v27  ;;  %v2245_v27 = vsel %vm8358_vm12, %v8350_v7, 0.0  ;;  %v8428_v59 = vld [vmem:[#allocation62_spill] sm:$0xff] }
 0x194   : > { %8400 = vst [vmem:[#allocation52_spill] sm:$0xff] %v6947_v0  ;;  %8403 = vst [vmem:[#allocation82_spill] sm:$0xff] %v6955_v1  ;;  %v8406_v0 = vsel %vm8315_vm8, %v8313_v14, 0.0  ;;  %v6975_v1 = vpack.c.bf16 %v3680_v30, %v6891_v42  ;;  %v6978_v44 = vpack.c.bf16 %v3682_v23, %v8407_v39  ;;  %v1917_v14 = vsel %vm6786_vm15, %v6517_v41, 0.0  ;;  %v8436_v23 = vld [vmem:[#allocation95_spill] sm:$0xff] }
 0x195   : > { %v2265_v49 = vpack.c.bf16 %v8346_v25, %v8406_v0  ;;  %v1937_v25 = vpack.c.bf16 %v1915_v50, %v6750_v5  ;;  %v2243_v39 = vsel %vm8352_vm7, %v8339_v20, 0.0  ;;  %v1938_v0 = vpack.c.bf16 %v1917_v14, %v6697_v47  ;;  %vm8410_vm8 = vmmov %vm8402_vm1  ;;  %v5382_v14 = vld [vmem:[#allocation6 + $0xd0] sm:$0xff]  }
 0x196   : > { %vm8411_vm11 = vmmov %vm8402_vm1  ;;  %v2266_v26 = vpack.c.bf16 %v8348_v22, %v2243_v39  ;;  %v2267_v41 = vpack.c.bf16 %v8354_v6, %v2245_v27  ;;  %v1919_v20 = vsel %vm6569_vm14, %v6774_v36, 0.0  ;;  %v1921_v47 = vsel %vm6823_vm6, %v6556_v21, 0.0  ;;  %v8443_v27 = vld [vmem:[#allocation88_spill] sm:$0xff] }
 0x197   : > { %5045 = vmatprep.mubr.msk.bf16.mxu0 %vm8402_vm1, %v2265_v49  ;;  %vm8412_vm2 = vmmov %vm8402_vm1  ;;  %v1939_v22 = vpack.c.bf16 %v1919_v20, %v6767_v40  ;;  %v1940_v16 = vpack.c.bf16 %v1921_v47, %v6713_v24  ;;  %vm8417_vm14 = vnez %v8363_v43  ;;  %v1925_v24 = vsel %vm6593_vm9, %v6603_v37, 0.0  ;;  %v8422_v43 = vld [vmem:[#allocation99_spill] sm:$0xff]  ;;  %v8437_v49 = vld [vmem:[#allocation49_spill] sm:$0xff] }
 0x198   : > { %vm8413_vm7 = vmmov %vm8402_vm1  ;;  %vm8414_vm1 = vnez %v8360_v58  ;;  %v2249_v6 = vsel %vm8417_vm14, %v8359_v9, 0.0  ;;  %v1942_v58 = vpack.c.bf16 %v1925_v24, %v6730_v46  ;;  %v8444_v20 = vld [vmem:[#allocation30_spill] sm:$0xff]  ;;  %v2791_v24 = vsel %vm8391_vm0, %v8388_v31, 0.0 }
 0x199   : > { %5006 = vmatmul.mubr.msk.bf16.gmra.mxu1 %vm8410_vm8, %v1937_v25  ;;  %v2247_v7 = vsel %vm8414_vm1, %v8356_v54, 0.0  ;;  %vm8415_vm12 = vmmov %vm8412_vm2  ;;  %v2269_v21 = vpack.c.bf16 %v8367_v32, %v2249_v6  ;;  %v1923_v54 = vsel %vm8404_vm10, %v6873_v35, 0.0  ;;  %v8424_v32 = vld [vmem:[#allocation86_spill] sm:$0xff]  ;;  %v8439_v25 = vld [vmem:[#allocation61_spill] sm:$0xff]  ;;  %v2795_v31 = vsel %vm8394_vm3, %v8392_v11, 0.0 }
 0x19a   : > { %5009 = vmatprep.mubr.msk.bf16.mxu1 %vm8411_vm11, %v1938_v0  ;;  %vm8416_vm8 = vmmov %vm8412_vm2  ;;  %v2268_v62 = vpack.c.bf16 %v8365_v18, %v2247_v7  ;;  %v1941_v3 = vpack.c.bf16 %v1923_v54, %v6795_v53  ;;  %v2253_v18 = vsel %vm8381_vm13, %v8422_v43, 0.0  ;;  %v2787_v0 = vsel %vm8383_vm5, %v8439_v25, 0.0  ;;  %v8446_v47 = vld [vmem:[#allocation54_spill] sm:$0xff]  ;;  %v8447_v7 = vld [vmem:[#allocation67_spill] sm:$0xff] }
 0x19b   : > { %5046 = vmatmul.mubr.msk.bf16.gmra.mxu0 %vm8412_vm2, %v2266_v26  ;;  %vm8418_vm11 = vmmov %vm8412_vm2  ;;  %v2271_v37 = vpack.c.bf16 %v8377_v52, %v2253_v18  ;;  %v8433_v52 = vld [vmem:[#allocation84_spill] sm:$0xff]  ;;  %v8441_v26 = vld [vmem:[#allocation23_spill] sm:$0xff] }
 0x19c   : > { %5049 = vmatprep.mubr.msk.bf16.mxu0 %vm8413_vm7, %v2267_v41  ;;  %vm8419_vm7 = vnez %v8372_v19  ;;  %vm8420_vm1 = vmmov %vm8412_vm2  ;;  %v8450_v6 = vld [vmem:[#allocation50_spill] sm:$0xff]  ;;  %v5387_v54 = vld [vmem:[#allocation6 + $0xc0] sm:$0xff]  }
 0x19d   : > { %v2251_v9 = vsel %vm8419_vm7, %v8362_v48, 0.0  ;;  %vm8423_vm10 = vmmov %vm8420_vm1  ;;  %v8427_v48 = vld [vmem:[#allocation76_spill] sm:$0xff]  ;;  %v5389_v43 = vld [vmem:[#allocation6 + $0x118] sm:$0xff]  }
 0x19e   : > { %v2270_v8 = vpack.c.bf16 %v8369_v51, %v2251_v9  ;;  %vm8426_vm14 = vmmov %vm8420_vm1  ;;  %v8453_v9 = vld [vmem:[#allocation38_spill] sm:$0xff]  ;;  %v8455_v18 = vld [vmem:[#allocation47_spill] sm:$0xff] }
 0x19f   : > { %vm8432_vm13 = vmmov %vm8420_vm1  ;;  %v8466_v11 = vld [vmem:[#allocation65_spill] sm:$0xff]  ;;  %v8495_v25 = vld [vmem:[#allocation28_spill] sm:$0xff] }
 0x1a0   : > { %vm8435_vm7 = vmmov %vm8420_vm1 }
 0x1a1   : > { %5010 = vmatmul.mubr.msk.bf16.gmra.mxu1 %vm8415_vm12, %v1939_v22  ;;  %vm8421_vm12 = vmmov %vm8420_vm1  ;;  %v5384_v22 = vld [vmem:[#allocation6 + $0xf0] sm:$0xff]  }
 0x1a2   : > { %5013 = vmatprep.mubr.msk.bf16.mxu1 %vm8416_vm8, %v1940_v16  ;;  %vm8425_vm8 = vnez %v8424_v32  ;;  %v2816_v16 = vpack.c.bf16 %v2787_v0, %v8447_v7  ;;  %vm8452_vm5 = vmmov %vm8420_vm1  ;;  %v8461_v32 = vld [vmem:[#allocation35_spill] sm:$0xff]  ;;  %v8496_v0 = vld [vmem:[#allocation97_spill] sm:$0xff] }
 0x1a3   : > { %5050 = vmatmul.mubr.msk.bf16.gmra.mxu0 %vm8418_vm11, %v2268_v62  ;;  %v1927_v19 = vsel %vm8425_vm8, %v6680_v28, 0.0  ;;  %vm8429_vm11 = vnez %v8428_v59  ;;  %vm8445_vm8 = vmmov %vm8420_vm1  ;;  %v5385_v62 = vld [vmem:[#allocation6 + $0xc8] sm:$0xff]  }
 0x1a4   : > { %5053 = vmatprep.mubr.msk.bf16.mxu0 %vm8412_vm2, %v2269_v21  ;;  %v1943_v46 = vpack.c.bf16 %v1927_v19, %v6891_v42  ;;  %v2783_v51 = vsel %vm8429_vm11, %v8427_v48, 0.0  ;;  %vm8430_vm2 = vmmov %vm8420_vm1  ;;  %v5386_v21 = vld [vmem:[#allocation6 + $0xe8] sm:$0xff]   ;;  %v2799_v19 = vsel %vm6483_vm4, %v6757_v61, 0.0  ;;  %v8473_v61 = vld [vmem:[#allocation78_spill] sm:$0xff] }
 0x1a5   : > { %v2814_v30 = vpack.c.bf16 %v2783_v51, %v8433_v52  ;;  %vm8458_vm0 = vmmov %vm8420_vm1  ;;  %v8468_v48 = vld [vmem:[#allocation44_spill] sm:$0xff]  ;;  %v8471_v51 = vld [vmem:[#allocation69_spill] sm:$0xff] }
 0x1a6   : > { %vm8465_vm3 = vmmov %vm8458_vm0  ;;  %v8478_v52 = vld [vmem:[#allocation81_spill] sm:$0xff] }
 0x1a7   : > { %vm8474_vm4 = vmmov %vm8458_vm0  ;;  %v8502_v28 = vld [vmem:[#allocation33_spill] sm:$0xff] }
 0x1a8   : > { %vm8501_vm9 = vmmov %vm8458_vm0  ;;  %v8505_v7 = vld [vmem:[#allocation37_spill] sm:$0xff] }
 0x1a9   : > { %5014 = vmatmul.mubr.msk.bf16.gmra.mxu1 %vm8420_vm1, %v1941_v3  ;;  %v8451_v3 = vld [vmem:[#allocation29_spill] sm:$0xff] }
 0x1aa   : > { %5017 = vmatprep.mubr.msk.bf16.mxu1 %vm8421_vm12, %v1942_v58  ;;  %vm8438_vm12 = vnez %v8437_v49  ;;  %v5388_v58 = vld [vmem:[#allocation6 + $0xe0] sm:$0xff]  }
 0x1ab   : > { %5054 = vmatmul.mubr.msk.bf16.gmra.mxu0 %vm8423_vm10, %v2270_v8  ;;  %v2785_v50 = vsel %vm8438_vm12, %v8436_v23, 0.0  ;;  %vm8442_vm10 = vmmov %vm8420_vm1  ;;  %v2818_v8 = vpack.c.bf16 %v2791_v24, %v8389_v33  ;;  %v8459_v33 = vld [vmem:[#allocation51_spill] sm:$0xff]  ;;  %v8489_v49 = vld [vmem:[#allocation40_spill] sm:$0xff] }
 0x1ac   : > { %5057 = vmatprep.mubr.msk.bf16.mxu0 %vm8426_vm14, %v2271_v37  ;;  %v2815_v41 = vpack.c.bf16 %v2785_v50, %v8443_v27  ;;  %vm8448_vm14 = vmmov %vm8420_vm1  ;;  %v2820_v37 = vpack.c.bf16 %v2795_v31, %v6635_v57  ;;  %v2803_v57 = vsel %vm6786_vm15, %v6774_v36, 0.0  ;;  %v8479_v36 = vld [vmem:[#allocation90_spill] sm:$0xff]  ;;  %v8493_v50 = vld [vmem:[#allocation72_spill] sm:$0xff] }
 0x1ad   : > { %vm8460_vm12 = vmmov %vm8458_vm0  ;;  %v2824_v2 = vpack.c.bf16 %v2803_v57, %v6767_v40  ;;  %v8484_v40 = vld [vmem:[#allocation92_spill] sm:$0xff] }
 0x1ae   : > { %vm8480_vm15 = vmmov %vm8458_vm0 }
 0x1b1   : > { %5018 = vmatmul.mubr.msk.bf16.gmra.mxu1 %vm8430_vm2, %v1943_v46  ;;  %vm8449_vm2 = vmmov %vm8420_vm1  ;;  %v2822_v46 = vpack.c.bf16 %v2799_v19, %v6750_v5  ;;  %v2807_v5 = vsel %vm6823_vm6, %v6873_v35, 0.0  ;;  %v2828_v35 = vpack.c.bf16 %v8488_v55, %v6891_v42  ;;  %v8503_v42 = vld [vmem:[#allocation20_spill] sm:$0xff]  ;;  %v8510_v19 = vld [vmem:[#allocation31_spill] sm:$0xff] }
 0x1b2   : > { %5069 = vmatprep.mubr.msk.bf16.mxu1 %vm8432_vm13, %v8431_v56  ;;  %vm8454_vm13 = vmmov %vm8420_vm1  ;;  %v8475_v56 = vld [vmem:[#allocation41_spill] sm:$0xff]  ;;  %v2826_v13 = vpack.c.bf16 %v2807_v5, %v6795_v53  ;;  %v8492_v53 = vld [vmem:[#allocation26_spill] sm:$0xff] }
 0x1b3   : > { %5058 = vmatmul.mubr.msk.bf16.gmra.mxu0 %vm8435_vm7, %v8434_v45  ;;  %vm8456_vm7 = vmmov %vm8420_vm1  ;;  %v8486_v45 = vld [vmem:[#allocation103_spill] sm:$0xff] }
 0x1b4   : > { %5109 = vmatprep.mubr.msk.bf16.mxu0 %vm8420_vm1, %v2814_v30  ;;  %v8481_v30 = vld [vmem:[#allocation46_spill] sm:$0xff]  ;;  %vm8490_vm6 = vmmov %vm8458_vm0 }
 0x1b9   : > { %5070 = vmatmul.mubr.msk.bf16.vlgmr.msra.gmra.mxu1 %vm8442_vm10, %v8441_v26  ;;  %vm8462_vm10 = vmmov %vm8458_vm0 }
 0x1ba   : > { %5073 = vmatprep.mubr.msk.bf16.mxu1 %vm8445_vm8, %v8444_v20  ;;  %5142 = vmatpush3.bf16.msra.mxu1 %v8446_v47  ;;  %vm8463_vm8 = vmmov %vm8458_vm0  ;;  %v5390_v47 = vld [vmem:[#allocation6 + $0x110] sm:$0xff]  }
 0x1bb   : > { %5143 = vmatprep.subr.bf16.mxu1 %v5382_v14  ;;  %5110 = vmatmul.mubr.msk.bf16.vlgmr.msra.gmra.mxu0 %vm8448_vm14, %v2815_v41  ;;  %vm8467_vm14 = vmmov %vm8458_vm0 }
 0x1bc   : > { %5113 = vmatprep.mubr.msk.bf16.mxu0 %vm8449_vm2, %v2816_v16  ;;  %5182 = vmatpush3.bf16.msra.mxu0 %v8450_v6  ;;  %vm8469_vm2 = vmmov %vm8458_vm0 }
 0x1bd   : > { %5183 = vmatprep.subr.bf16.mxu0 %v5384_v22 }
 0x1be   : > { %5144 = vmatpush3.bf16.msra.mxu1 %v5382_v14 }
 0x1bf   : > { %5145 = vmatprep.subr.bf16.mxu1 %v5385_v62 }
 0x1c0   : > { %5184 = vmatpush3.bf16.msra.mxu0 %v5384_v22 }
 0x1c1   : > { %5074 = vmatmul.mubr.msk.bf16.gmra.mxu1 %vm8452_vm5, %v8451_v3  ;;  %5185 = vmatprep.subr.bf16.mxu0 %v5386_v21  ;;  %vm8470_vm5 = vmmov %vm8458_vm0 }
 0x1c2   : > { %5077 = vmatprep.mubr.msk.bf16.mxu1 %vm8454_vm13, %v8453_v9  ;;  %5146 = vmatpush3.bf16.msra.mxu1 %v5385_v62  ;;  %vm8472_vm13 = vmmov %vm8458_vm0  ;;  %v8506_v62 = vld [vmem:[#allocation34_spill] sm:$0xff] }
 0x1c3   : > { %5147 = vmatprep.subr.bf16.mxu1 %v5387_v54  ;;  %5114 = vmatmul.mubr.msk.bf16.gmra.mxu0 %vm8456_vm7, %v8455_v18  ;;  %vm8476_vm7 = vmmov %vm8458_vm0 }
 0x1c4   : > { %5117 = vmatprep.mubr.msk.bf16.mxu0 %vm8420_vm1, %v2818_v8  ;;  %5186 = vmatpush3.bf16.msra.mxu0 %v5386_v21  ;;  %vm8477_vm1 = vmmov %vm8458_vm0 }
 0x1c5   : > { %5187 = vmatprep.subr.bf16.mxu0 %v5388_v58 }
 0x1c6   : > { %5148 = vmatpush3.bf16.msra.mxu1 %v5387_v54  ;;  %v5391_v54 = vld [vmem:[#allocation6 + $0x108] sm:$0xff]  }
 0x1c7   : > { %5221 = vmatprep.subr.bf16.mxu1 %v5389_v43 }
 0x1c8   : > { %5188 = vmatpush3.bf16.msra.mxu0 %v5388_v58 }
 0x1c9   : > { %5078 = vmatmul.mubr.msk.bf16.gmra.mxu1 %vm8458_vm0, %v8457_v4 }
 0x1ca   : > { %5081 = vmatprep.mubr.msk.bf16.mxu1 %vm8460_vm12, %v8459_v33  ;;  %vm8482_vm12 = vmmov %vm8458_vm0 }
 0x1cb   : > { %5118 = vmatmul.mubr.msk.bf16.gmra.mxu0 %vm8462_vm10, %v8461_v32  ;;  %vm8483_vm10 = vmmov %vm8458_vm0 }
 0x1cc   : > { %5121 = vmatprep.mubr.msk.bf16.mxu0 %vm8463_vm8, %v2820_v37  ;;  %vm8485_vm8 = vmmov %vm8458_vm0 }
 0x1d1   : > { %5082 = vmatmul.mubr.msk.bf16.gmra.mxu1 %vm8465_vm3, %v8464_v63  ;;  %vm8487_vm3 = vmmov %vm8458_vm0 }
 0x1d2   : > { %5085 = vmatprep.mubr.msk.bf16.mxu1 %vm8467_vm14, %v8466_v11  ;;  %vm8491_vm14 = vmmov %vm8458_vm0 }
 0x1d3   : > { %5122 = vmatmul.mubr.msk.bf16.gmra.mxu0 %vm8469_vm2, %v8468_v48  ;;  %vm8494_vm2 = vnez %v8493_v50  ;;  %v8512_v48 = vld [vmem:[#allocation56_spill] sm:$0xff] }
 0x1d4   : > { %5125 = vmatprep.mubr.msk.bf16.mxu0 %vm8470_vm5, %v2822_v46  ;;  %v3106_v14 = vsel %vm8494_vm2, %v8492_v53, 0.0  ;;  %vm8497_vm5 = vmmov %vm8458_vm0  ;;  %v8516_v53 = vld [vmem:[#allocation57_spill] sm:$0xff] }
 0x1d5   : > { %v3137_v39 = vpack.c.bf16 %v8495_v25, %v3106_v14  ;;  %vm8519_vm2 = vmmov %vm8458_vm0 }
 0x1d9   : > { %5086 = vmatmul.mubr.msk.bf16.gmra.mxu1 %vm8472_vm13, %v8471_v51  ;;  %vm8498_vm13 = vmmov %vm8458_vm0  ;;  %v4911_v22 = vpop.f32.mrf.mxu1 }
 0x1da   : > { %5089 = vmatprep.mubr.msk.bf16.mxu1 %vm8474_vm4, %v8473_v61  ;;  %vm8500_vm4 = vmmov %vm8458_vm0 }
 0x1db   : > { %5126 = vmatmul.mubr.msk.bf16.gmra.mxu0 %vm8476_vm7, %v8475_v56  ;;  %vm8504_vm7 = vnez %v8503_v42  ;;  %v1445_v6 = vpop.f32.mrf.mxu1 }
 0x1dc   : > { %5129 = vmatprep.mubr.msk.bf16.mxu0 %vm8477_vm1, %v2824_v2  ;;  %v3110_v41 = vsel %vm8504_vm7, %v8502_v28, 0.0  ;;  %vm8507_vm1 = vmmov %vm8458_vm0  ;;  %v4951_v21 = vpop.f32.mrf.mxu0 }
 0x1dd   : > { %v3139_v16 = vpack.c.bf16 %v8505_v7, %v3110_v41  ;;  %v7158_v24 = vadd.f32 %v4951_v21, %v4911_v22  ;;  %vm8526_vm7 = vmmov %vm8458_vm0 }
 0x1de   : > { %v1675_v58 = vpop.f32.mrf.mxu0 }
 0x1df   : > { %v7164_v8 = vadd.f32 %v1675_v58, %v1445_v6  ;;  %v8524_v6 = vld [vmem:[#allocation64_spill] sm:$0xff] }
 0x1e0   : > { %v4952_v31 = vpop.f32.mrf.mxu0 }
 0x1e1   : > { %5090 = vmatmul.mubr.msk.bf16.gmra.mxu1 %vm8458_vm0, %v8478_v52 }
 0x1e2   : > { %5093 = vmatprep.mubr.msk.bf16.mxu1 %vm8480_vm15, %v8479_v36  ;;  %vm8508_vm15 = vmmov %vm8458_vm0  ;;  %v1678_v46 = vpop.f32.mrf.mxu0 }
 0x1e3   : > { %5130 = vmatmul.mubr.msk.bf16.gmra.mxu0 %vm8482_vm12, %v8481_v30  ;;  %vm8509_vm12 = vmmov %vm8458_vm0 }
 0x1e4   : > { %5133 = vmatprep.mubr.msk.bf16.mxu0 %vm8483_vm10, %v2826_v13  ;;  %vm8511_vm10 = vmmov %vm8458_vm0  ;;  %v4955_v57 = vpop.f32.mrf.mxu0 }
 0x1e6   : > { %v1691_v5 = vpop.f32.mrf.mxu0 }
 0x1e8   : > { %v4956_v55 = vpop.f32.mrf.mxu0 }
 0x1e9   : > { %5094 = vmatmul.mubr.msk.bf16.gmra.mxu1 %vm8485_vm8, %v8484_v40  ;;  %vm8513_vm8 = vmmov %vm8458_vm0 }
 0x1ea   : > { %5097 = vmatprep.mubr.msk.bf16.mxu1 %vm8487_vm3, %v8486_v45  ;;  %vm8514_vm3 = vmmov %vm8458_vm0  ;;  %v1694_v50 = vpop.f32.mrf.mxu0 }
 0x1eb   : > { %5134 = vmatmul.mubr.msk.bf16.gmra.mxu0 %vm8490_vm6, %v8489_v49  ;;  %vm8515_vm6 = vmmov %vm8458_vm0 }
 0x1ec   : > { %5137 = vmatprep.mubr.msk.bf16.mxu0 %vm8491_vm14, %v2828_v35  ;;  %vm8517_vm14 = vmmov %vm8458_vm0 }
 0x1f1   : > { %5098 = vmatmul.mubr.msk.bf16.gmra.mxu1 %vm8497_vm5, %v8496_v0  ;;  %vm8520_vm5 = vmmov %vm8458_vm0 }
 0x1f2   : > { %5149 = vmatprep.mubr.msk.bf16.mxu1 %vm8498_vm13, %v3137_v39  ;;  %vm8521_vm13 = vmmov %vm8458_vm0 }
 0x1f3   : > { %5138 = vmatmul.mubr.msk.bf16.gmra.mxu0 %vm8500_vm4, %v8499_v34  ;;  %vm8523_vm4 = vmmov %vm8458_vm0 }
 0x1f4   : > { %5189 = vmatprep.mubr.msk.bf16.mxu0 %vm8501_vm9, %v8441_v26  ;;  %v4912_v26 = vpop.f32.mrf.mxu1  ;;  %vm8525_vm9 = vmmov %vm8458_vm0 }
 0x1f5   : > { %v7166_v37 = vadd.f32 %v4952_v31, %v4912_v26 }
 0x1f6   : > { %v1448_v18 = vpop.f32.mrf.mxu1 }
 0x1f8   : > { %v4915_v32 = vpop.f32.mrf.mxu1 }
 0x1f9   : > { %5150 = vmatmul.mubr.msk.bf16.vlgmr.msra.gmra.mxu1 %vm8507_vm1, %v8506_v62  ;;  %v7176_v2 = vadd.f32 %v4955_v57, %v4915_v32  ;;  %vm8527_vm1 = vmmov %vm8458_vm0 }
 0x1fa   : > { %5153 = vmatprep.mubr.msk.bf16.mxu1 %vm8458_vm0, %v3139_v16  ;;  %5222 = vmatpush3.bf16.msra.mxu1 %v5389_v43  ;;  %v5392_v43 = vld [vmem:[#allocation6 + $0x100] sm:$0xff]  }
 0x1fb   : > { %5223 = vmatprep.subr.bf16.mxu1 %v5390_v47  ;;  %5190 = vmatmul.mubr.msk.bf16.vlgmr.msra.gmra.mxu0 %vm8508_vm15, %v8444_v20  ;;  %v7170_v20 = vadd.f32 %v1678_v46, %v1448_v18  ;;  %v8522_v16 = vld [vmem:[#allocation59_spill] sm:$0xff]  ;;  %v8528_v46 = vld [vmem:[#allocation42_spill] sm:$0xff]  ;;  %vm8530_vm15 = vmmov %vm8458_vm0 }
 0x1fc   : > { %5193 = vmatprep.mubr.msk.bf16.mxu0 %vm8509_vm12, %v8451_v3  ;;  %v1461_v3 = vpop.f32.mrf.mxu1  ;;  %vm8531_vm12 = vmmov %vm8458_vm0 }
 0x1fd   : > { %v7180_v13 = vadd.f32 %v1691_v5, %v1461_v3  ;;  %v8529_v3 = vld [vmem:[#allocation48_spill] sm:$0xff] }
 0x1fe   : > { %5224 = vmatpush3.bf16.msra.mxu1 %v5390_v47  ;;  %v4916_v56 = vpop.f32.mrf.mxu1 }
 0x1ff   : > { %5225 = vmatprep.subr.bf16.mxu1 %v5391_v54  ;;  %v7182_v35 = vadd.f32 %v4956_v55, %v4916_v56 }
 0x200   : > { %v1464_v30 = vpop.f32.mrf.mxu1 }
 0x201   : > { %5154 = vmatmul.mubr.msk.bf16.gmra.mxu1 %vm8511_vm10, %v8510_v19  ;;  %v7188_v14 = vadd.f32 %v1694_v50, %v1464_v30  ;;  %vm8532_vm10 = vmmov %vm8458_vm0 }
 0x202   : > { %5157 = vmatprep.mubr.msk.bf16.mxu1 %vm8513_vm8, %v8512_v48  ;;  %5226 = vmatpush3.bf16.msra.mxu1 %v5391_v54  ;;  %v4919_v49 = vpop.f32.mrf.mxu1  ;;  %vm8534_vm8 = vmmov %vm8458_vm0 }
 0x203   : > { %5227 = vmatprep.subr.bf16.mxu1 %v5392_v43  ;;  %5194 = vmatmul.mubr.msk.bf16.gmra.mxu0 %vm8514_vm3, %v8453_v9  ;;  %v8518_v9 = vld [vmem:[#allocation39_spill] sm:$0xff]  ;;  %vm8536_vm3 = vmmov %vm8458_vm0 }
 0x204   : > { %5197 = vmatprep.mubr.msk.bf16.mxu0 %vm8515_vm6, %v8457_v4  ;;  %v1477_v25 = vpop.f32.mrf.mxu1  ;;  %v4959_v4 = vpop.f32.mrf.mxu0  ;;  %vm8537_vm6 = vmmov %vm8458_vm0 }
 0x205   : > { %v7192_v39 = vadd.f32 %v4959_v4, %v4919_v49 }
 0x206   : > { %5228 = vmatpush3.bf16.msra.mxu1 %v5392_v43  ;;  %v4920_v34 = vpop.f32.mrf.mxu1  ;;  %v1707_v28 = vpop.f32.mrf.mxu0 }
 0x207   : > { %v7196_v42 = vadd.f32 %v1707_v28, %v1477_v25  ;;  %v8533_v25 = vld [vmem:[#allocation27_spill] sm:$0xff] }
 0x208   : > { %v1480_v41 = vpop.f32.mrf.mxu1  ;;  %v4960_v47 = vpop.f32.mrf.mxu0 }
 0x209   : > { %5158 = vmatmul.mubr.msk.bf16.gmra.mxu1 %vm8517_vm14, %v8516_v53  ;;  %v7198_v22 = vadd.f32 %v4960_v47, %v4920_v34  ;;  %vm8538_vm14 = vmmov %vm8458_vm0 }
 0x20a   : > { %5161 = vmatprep.mubr.msk.bf16.mxu1 %vm8519_vm2, %v8518_v9  ;;  %v4923_v7 = vpop.f32.mrf.mxu1  ;;  %v1710_v62 = vpop.f32.mrf.mxu0  ;;  %vm8540_vm2 = vmmov %vm8458_vm0 }
 0x20b   : > { %5198 = vmatmul.mubr.msk.bf16.gmra.mxu0 %vm8520_vm5, %v8459_v33  ;;  %v7204_v33 = vadd.f32 %v1710_v62, %v1480_v41  ;;  %vm8541_vm5 = vmmov %vm8458_vm0 }
 0x20c   : > { %5201 = vmatprep.mubr.msk.bf16.mxu0 %vm8521_vm13, %v8464_v63  ;;  %v1493_v21 = vpop.f32.mrf.mxu1  ;;  %v4963_v54 = vpop.f32.mrf.mxu0  ;;  %vm8542_vm13 = vmmov %vm8458_vm0 }
 0x20d   : > { %v7208_v63 = vadd.f32 %v4963_v54, %v4923_v7  ;;  %v8539_v54 = vld [vmem:[#allocation63_spill] sm:$0xff] }
 0x20e   : > { %v4924_v26 = vpop.f32.mrf.mxu1  ;;  %v1723_v58 = vpop.f32.mrf.mxu0 }
 0x20f   : > { %v7212_v18 = vadd.f32 %v1723_v58, %v1493_v21 }
 0x210   : > { %v1496_v31 = vpop.f32.mrf.mxu1  ;;  %v4964_v43 = vpop.f32.mrf.mxu0 }
 0x211   : > { %5162 = vmatmul.mubr.msk.bf16.gmra.mxu1 %vm8523_vm4, %v8522_v16  ;;  %v7214_v32 = vadd.f32 %v4964_v43, %v4924_v26  ;;  %vm8543_vm4 = vmmov %vm8458_vm0  ;;  %v3654_v43 = vsel %vm8429_vm11, %v8436_v23, 0.0 }
 0x212   : > { %5165 = vmatprep.mubr.msk.bf16.mxu1 %vm8525_vm9, %v8524_v6  ;;  %v4927_v19 = vpop.f32.mrf.mxu1  ;;  %v1726_v48 = vpop.f32.mrf.mxu0  ;;  %vm8545_vm9 = vmmov %vm8458_vm0 }
 0x213   : > { %5202 = vmatmul.mubr.msk.bf16.gmra.mxu0 %vm8526_vm7, %v8466_v11  ;;  %v7220_v11 = vadd.f32 %v1726_v48, %v1496_v31  ;;  %vm8546_vm7 = vmmov %vm8458_vm0 }
 0x214   : > { %5205 = vmatprep.mubr.msk.bf16.mxu0 %vm8527_vm1, %v8471_v51  ;;  %v1509_v57 = vpop.f32.mrf.mxu1  ;;  %v4967_v56 = vpop.f32.mrf.mxu0  ;;  %vm8549_vm11 = vmmov %vm8458_vm0 }
 0x215   : > { %v7224_v51 = vadd.f32 %v4967_v56, %v4927_v19  ;;  %v8544_v56 = vld [vmem:[#allocation104_spill] sm:$0xff]  ;;  %vm8550_vm1 = vmmov %vm8458_vm0 }
 0x216   : > { %v4928_v5 = vpop.f32.mrf.mxu1  ;;  %v1739_v30 = vpop.f32.mrf.mxu0 }
 0x217   : > { %v7228_v55 = vadd.f32 %v1739_v30, %v1509_v57  ;;  %v8547_v30 = vmov 0.0|0.0  }
 0x218   : > { %v7230_v49 = vpop.f32.mrf.mxu1  ;;  %v4968_v53 = vpop.f32.mrf.mxu0 }
 0x219   : > { %5166 = vmatmul.mubr.msk.bf16.gmra.mxu1 %vm8458_vm0, %v8528_v46  ;;  %v7232_v50 = vadd.f32 %v4968_v53, %v4928_v5 }
 0x21a   : > { %5169 = vmatprep.mubr.msk.bf16.mxu1 %vm8530_vm15, %v8529_v3  ;;  %v4931_v9 = vpop.f32.mrf.mxu1  ;;  %v7236_v4 = vpop.f32.mrf.mxu0  ;;  %v3683_v3 = vpack.c.bf16 %v3654_v43, %v8443_v27  ;;  %vm8551_vm15 = vmmov %vm8458_vm0 }
 0x21b   : > { %5206 = vmatmul.mubr.msk.bf16.gmra.mxu0 %vm8531_vm12, %v8473_v61  ;;  %v8535_v61 = vld [vmem:[#allocation71_spill] sm:$0xff]  ;;  %vm8552_vm12 = vmmov %vm8458_vm0 }
 0x21c   : > { %5209 = vmatprep.mubr.msk.bf16.mxu0 %vm8532_vm10, %v8478_v52  ;;  %v1525_v34 = vpop.f32.mrf.mxu1  ;;  %v4971_v28 = vpop.f32.mrf.mxu0  ;;  %vm8553_vm10 = vmmov %vm8458_vm0 }
 0x21d   : > { %v7242_v52 = vadd.f32 %v4971_v28, %v4931_v9 }
 0x21e   : > { %v4932_v41 = vpop.f32.mrf.mxu1  ;;  %v1755_v47 = vpop.f32.mrf.mxu0 }
 0x21f   : > { %v7246_v7 = vadd.f32 %v1755_v47, %v1525_v34  ;;  %v8548_v47 = vld [vmem:[#allocation73_spill] sm:$0xff] }
 0x220   : > { %v7248_v16 = vpop.f32.mrf.mxu1  ;;  %v4972_v62 = vpop.f32.mrf.mxu0 }
 0x221   : > { %5170 = vmatmul.mubr.msk.bf16.gmra.mxu1 %vm8534_vm8, %v8533_v25  ;;  %v7250_v6 = vadd.f32 %v4972_v62, %v4932_v41  ;;  %vm8555_vm8 = vmmov %vm8458_vm0 }
 0x222   : > { %5173 = vmatprep.mubr.msk.bf16.mxu1 %vm8536_vm3, %v8535_v61  ;;  %v4935_v21 = vpop.f32.mrf.mxu1  ;;  %v7254_v26 = vpop.f32.mrf.mxu0  ;;  %vm8557_vm3 = vmmov %vm8458_vm0 }
 0x223   : > { %5210 = vmatmul.mubr.msk.bf16.gmra.mxu0 %vm8537_vm6, %v8479_v36  ;;  %vm8559_vm6 = vmmov %vm8458_vm0 }
 0x224   : > { %5213 = vmatprep.mubr.msk.bf16.mxu0 %vm8538_vm14, %v8484_v40  ;;  %v1541_v36 = vpop.f32.mrf.mxu1  ;;  %v4975_v58 = vpop.f32.mrf.mxu0  ;;  %vm8561_vm14 = vmmov %vm8458_vm0 }
 0x225   : > { %v7260_v40 = vadd.f32 %v4975_v58, %v4935_v21 }
 0x226   : > { %v4936_v31 = vpop.f32.mrf.mxu1  ;;  %v1771_v19 = vpop.f32.mrf.mxu0 }
 0x227   : > { %v7267_v46 = vadd.f32 %v1771_v19, %v1541_v36 }
 0x228   : > { %v1544_v48 = vpop.f32.mrf.mxu1 }
 0x229   : > { %5174 = vmatmul.mubr.msk.bf16.gmra.mxu1 %vm8540_vm2, %v8539_v54  ;;  %vm8563_vm2 = vmmov %vm8458_vm0 }
 0x22a   : > { %5177 = vmatprep.mubr.msk.bf16.mxu1 %vm8541_vm5, %v6894_v29  ;;  %v4976_v29 = vpop.f32.mrf.mxu0  ;;  %vm8564_vm5 = vmmov %vm8458_vm0 }
 0x22b   : > { %5214 = vmatmul.mubr.msk.bf16.gmra.mxu0 %vm8542_vm13, %v8486_v45  ;;  %v7270_v57 = vadd.f32 %v4976_v29, %v4936_v31  ;;  %v4939_v45 = vpop.f32.mrf.mxu1  ;;  %vm8565_vm13 = vmmov %vm8458_vm0 }
 0x22c   : > { %5217 = vmatprep.mubr.msk.bf16.mxu0 %vm8543_vm4, %v8496_v0  ;;  %v1774_v5 = vpop.f32.mrf.mxu0  ;;  %vm8566_vm4 = vmmov %vm8458_vm0 }
 0x22d   : > { %v7275_v0 = vadd.f32 %v1774_v5, %v1544_v48  ;;  %v1557_v59 = vpop.f32.mrf.mxu1 }
 0x22e   : > { %v4979_v23 = vpop.f32.mrf.mxu0 }
 0x22f   : > { %v7278_v53 = vadd.f32 %v4979_v23, %v4939_v45  ;;  %v4940_v9 = vpop.f32.mrf.mxu1 }
 0x230   : > { %v1787_v25 = vpop.f32.mrf.mxu0 }
 0x231   : > { %5178 = vmatmul.mubr.msk.bf16.gmra.mxu1 %vm8545_vm9, %v8544_v56  ;;  %v7280_v27 = vadd.f32 %v1787_v25, %v1557_v59  ;;  %v1560_v61 = vpop.f32.mrf.mxu1 }
 0x232   : > { %5229 = vmatprep.mubr.msk.bf16.mxu1 %vm8546_vm7, %v3683_v3  ;;  %v4980_v34 = vpop.f32.mrf.mxu0 }
 0x233   : > { %5218 = vmatmul.mubr.bf16.gmra.mxu0 %v8547_v30  ;;  %v7282_v28 = vadd.f32 %v4980_v34, %v4940_v9  ;;  %v4991_v41 = vpop.f32.mrf.mxu1 }
 0x234   : > { %v2188_v62 = vadd.f32 %v4991_v41, %v7158_v24  ;;  %v1790_v21 = vpop.f32.mrf.mxu0 }
 0x235   : > { %v7289_v54 = vadd.f32 %v1790_v21, %v1560_v61  ;;  %v2059_v36 = vpop.f32.mrf.mxu1 }
 0x236   : > { %v2186_v58 = vadd.f32 %v2059_v36, %v7164_v8  ;;  %v5031_v31 = vpop.f32.mrf.mxu0 }
 0x237   : > { %v7292_v43 = vadd.f32 %v5031_v31, %v2188_v62  ;;  %v4992_v19 = vpop.f32.mrf.mxu1 }
 0x238   : > { %v2189_v48 = vadd.f32 %v4992_v19, %v7166_v37  ;;  %v2388_v29 = vpop.f32.mrf.mxu0 }
 0x239   : > { %5230 = vmatmul.mubr.msk.bf16.vlgmr.msra.gmra.mxu1 %vm8549_vm11, %v8548_v47  ;;  %v7295_v3 = vadd.f32 %v2388_v29, %v2186_v58  ;;  %v2062_v45 = vpop.f32.mrf.mxu1 }
 0x23a   : > { %5233 = vmatprep.mubr.msk.bf16.mxu1 %vm8550_vm1, %v6897_v10  ;;  %v2187_v24 = vadd.f32 %v2062_v45, %v7170_v20  ;;  %v5032_v56 = vpop.f32.mrf.mxu0  ;;  %vm8570_vm1 = vcmask 1046528  }
 0x23b   : > { %v7298_v5 = vadd.f32 %v5032_v56, %v2189_v48  ;;  %v4995_v10 = vpop.f32.mrf.mxu1 }
 0x23c   : > { %v2192_v8 = vadd.f32 %v4995_v10, %v7176_v2  ;;  %v2391_v59 = vpop.f32.mrf.mxu0 }
 0x23d   : > { %v7305_v37 = vadd.f32 %v2391_v59, %v2187_v24  ;;  %v2075_v23 = vpop.f32.mrf.mxu1 }
 0x23e   : > { %v2190_v9 = vadd.f32 %v2075_v23, %v7180_v13  ;;  %v5035_v25 = vpop.f32.mrf.mxu0  ;;  %v8556_v23 = vld [vmem:[#allocation74_spill] sm:$0xff] }
 0x23f   : > { %v7308_v20 = vadd.f32 %v5035_v25, %v2192_v8  ;;  %v4996_v61 = vpop.f32.mrf.mxu1  ;;  %v8554_v8 = vld [vmem:[#allocation70_spill] sm:$0xff] }
 0x240   : > { %v2193_v34 = vadd.f32 %v4996_v61, %v7182_v35  ;;  %v2404_v41 = vpop.f32.mrf.mxu0 }
 0x241   : > { %5234 = vmatmul.mubr.msk.bf16.gmra.mxu1 %vm8458_vm0, %v6903_v12  ;;  %v7311_v47 = vadd.f32 %v2404_v41, %v2190_v9  ;;  %v2078_v12 = vpop.f32.mrf.mxu1  ;;  %vm8571_vm0 = vmmov %vm8570_vm1 }
 0x242   : > { %5237 = vmatprep.mubr.msk.bf16.mxu1 %vm8551_vm15, %v6915_v60  ;;  %v2191_v2 = vadd.f32 %v2078_v12, %v7188_v14  ;;  %v5036_v62 = vpop.f32.mrf.mxu0  ;;  %vm8572_vm15 = vmmov %vm8571_vm0 }
 0x243   : > { %v7314_v21 = vadd.f32 %v5036_v62, %v2193_v34 }
 0x244   : > { %v4999_v60 = vpop.f32.mrf.mxu1  ;;  %v2407_v36 = vpop.f32.mrf.mxu0 }
 0x245   : > { %v2196_v13 = vadd.f32 %v4999_v60, %v7192_v39  ;;  %v7321_v35 = vadd.f32 %v2407_v36, %v2191_v2 }
 0x246   : > { %v2091_v58 = vpop.f32.mrf.mxu1  ;;  %v5039_v19 = vpop.f32.mrf.mxu0 }
 0x247   : > { %v2194_v31 = vadd.f32 %v2091_v58, %v7196_v42  ;;  %v7324_v14 = vadd.f32 %v5039_v19, %v2196_v13  ;;  %v8558_v58 = vld [vmem:[#allocation77_spill] sm:$0xff]  ;;  %v8560_v19 = vld [vmem:[#allocation52_spill] sm:$0xff] }
 0x248   : > { %v5000_v48 = vpop.f32.mrf.mxu1  ;;  %v2420_v45 = vpop.f32.mrf.mxu0 }
 0x249   : > { %5238 = vmatmul.mubr.msk.bf16.gmra.mxu1 %vm8552_vm12, %v6918_v17  ;;  %v2197_v29 = vadd.f32 %v5000_v48, %v7198_v22  ;;  %v7327_v24 = vadd.f32 %v2420_v45, %v2194_v31  ;;  %vm8573_vm12 = vmmov %vm8571_vm0 }
 0x24a   : > { %5241 = vmatprep.mubr.msk.bf16.mxu1 %vm8553_vm10, %v6921_v38  ;;  %v2094_v17 = vpop.f32.mrf.mxu1  ;;  %v5040_v56 = vpop.f32.mrf.mxu0  ;;  %vm8574_vm10 = vmmov %vm8571_vm0 }
 0x24b   : > { %v2195_v39 = vadd.f32 %v2094_v17, %v7204_v33  ;;  %v7330_v10 = vadd.f32 %v5040_v56, %v2197_v29 }
 0x24c   : > { %v2423_v59 = vpop.f32.mrf.mxu0 }
 0x24d   : > { %v7337_v22 = vadd.f32 %v2423_v59, %v2195_v39  ;;  %v1743_v39 = vadd.f32 %v7236_v4, %v7230_v49 }
 0x251   : > { %v5003_v38 = vpop.f32.mrf.mxu1  ;;  %5242 = vmatmul.mubr.msk.bf16.gmra.mxu1 %vm8555_vm8, %v8554_v8  ;;  %vm8575_vm8 = vmmov %vm8571_vm0 }
 0x252   : > { %v2200_v42 = vadd.f32 %v5003_v38, %v7208_v63  ;;  %5245 = vmatprep.mubr.msk.bf16.mxu1 %vm8557_vm3, %v8556_v23  ;;  %vm8576_vm3 = vmmov %vm8571_vm0 }
 0x253   : > { %v2107_v9 = vpop.f32.mrf.mxu1  ;;  %v5043_v61 = vpop.f32.mrf.mxu0 }
 0x254   : > { %v2198_v25 = vadd.f32 %v2107_v9, %v7212_v18  ;;  %v7340_v33 = vadd.f32 %v5043_v61, %v2200_v42 }
 0x255   : > { %v5004_v34 = vpop.f32.mrf.mxu1  ;;  %v2436_v12 = vpop.f32.mrf.mxu0 }
 0x256   : > { %v2201_v41 = vadd.f32 %v5004_v34, %v7214_v32  ;;  %v7343_v2 = vadd.f32 %v2436_v12, %v2198_v25  ;;  %v8562_v25 = vld [vmem:[#allocation82_spill] sm:$0xff] }
 0x257   : > { %v2110_v62 = vpop.f32.mrf.mxu1  ;;  %v5044_v60 = vpop.f32.mrf.mxu0 }
 0x258   : > { %v2199_v63 = vadd.f32 %v2110_v62, %v7220_v11  ;;  %v7346_v13 = vadd.f32 %v5044_v60, %v2201_v41  ;;  %v1759_v62 = vadd.f32 %v7254_v26, %v7248_v16 }
 0x259   : > { %v5007_v36 = vpop.f32.mrf.mxu1  ;;  %5246 = vmatmul.mubr.msk.bf16.gmra.mxu1 %vm8559_vm6, %v8558_v58  ;;  %v2439_v31 = vpop.f32.mrf.mxu0  ;;  %vm8577_vm6 = vmmov %vm8571_vm0 }
 0x25a   : > { %v2204_v18 = vadd.f32 %v5007_v36, %v7224_v51  ;;  %5249 = vmatprep.mubr.msk.bf16.mxu1 %vm8561_vm14, %v8560_v19  ;;  %v7353_v32 = vadd.f32 %v2439_v31, %v2199_v63  ;;  %vm8578_vm14 = vmmov %vm8571_vm0 }
 0x25b   : > { %v2123_v48 = vpop.f32.mrf.mxu1  ;;  %v5047_v45 = vpop.f32.mrf.mxu0 }
 0x25c   : > { %v2202_v29 = vadd.f32 %v2123_v48, %v7228_v55  ;;  %v7356_v11 = vadd.f32 %v5047_v45, %v2204_v18 }
 0x25d   : > { %v5008_v17 = vpop.f32.mrf.mxu1  ;;  %v2452_v38 = vpop.f32.mrf.mxu0 }
 0x25e   : > { %v2205_v56 = vadd.f32 %v5008_v17, %v7232_v50  ;;  %v7361_v51 = vadd.f32 %v2452_v38, %v2202_v29 }
 0x25f   : > { %v2126_v8 = vpop.f32.mrf.mxu1  ;;  %v5048_v59 = vpop.f32.mrf.mxu0 }
 0x260   : > { %v2203_v42 = vadd.f32 %v2126_v8, %v1743_v39  ;;  %v7363_v23 = vadd.f32 %v5048_v59, %v2205_v56 }
 0x261   : > { %v5011_v9 = vpop.f32.mrf.mxu1  ;;  %5250 = vmatmul.mubr.msk.bf16.gmra.mxu1 %vm8563_vm2, %v8562_v25  ;;  %v2455_v61 = vpop.f32.mrf.mxu0  ;;  %vm8579_vm2 = vmmov %vm8571_vm0 }
 0x262   : > { %v2208_v55 = vadd.f32 %v5011_v9, %v7242_v52  ;;  %5253 = vmatprep.mubr.msk.bf16.mxu1 %vm8564_vm5, %v6972_v15  ;;  %v7370_v49 = vadd.f32 %v2455_v61, %v2203_v42  ;;  %vm8580_vm5 = vmmov %vm8571_vm0 }
 0x263   : > { %v2139_v50 = vpop.f32.mrf.mxu1  ;;  %v5051_v34 = vpop.f32.mrf.mxu0 }
 0x264   : > { %v2206_v4 = vadd.f32 %v2139_v50, %v7246_v7  ;;  %v7373_v41 = vadd.f32 %v5051_v34, %v2208_v55 }
 0x265   : > { %v5012_v12 = vpop.f32.mrf.mxu1  ;;  %v2468_v60 = vpop.f32.mrf.mxu0 }
 0x266   : > { %v2209_v63 = vadd.f32 %v5012_v12, %v7250_v6  ;;  %v7378_v52 = vadd.f32 %v2468_v60, %v2206_v4 }
 0x267   : > { %v2142_v36 = vpop.f32.mrf.mxu1  ;;  %v5052_v15 = vpop.f32.mrf.mxu0 }
 0x268   : > { %v2207_v58 = vadd.f32 %v2142_v36, %v1759_v62  ;;  %v7380_v18 = vadd.f32 %v5052_v15, %v2209_v63 }
 0x269   : > { %v5015_v31 = vpop.f32.mrf.mxu1  ;;  %5254 = vmatmul.mubr.msk.bf16.gmra.mxu1 %vm8565_vm13, %v6975_v1  ;;  %v2471_v19 = vpop.f32.mrf.mxu0  ;;  %vm8581_vm13 = vmmov %vm8571_vm0 }
 0x26a   : > { %v2212_v7 = vadd.f32 %v5015_v31, %v7260_v40  ;;  %5257 = vmatprep.mubr.msk.bf16.mxu1 %vm8566_vm4, %v6978_v44  ;;  %v7387_v16 = vadd.f32 %v2471_v19, %v2207_v58  ;;  %vm8582_vm4 = vmmov %vm8571_vm0 }
 0x26b   : > { %v2155_v6 = vpop.f32.mrf.mxu1  ;;  %v5055_v48 = vpop.f32.mrf.mxu0 }
 0x26c   : > { %v2210_v26 = vadd.f32 %v2155_v6, %v7267_v46  ;;  %v7390_v29 = vadd.f32 %v5055_v48, %v2212_v7 }
 0x26d   : > { %v5016_v45 = vpop.f32.mrf.mxu1  ;;  %v2484_v39 = vpop.f32.mrf.mxu0 }
 0x26e   : > { %v2213_v17 = vadd.f32 %v5016_v45, %v7270_v57  ;;  %v7393_v56 = vadd.f32 %v2484_v39, %v2210_v26 }
 0x26f   : > { %v2158_v1 = vpop.f32.mrf.mxu1  ;;  %v5056_v38 = vpop.f32.mrf.mxu0 }
 0x270   : > { %v2211_v40 = vadd.f32 %v2158_v1, %v7275_v0  ;;  %v7396_v8 = vadd.f32 %v5056_v38, %v2213_v17 }
 0x271   : > { %v5019_v44 = vpop.f32.mrf.mxu1  ;;  %5258 = vmatmul.mubr.bf16.gmra.mxu1 %v8547_v30  ;;  %v2487_v42 = vpop.f32.mrf.mxu0 }
 0x272   : > { %v2216_v46 = vadd.f32 %v5019_v44, %v7278_v53  ;;  %v7400_v59 = vadd.f32 %v2487_v42, %v2211_v40 }
 0x273   : > { %v2171_v9 = vpop.f32.mrf.mxu1  ;;  %v5059_v25 = vpop.f32.mrf.mxu0 }
 0x274   : > { %v2214_v57 = vadd.f32 %v2171_v9, %v7280_v27  ;;  %v7403_v55 = vadd.f32 %v5059_v25, %v2216_v46 }
 0x275   : > { %v5020_v61 = vpop.f32.mrf.mxu1  ;;  %v2500_v50 = vpop.f32.mrf.mxu0 }
 0x276   : > { %v2217_v0 = vadd.f32 %v5020_v61, %v7282_v28  ;;  %v7406_v4 = vadd.f32 %v2500_v50, %v2214_v57 }
 0x277   : > { %v2174_v34 = vpop.f32.mrf.mxu1  ;;  %v5060_v12 = vpop.f32.mrf.mxu0 }
 0x278   : > { %v2215_v30 = vadd.f32 %v2174_v34, %v7289_v54  ;;  %v7409_v53 = vadd.f32 %v5060_v12, %v2217_v0 }
 0x279   : > { %v5071_v62 = vpop.f32.mrf.mxu1  ;;  %v2503_v60 = vpop.f32.mrf.mxu0 }
 0x27a   : > { %v2747_v63 = vadd.f32 %v5071_v62, %v7292_v43  ;;  %v7412_v27 = vadd.f32 %v2503_v60, %v2215_v30 }
 0x27b   : > { %v2618_v36 = vpop.f32.mrf.mxu1  ;;  %v5111_v15 = vpop.f32.mrf.mxu0 }
 0x27c   : > { %v2745_v58 = vadd.f32 %v2618_v36, %v7295_v3  ;;  %v7415_v28 = vadd.f32 %v5111_v15, %v2747_v63 }
 0x27d   : > { %v5072_v31 = vpop.f32.mrf.mxu1  ;;  %v2945_v19 = vpop.f32.mrf.mxu0 }
 0x27e   : > { %v2748_v7 = vadd.f32 %v5072_v31, %v7298_v5  ;;  %v7418_v54 = vadd.f32 %v2945_v19, %v2745_v58 }
 0x27f   : > { %v2621_v6 = vpop.f32.mrf.mxu1  ;;  %v5112_v48 = vpop.f32.mrf.mxu0 }
 0x280   : > { %v2746_v26 = vadd.f32 %v2621_v6, %v7305_v37  ;;  %v7421_v43 = vadd.f32 %v5112_v48, %v2748_v7 }
 0x281   : > { %v5075_v45 = vpop.f32.mrf.mxu1  ;;  %v2948_v39 = vpop.f32.mrf.mxu0 }
 0x282   : > { %v2751_v17 = vadd.f32 %v5075_v45, %v7308_v20  ;;  %v7424_v3 = vadd.f32 %v2948_v39, %v2746_v26 }
 0x283   : > { %v2634_v1 = vpop.f32.mrf.mxu1  ;;  %v5115_v38 = vpop.f32.mrf.mxu0 }
 0x284   : > { %v2749_v40 = vadd.f32 %v2634_v1, %v7311_v47  ;;  %v7427_v5 = vadd.f32 %v5115_v38, %v2751_v17 }
 0x285   : > { %v5076_v44 = vpop.f32.mrf.mxu1  ;;  %v2961_v42 = vpop.f32.mrf.mxu0 }
 0x286   : > { %v2752_v46 = vadd.f32 %v5076_v44, %v7314_v21  ;;  %v7430_v37 = vadd.f32 %v2961_v42, %v2749_v40 }
 0x287   : > { %v2637_v9 = vpop.f32.mrf.mxu1  ;;  %v5116_v25 = vpop.f32.mrf.mxu0 }
 0x288   : > { %v2750_v57 = vadd.f32 %v2637_v9, %v7321_v35  ;;  %v7433_v20 = vadd.f32 %v5116_v25, %v2752_v46 }
 0x289   : > { %v5079_v61 = vpop.f32.mrf.mxu1  ;;  %v2964_v50 = vpop.f32.mrf.mxu0 }
 0x28a   : > { %v2755_v0 = vadd.f32 %v5079_v61, %v7324_v14  ;;  %v7436_v47 = vadd.f32 %v2964_v50, %v2750_v57 }
 0x28b   : > { %v2650_v34 = vpop.f32.mrf.mxu1  ;;  %v5119_v12 = vpop.f32.mrf.mxu0 }
 0x28c   : > { %v2753_v30 = vadd.f32 %v2650_v34, %v7327_v24  ;;  %v7439_v21 = vadd.f32 %v5119_v12, %v2755_v0 }
 0x28d   : > { %v5080_v62 = vpop.f32.mrf.mxu1  ;;  %v2977_v60 = vpop.f32.mrf.mxu0 }
 0x28e   : > { %v2756_v63 = vadd.f32 %v5080_v62, %v7330_v10  ;;  %v7442_v35 = vadd.f32 %v2977_v60, %v2753_v30 }
 0x28f   : > { %v2653_v36 = vpop.f32.mrf.mxu1  ;;  %v5120_v15 = vpop.f32.mrf.mxu0 }
 0x290   : > { %v2754_v58 = vadd.f32 %v2653_v36, %v7337_v22  ;;  %v7445_v14 = vadd.f32 %v5120_v15, %v2756_v63 }
 0x291   : > { %v5083_v31 = vpop.f32.mrf.mxu1  ;;  %v2980_v19 = vpop.f32.mrf.mxu0 }
 0x292   : > { %v2759_v7 = vadd.f32 %v5083_v31, %v7340_v33  ;;  %v7448_v24 = vadd.f32 %v2980_v19, %v2754_v58 }
 0x293   : > { %v2666_v6 = vpop.f32.mrf.mxu1  ;;  %v5123_v48 = vpop.f32.mrf.mxu0 }
 0x294   : > { %v2757_v26 = vadd.f32 %v2666_v6, %v7343_v2  ;;  %v7451_v10 = vadd.f32 %v5123_v48, %v2759_v7 }
 0x295   : > { %v5084_v45 = vpop.f32.mrf.mxu1  ;;  %v2993_v39 = vpop.f32.mrf.mxu0 }
 0x296   : > { %v2760_v17 = vadd.f32 %v5084_v45, %v7346_v13  ;;  %v7454_v22 = vadd.f32 %v2993_v39, %v2757_v26 }
 0x297   : > { %v2669_v1 = vpop.f32.mrf.mxu1  ;;  %v5124_v38 = vpop.f32.mrf.mxu0 }
 0x298   : > { %v2758_v40 = vadd.f32 %v2669_v1, %v7353_v32  ;;  %v7457_v33 = vadd.f32 %v5124_v38, %v2760_v17 }
 0x299   : > { %v5087_v44 = vpop.f32.mrf.mxu1  ;;  %v2996_v42 = vpop.f32.mrf.mxu0 }
 0x29a   : > { %v2763_v46 = vadd.f32 %v5087_v44, %v7356_v11  ;;  %v7460_v2 = vadd.f32 %v2996_v42, %v2758_v40 }
 0x29b   : > { %v2682_v9 = vpop.f32.mrf.mxu1  ;;  %v5127_v25 = vpop.f32.mrf.mxu0 }
 0x29c   : > { %v2761_v57 = vadd.f32 %v2682_v9, %v7361_v51  ;;  %v7463_v13 = vadd.f32 %v5127_v25, %v2763_v46 }
 0x29d   : > { %v5088_v61 = vpop.f32.mrf.mxu1  ;;  %v3009_v50 = vpop.f32.mrf.mxu0 }
 0x29e   : > { %v2764_v0 = vadd.f32 %v5088_v61, %v7363_v23  ;;  %v7466_v32 = vadd.f32 %v3009_v50, %v2761_v57 }
 0x29f   : > { %v2685_v34 = vpop.f32.mrf.mxu1  ;;  %v5128_v12 = vpop.f32.mrf.mxu0 }
 0x2a0   : > { %v2762_v30 = vadd.f32 %v2685_v34, %v7370_v49  ;;  %v7469_v11 = vadd.f32 %v5128_v12, %v2764_v0 }
 0x2a1   : > { %v5091_v62 = vpop.f32.mrf.mxu1  ;;  %v3012_v60 = vpop.f32.mrf.mxu0 }
 0x2a2   : > { %v2767_v63 = vadd.f32 %v5091_v62, %v7373_v41  ;;  %v7472_v51 = vadd.f32 %v3012_v60, %v2762_v30 }
 0x2a3   : > { %v2698_v36 = vpop.f32.mrf.mxu1  ;;  %v5131_v15 = vpop.f32.mrf.mxu0 }
 0x2a4   : > { %v2765_v58 = vadd.f32 %v2698_v36, %v7378_v52  ;;  %v7475_v23 = vadd.f32 %v5131_v15, %v2767_v63 }
 0x2a5   : > { %v5092_v31 = vpop.f32.mrf.mxu1  ;;  %v3025_v19 = vpop.f32.mrf.mxu0 }
 0x2a6   : > { %v2768_v7 = vadd.f32 %v5092_v31, %v7380_v18  ;;  %v7478_v49 = vadd.f32 %v3025_v19, %v2765_v58 }
 0x2a7   : > { %v2701_v6 = vpop.f32.mrf.mxu1  ;;  %v5132_v48 = vpop.f32.mrf.mxu0 }
 0x2a8   : > { %v2766_v26 = vadd.f32 %v2701_v6, %v7387_v16  ;;  %v7481_v41 = vadd.f32 %v5132_v48, %v2768_v7 }
 0x2a9   : > { %v5095_v45 = vpop.f32.mrf.mxu1  ;;  %v3028_v39 = vpop.f32.mrf.mxu0 }
 0x2aa   : > { %v2771_v17 = vadd.f32 %v5095_v45, %v7390_v29  ;;  %v7484_v52 = vadd.f32 %v3028_v39, %v2766_v26 }
 0x2ab   : > { %v2714_v1 = vpop.f32.mrf.mxu1  ;;  %v5135_v38 = vpop.f32.mrf.mxu0 }
 0x2ac   : > { %v2769_v40 = vadd.f32 %v2714_v1, %v7393_v56  ;;  %v7487_v18 = vadd.f32 %v5135_v38, %v2771_v17 }
 0x2ad   : > { %v5096_v44 = vpop.f32.mrf.mxu1  ;;  %v3041_v42 = vpop.f32.mrf.mxu0 }
 0x2ae   : > { %v2772_v46 = vadd.f32 %v5096_v44, %v7396_v8  ;;  %v7490_v16 = vadd.f32 %v3041_v42, %v2769_v40 }
 0x2af   : > { %v2717_v9 = vpop.f32.mrf.mxu1  ;;  %v5136_v25 = vpop.f32.mrf.mxu0 }
 0x2b0   : > { %v2770_v57 = vadd.f32 %v2717_v9, %v7400_v59  ;;  %v7493_v29 = vadd.f32 %v5136_v25, %v2772_v46 }
 0x2b1   : > { %v5099_v61 = vpop.f32.mrf.mxu1  ;;  %v3044_v50 = vpop.f32.mrf.mxu0 }
 0x2b2   : > { %v2775_v0 = vadd.f32 %v5099_v61, %v7403_v55  ;;  %v7496_v56 = vadd.f32 %v3044_v50, %v2770_v57 }
 0x2b3   : > { %v2730_v34 = vpop.f32.mrf.mxu1  ;;  %v5139_v12 = vpop.f32.mrf.mxu0 }
 0x2b4   : > { %v2773_v30 = vadd.f32 %v2730_v34, %v7406_v4  ;;  %v7499_v8 = vadd.f32 %v5139_v12, %v2775_v0 }
 0x2b5   : > { %v5100_v62 = vpop.f32.mrf.mxu1  ;;  %v3057_v59 = vpop.f32.mrf.mxu0 }
 0x2b6   : > { %v7502_v63 = vadd.f32 %v5100_v62, %v7409_v53  ;;  %v7504_v60 = vadd.f32 %v3057_v59, %v2773_v30 }
 0x2b7   : > { %v2733_v36 = vpop.f32.mrf.mxu1  ;;  %v7509_v55 = vpop.f32.mrf.mxu0 }
 0x2b8   : > { %v7507_v58 = vadd.f32 %v2733_v36, %v7412_v27 }
 0x2b9   : > { %v5151_v15 = vpop.f32.mrf.mxu1  ;;  %v7512_v4 = vpop.f32.mrf.mxu0 }
 0x2ba   : > { %v3397_v31 = vadd.f32 %v5151_v15, %v7415_v28 }
 0x2bb   : > { %v3268_v7 = vpop.f32.mrf.mxu1  ;;  %v5191_v6 = vpop.f32.mrf.mxu0 }
 0x2bc   : > { %v3395_v19 = vadd.f32 %v3268_v7, %v7418_v54  ;;  %v7515_v53 = vadd.f32 %v5191_v6, %v3397_v31 }
 0x2bd   : > { %v5152_v26 = vpop.f32.mrf.mxu1  ;;  %v3494_v45 = vpop.f32.mrf.mxu0 }
 0x2be   : > { %v3398_v48 = vadd.f32 %v5152_v26, %v7421_v43  ;;  %v7518_v17 = vadd.f32 %v3494_v45, %v3395_v19 }
 0x2bf   : > { %v3271_v27 = vpop.f32.mrf.mxu1  ;;  %v5192_v1 = vpop.f32.mrf.mxu0 }
 0x2c0   : > { %v3396_v39 = vadd.f32 %v3271_v27, %v7424_v3  ;;  %v7521_v40 = vadd.f32 %v5192_v1, %v3398_v48 }
 0x2c1   : > { %v5155_v28 = vpop.f32.mrf.mxu1  ;;  %v3497_v44 = vpop.f32.mrf.mxu0 }
 0x2c2   : > { %v3401_v38 = vadd.f32 %v5155_v28, %v7427_v5  ;;  %v7524_v54 = vadd.f32 %v3497_v44, %v3396_v39 }
 0x2c3   : > { %v3284_v46 = vpop.f32.mrf.mxu1  ;;  %v5195_v9 = vpop.f32.mrf.mxu0 }
 0x2c4   : > { %v3399_v42 = vadd.f32 %v3284_v46, %v7430_v37  ;;  %v7527_v43 = vadd.f32 %v5195_v9, %v3401_v38 }
 0x2c5   : > { %v5156_v57 = vpop.f32.mrf.mxu1  ;;  %v3510_v61 = vpop.f32.mrf.mxu0 }
 0x2c6   : > { %v3402_v25 = vadd.f32 %v5156_v57, %v7433_v20  ;;  %v7530_v3 = vadd.f32 %v3510_v61, %v3399_v42  ;;  %v8567_v57 = vlaneseq }
 0x2c7   : > { %v3287_v0 = vpop.f32.mrf.mxu1  ;;  %v5196_v34 = vpop.f32.mrf.mxu0 }
 0x2c8   : > { %v3400_v50 = vadd.f32 %v3287_v0, %v7436_v47  ;;  %v7533_v5 = vadd.f32 %v5196_v34, %v3402_v25  ;;  %v7586_v25 = vand.u32 127, %v8567_v57  ;;  %v8569_v0 = vld [vmem:[#allocation17_spill] sm:$0xff] }
 0x2c9   : > { %v5159_v30 = vpop.f32.mrf.mxu1  ;;  %v3513_v62 = vpop.f32.mrf.mxu0 }
 0x2ca   : > { %v3405_v12 = vadd.f32 %v5159_v30, %v7439_v21  ;;  %v7536_v37 = vadd.f32 %v3513_v62, %v3400_v50  ;;  %v4147_v50 = vmul.u32 2, %v8569_v0 }
 0x2cb   : > { %v3300_v59 = vpop.f32.mrf.mxu1  ;;  %v5199_v20 = vpop.f32.mrf.mxu0 }
 0x2cc   : > { %v7539_v36 = vadd.f32 %v3300_v59, %v7442_v35  ;;  %v7541_v15 = vadd.f32 %v5199_v20, %v3405_v12  ;;  %vm4155_vm7 = vcmp.eq.s32.totalorder %v7586_v25, %v4147_v50  ;;  %v5525_v12 = vmov 1.0|1.0  }
 0x2cd   : > { %v5160_v31 = vpop.f32.mrf.mxu1  ;;  %v7564_v1 = vpop.f32.mrf.mxu0 }
 0x2ce   : > { %v7544_v7 = vadd.f32 %v5160_v31, %v7445_v14 }
 0x2cf   : > { %v3303_v47 = vpop.f32.mrf.mxu1 }
 0x2d0   : > { %v7547_v19 = vadd.f32 %v3303_v47, %v7448_v24 }
 0x2d1   : > { %v5163_v6 = vpop.f32.mrf.mxu1 }
 0x2d2   : > { %v7550_v21 = vadd.f32 %v5163_v6, %v7451_v10 }
 0x2d3   : > { %v3316_v26 = vpop.f32.mrf.mxu1 }
 0x2d4   : > { %v7553_v48 = vadd.f32 %v3316_v26, %v7454_v22 }
 0x2d5   : > { %v5164_v35 = vpop.f32.mrf.mxu1 }
 0x2d6   : > { %v7556_v45 = vadd.f32 %v5164_v35, %v7457_v33  ;;  %v7572_v33 = vpop.f32.mrf.mxu0 }
 0x2d7   : > { %v3319_v27 = vpop.f32.mrf.mxu1 }
 0x2d8   : > { %v7559_v14 = vadd.f32 %v3319_v27, %v7460_v2  ;;  %v7580_v42 = vpop.f32.mrf.mxu0 }
 0x2d9   : > { %v5167_v39 = vpop.f32.mrf.mxu1 }
 0x2da   : > { %v7562_v24 = vadd.f32 %v5167_v39, %v7463_v13 }
 0x2db   : > { %v3332_v10 = vpop.f32.mrf.mxu1 }
 0x2dc   : > { %v7567_v28 = vadd.f32 %v3332_v10, %v7466_v32 }
 0x2dd   : > { %v5168_v22 = vpop.f32.mrf.mxu1 }
 0x2de   : > { %v7570_v38 = vadd.f32 %v5168_v22, %v7469_v11  ;;  %v8568_v11 = vld [vmem:[#allocation12_spill] sm:$0xff] }
 0x2df   : > { %v3335_v44 = vpop.f32.mrf.mxu1  ;;  %v4146_v61 = vmul.u32 2, %v8568_v11 }
 0x2e0   : > { %v7575_v2 = vadd.f32 %v3335_v44, %v7472_v51 }
 0x2e1   : > { %v5171_v46 = vpop.f32.mrf.mxu1  ;;  %vm4154_vm9 = vcmp.eq.s32.totalorder %v7586_v25, %v4146_v61 }
 0x2e2   : > { %v7578_v13 = vadd.f32 %v5171_v46, %v7475_v23  ;;  %v7595_v23 = vpop.f32.mrf.mxu0  ;;  %vm4604_vm11 = vmpackc.low %vm4155_vm7, %vm4154_vm9 }
 0x2e3   : > { %v3348_v9 = vpop.f32.mrf.mxu1  ;;  %5277 = vmatprep.mubr.msk.bf16.mxu0 %vm4604_vm11, %v5525_v12  ;;  %vm8583_vm9 = vmmov %vm8571_vm0 }
 0x2e4   : > { %v7583_v32 = vadd.f32 %v3348_v9, %v7478_v49  ;;  %v7631_v9 = vld [vmem:[#allocation7] ss:$0 sm:$0xff]  ;;  %vm8584_vm7 = vmmov %vm8571_vm0 }
 0x2e5   : > { %v5172_v34 = vpop.f32.mrf.mxu1  ;;  %vm8585_vm11 = vmmov %vm8571_vm0 }
 0x2e6   : > { %v7591_v51 = vadd.f32 %v5172_v34, %v7481_v41  ;;  %v7604_v41 = vpop.f32.mrf.mxu0 }
 0x2e7   : > { %v3351_v30 = vpop.f32.mrf.mxu1 }
 0x2e8   : > { %v7598_v49 = vadd.f32 %v3351_v30, %v7484_v52  ;;  %v7612_v26 = vpop.f32.mrf.mxu0 }
 0x2e9   : > { %v5175_v62 = vpop.f32.mrf.mxu1 }
 0x2ea   : > { %v7602_v59 = vadd.f32 %v5175_v62, %v7487_v18  ;;  %v7620_v39 = vpop.f32.mrf.mxu0 }
 0x2eb   : > { %v3364_v20 = vpop.f32.mrf.mxu1 }
 0x2ec   : > { %v7607_v31 = vadd.f32 %v3364_v20, %v7490_v16 }
 0x2ed   : > { %v5176_v47 = vpop.f32.mrf.mxu1 }
 0x2ee   : > { %v7610_v6 = vadd.f32 %v5176_v47, %v7493_v29  ;;  %v7627_v29 = vpop.f32.mrf.mxu0 }
 0x2ef   : > { %v3367_v52 = vpop.f32.mrf.mxu1 }
 0x2f0   : > { %v7615_v35 = vadd.f32 %v3367_v52, %v7496_v56  ;;  %v7634_v57 = vpop.f32.mrf.mxu0 }
 0x2f1   : > { %v5179_v27 = vpop.f32.mrf.mxu1 }
 0x2f2   : > { %v7618_v18 = vadd.f32 %v5179_v27, %v7499_v8  ;;  %v7640_v34 = vpop.f32.mrf.mxu0 }
 0x2f3   : > { %v3380_v10 = vpop.f32.mrf.mxu1 }
 0x2f4   : > { %v7623_v16 = vadd.f32 %v3380_v10, %v7504_v60 }
 0x2f5   : > { %v7625_v22 = vpop.f32.mrf.mxu1 }
 0x2f7   : > { %v7629_v44 = vpop.f32.mrf.mxu1 }
 0x2f9   : > { %v5231_v46 = vpop.f32.mrf.mxu1 }
 0x2fa   : > { %v3939_v56 = vadd.f32 %v5231_v46, %v7515_v53  ;;  %v7646_v46 = vpop.f32.mrf.mxu0 }
 0x2fb   : > { %v3810_v8 = vpop.f32.mrf.mxu1 }
 0x2fc   : > { %v3978_v11 = vadd.f32 %v7631_v9, %v3939_v56  ;;  %v3937_v61 = vadd.f32 %v3810_v8, %v7518_v17 }
 0x2fd   : > { %v5232_v60 = vpop.f32.mrf.mxu1 }
 0x2fe   : > { %v3976_v0 = vadd.f32 %v7631_v9, %v3937_v61  ;;  %v3940_v50 = vadd.f32 %v5232_v60, %v7521_v40  ;;  %v4010_v62 = vmax.f32 %v3978_v11, 0.0 }
 0x2ff   : > { %v3813_v30 = vpop.f32.mrf.mxu1 }
 0x300   : > { %v4008_v20 = vmax.f32 %v3976_v0, 0.0  ;;  %v3979_v47 = vadd.f32 %v7631_v9, %v3940_v50  ;;  %v3938_v53 = vadd.f32 %v3813_v30, %v7524_v54  ;;  %v7652_v30 = vpop.f32.mrf.mxu0 }
 0x301   : > { %v5235_v52 = vpop.f32.mrf.mxu1 }
 0x302   : > { %v4040_v27 = vmax.f32 %v4008_v20, %v4010_v62  ;;  %v3977_v10 = vadd.f32 %v7631_v9, %v3938_v53  ;;  %v3943_v17 = vadd.f32 %v5235_v52, %v7527_v43  ;;  %v4011_v8 = vmax.f32 %v3979_v47, 0.0 }
 0x303   : > { %v3826_v56 = vpop.f32.mrf.mxu1 }
 0x304   : > { %v4009_v40 = vmax.f32 %v3977_v10, 0.0  ;;  %v3982_v61 = vadd.f32 %v7631_v9, %v3943_v17  ;;  %v3941_v11 = vadd.f32 %v3826_v56, %v7530_v3  ;;  %v4072_v10 = vrot.slane %v4040_v27, 1 }
 0x305   : > { %v5236_v60 = vpop.f32.mrf.mxu1  ;;  %v3629_v3 = vadd.f32 %v7564_v1, %v7539_v36 }
 0x306   : > { %v4041_v0 = vmax.f32 %v4009_v40, %v4011_v8  ;;  %v3980_v50 = vadd.f32 %v7631_v9, %v3941_v11  ;;  %v3944_v54 = vadd.f32 %v5236_v60, %v7533_v5  ;;  %v4014_v62 = vmax.f32 %v3982_v61, 0.0  ;;  %v7664_v61 = vpop.f32.mrf.mxu0 }
 0x307   : > { %v3829_v20 = vpop.f32.mrf.mxu1  ;;  %v3632_v40 = vadd.f32 %v7572_v33, %v7544_v7 }
 0x308   : > { %v4073_v43 = vrot.slane %v4041_v0, 1  ;;  %v4012_v53 = vmax.f32 %v3980_v50, 0.0  ;;  %v3983_v52 = vadd.f32 %v7631_v9, %v3944_v54  ;;  %v3942_v47 = vadd.f32 %v3829_v20, %v7536_v37 }
 0x309   : > { %v5239_v17 = vpop.f32.mrf.mxu1 }
 0x30a   : > { %v7658_v56 = vmax.f32 %v4012_v53, %v4014_v62  ;;  %v3981_v8 = vadd.f32 %v7631_v9, %v3942_v47  ;;  %v3947_v5 = vadd.f32 %v5239_v17, %v7541_v15  ;;  %v4015_v11 = vmax.f32 %v3983_v52, 0.0  ;;  %v7674_v47 = vpop.f32.mrf.mxu0 }
 0x30b   : > { %v3842_v60 = vpop.f32.mrf.mxu1  ;;  %v4074_v37 = vsel %vm8570_vm1, %v4072_v10, %v4073_v43  ;;  %v3630_v15 = vadd.f32 %v7580_v42, %v7547_v19  ;;  %v3635_v52 = vadd.f32 %v7595_v23, %v7550_v21  ;;  %v3633_v42 = vadd.f32 %v7604_v41, %v7553_v48 }
 0x30c   : > { %v4075_v50 = vrot.slane %v7658_v56, 1  ;;  %v4013_v54 = vmax.f32 %v3981_v8, 0.0  ;;  %v3986_v36 = vadd.f32 %v7631_v9, %v3947_v5  ;;  %v3945_v1 = vadd.f32 %v3842_v60, %v3629_v3 }
 0x30d   : > { %v5240_v62 = vpop.f32.mrf.mxu1  ;;  %v4120_v20 = vmax.f32 %v4040_v27, %v4074_v37 }
 0x30e   : > { %v4043_v53 = vmax.f32 %v4013_v54, %v4015_v11  ;;  %v3984_v7 = vadd.f32 %v7631_v9, %v3945_v1  ;;  %v3948_v33 = vadd.f32 %v5240_v62, %v3632_v40  ;;  %v4018_v10 = vmax.f32 %v3986_v36, 0.0  ;;  %v7685_v54 = vpop.f32.mrf.mxu0 }
 0x30f   : > { %v3845_v17 = vpop.f32.mrf.mxu1  ;;  %v4076_v8 = vsel %vm8571_vm0, %v4073_v43, %v4075_v50  ;;  %v3636_v11 = vadd.f32 %v7612_v26, %v7556_v45  ;;  %v3634_v45 = vadd.f32 %v7620_v39, %v7559_v14  ;;  %v3637_v14 = vadd.f32 %v7634_v57, %v7567_v28 }
 0x310   : > { %v4077_v5 = vrot.slane %v4043_v53, 1  ;;  %v4016_v3 = vmax.f32 %v3984_v7, 0.0  ;;  %v3987_v27 = vadd.f32 %v7631_v9, %v3948_v33  ;;  %v3946_v60 = vadd.f32 %v3845_v17, %v3630_v15 }
 0x311   : > { %v5243_v37 = vpop.f32.mrf.mxu1  ;;  %v4121_v19 = vmax.f32 %v4041_v0, %v4076_v8 }
 0x312   : > { %v7680_v40 = vmax.f32 %v4016_v3, %v4018_v10  ;;  %v3985_v21 = vadd.f32 %v7631_v9, %v3946_v60  ;;  %v3951_v23 = vadd.f32 %v5243_v37, %v3635_v52  ;;  %v4019_v43 = vmax.f32 %v3987_v27, 0.0 }
 0x313   : > { %v3858_v36 = vpop.f32.mrf.mxu1  ;;  %v4078_v1 = vsel %vm8572_vm15, %v4075_v50, %v4077_v5  ;;  %v7688_v62 = vpack.c.bf16 %v4121_v19, %v4120_v20  ;;  %v3639_v50 = vadd.f32 %v7627_v29, %v7562_v24  ;;  %v5215_v20 = vpop.f32.mrf.mxu0  ;;  %v3640_v29 = vadd.f32 %v7640_v34, %v7570_v38 }
 0x314   : > { %v4079_v0 = vrot.slane %v7680_v40, 1  ;;  %v4017_v15 = vmax.f32 %v3985_v21, 0.0  ;;  %v3990_v48 = vadd.f32 %v7631_v9, %v3951_v23  ;;  %v3949_v41 = vadd.f32 %v3858_v36, %v3633_v42 }
 0x315   : > { %v5244_v7 = vpop.f32.mrf.mxu1  ;;  %v4122_v33 = vmax.f32 %v7658_v56, %v4078_v1  ;;  %v3590_v23 = vpop.f32.mrf.mxu0 }
 0x316   : > { %v4045_v26 = vmax.f32 %v4017_v15, %v4019_v43  ;;  %v3988_v52 = vadd.f32 %v7631_v9, %v3949_v41  ;;  %v3952_v10 = vadd.f32 %v5244_v7, %v3636_v11  ;;  %v4022_v17 = vmax.f32 %v3990_v48, 0.0 }
 0x317   : > { %v3861_v8 = vpop.f32.mrf.mxu1  ;;  %v4080_v3 = vsel %vm8573_vm12, %v4077_v5, %v4079_v0  ;;  %v3638_v41 = vadd.f32 %v7646_v46, %v7575_v2  ;;  %v3641_v2 = vadd.f32 %v7664_v61, %v7583_v32 }
 0x318   : > { %v4081_v27 = vrot.slane %v4045_v26, 1  ;;  %v4020_v60 = vmax.f32 %v3988_v52, 0.0  ;;  %v3991_v37 = vadd.f32 %v7631_v9, %v3952_v10  ;;  %v3950_v56 = vadd.f32 %v3861_v8, %v3634_v45 }
 0x319   : > { %v5247_v19 = vpop.f32.mrf.mxu1  ;;  %v4123_v42 = vmax.f32 %v4043_v53, %v4080_v3 }
 0x31a   : > { %v7702_v39 = vmax.f32 %v4020_v60, %v4022_v17  ;;  %v3989_v21 = vadd.f32 %v7631_v9, %v3950_v56  ;;  %v3955_v24 = vadd.f32 %v5247_v19, %v3639_v50  ;;  %v4023_v5 = vmax.f32 %v3991_v37, 0.0 }
 0x31b   : > { %v3874_v11 = vpop.f32.mrf.mxu1  ;;  %v4082_v43 = vsel %vm8574_vm10, %v4079_v0, %v4081_v27  ;;  %v7708_v36 = vpack.c.bf16 %v4123_v42, %v4122_v33  ;;  %v3643_v0 = vadd.f32 %v7652_v30, %v7578_v13  ;;  %v5216_v33 = vpop.f32.mrf.mxu0  ;;  %v3644_v30 = vadd.f32 %v7674_v47, %v7591_v51 }
 0x31c   : > { %v4083_v53 = vrot.slane %v7702_v39, 1  ;;  %v4021_v1 = vmax.f32 %v3989_v21, 0.0  ;;  %v3994_v28 = vadd.f32 %v7631_v9, %v3955_v24  ;;  %v3953_v57 = vadd.f32 %v3874_v11, %v3637_v14 }
 0x31d   : > { %v5248_v15 = vpop.f32.mrf.mxu1  ;;  %v4124_v48 = vmax.f32 %v7680_v40, %v4082_v43  ;;  %v3593_v56 = vpop.f32.mrf.mxu0  ;;  %v3647_v43 = vadd.f32 %v5215_v20, %v7602_v59  ;;  %v3648_v59 = vadd.f32 %v5216_v33, %v7610_v6 }
 0x31e   : > { %v4047_v38 = vmax.f32 %v4021_v1, %v4023_v5  ;;  %v3992_v34 = vadd.f32 %v7631_v9, %v3953_v57  ;;  %v3956_v7 = vadd.f32 %v5248_v15, %v3640_v29  ;;  %v4026_v45 = vmax.f32 %v3994_v28, 0.0 }
 0x31f   : > { %v3877_v52 = vpop.f32.mrf.mxu1  ;;  %v4084_v10 = vsel %vm8575_vm8, %v4081_v27, %v4083_v53  ;;  %v3642_v5 = vadd.f32 %v7685_v54, %v7598_v49  ;;  %v3645_v49 = vadd.f32 %v3590_v23, %v7607_v31  ;;  %v3103_v23 = vadd.f32 %v7509_v55, %v7502_v63 }
 0x320   : > { %v4085_v50 = vrot.slane %v4047_v38, 1  ;;  %v4024_v17 = vmax.f32 %v3992_v34, 0.0  ;;  %v3995_v8 = vadd.f32 %v7631_v9, %v3956_v7  ;;  %v3954_v40 = vadd.f32 %v3877_v52, %v3638_v41 }
 0x321   : > { %v5251_v3 = vpop.f32.mrf.mxu1  ;;  %v4125_v60 = vmax.f32 %v4045_v26, %v4084_v10 }
 0x322   : > { %v7722_v46 = vmax.f32 %v4024_v17, %v4026_v45  ;;  %v3993_v37 = vadd.f32 %v7631_v9, %v3954_v40  ;;  %v3959_v13 = vadd.f32 %v5251_v3, %v3643_v0  ;;  %v4027_v27 = vmax.f32 %v3995_v8, 0.0 }
 0x323   : > { %v3890_v19 = vpop.f32.mrf.mxu1  ;;  %v4086_v42 = vsel %vm8576_vm3, %v4083_v53, %v4085_v50  ;;  %v7728_v14 = vpack.c.bf16 %v4125_v60, %v4124_v48  ;;  %v5219_v53 = vpop.f32.mrf.mxu0  ;;  %v3101_v3 = vadd.f32 %v7512_v4, %v7507_v58  ;;  %v3646_v60 = vadd.f32 %v3593_v56, %v7615_v35 }
 0x324   : > { %v4087_v26 = vrot.slane %v7722_v46, 1  ;;  %v4025_v21 = vmax.f32 %v3993_v37, 0.0  ;;  %v3998_v32 = vadd.f32 %v7631_v9, %v3959_v13  ;;  %v3957_v61 = vadd.f32 %v3890_v19, %v3641_v2 }
 0x325   : > { %v5252_v24 = vpop.f32.mrf.mxu1  ;;  %v4126_v29 = vmax.f32 %v7702_v39, %v4086_v42  ;;  %v3606_v20 = vpop.f32.mrf.mxu0 }
 0x326   : > { %v4049_v51 = vmax.f32 %v4025_v21, %v4027_v27  ;;  %v3996_v47 = vadd.f32 %v7631_v9, %v3957_v61  ;;  %v3960_v11 = vadd.f32 %v5252_v24, %v3644_v30  ;;  %v4030_v1 = vmax.f32 %v3998_v32, 0.0 }
 0x327   : > { %v3893_v28 = vpop.f32.mrf.mxu1  ;;  %v4088_v57 = vsel %vm8577_vm6, %v4085_v50, %v4087_v26  ;;  %v3651_v30 = vadd.f32 %v5219_v53, %v7618_v18  ;;  %v3426_v27 = vadd.f32 %v7625_v22, %v3103_v23  ;;  %v5220_v19 = vpop.f32.mrf.mxu0  ;;  %v3649_v35 = vadd.f32 %v3606_v20, %v7623_v16 }
 0x328   : > { %v4089_v15 = vrot.slane %v4049_v51, 1  ;;  %v4028_v48 = vmax.f32 %v3996_v47, 0.0  ;;  %v3999_v41 = vadd.f32 %v7631_v9, %v3960_v11  ;;  %v3958_v34 = vadd.f32 %v3893_v28, %v3642_v5 }
 0x329   : > { %v5255_v39 = vpop.f32.mrf.mxu1  ;;  %v4127_v7 = vmax.f32 %v4047_v38, %v4088_v57  ;;  %v3424_v32 = vadd.f32 %v7629_v44, %v3101_v3  ;;  %v3652_v24 = vadd.f32 %v5220_v19, %v3426_v27  ;;  %v8586_v27 = vld [vmem:[#allocation13_spill] sm:$0xff] }
 0x32a   : > { %v7740_v54 = vmax.f32 %v4028_v48, %v4030_v1  ;;  %v3997_v0 = vadd.f32 %v7631_v9, %v3958_v34  ;;  %v3963_v45 = vadd.f32 %v5255_v39, %v3647_v43  ;;  %v4031_v52 = vmax.f32 %v3999_v41, 0.0 }
 0x32b   : > { %v3906_v10 = vpop.f32.mrf.mxu1  ;;  %v4090_v50 = vsel %vm8578_vm14, %v4087_v26, %v4089_v15  ;;  %v7745_v17 = vpack.c.bf16 %v4127_v7, %v4126_v29  ;;  %v3609_v29 = vpop.f32.mrf.mxu0  ;;  %v4148_v19 = vmul.u32 2, %v8586_v27 }
 0x32c   : > { %v4091_v8 = vrot.slane %v7740_v54, 1  ;;  %v4029_v40 = vmax.f32 %v3997_v0, 0.0  ;;  %v4002_v38 = vadd.f32 %v7631_v9, %v3963_v45  ;;  %v3961_v31 = vadd.f32 %v3906_v10, %v3645_v49 }
 0x32d   : > { %v5256_v6 = vpop.f32.mrf.mxu1  ;;  %v4128_v33 = vmax.f32 %v7722_v46, %v4090_v50  ;;  %v3650_v44 = vadd.f32 %v3609_v29, %v3424_v32  ;;  %vm4156_vm1 = vcmp.eq.s32.totalorder %v7586_v25, %v4148_v19 }
 0x32e   : > { %v4051_v2 = vmax.f32 %v4029_v40, %v4031_v52  ;;  %v4000_v37 = vadd.f32 %v7631_v9, %v3961_v31  ;;  %v3964_v13 = vadd.f32 %v5256_v6, %v3648_v59  ;;  %v4034_v42 = vmax.f32 %v4002_v38, 0.0 }
 0x32f   : > { %v3909_v26 = vpop.f32.mrf.mxu1  ;;  %v4092_v63 = vsel %vm8579_vm2, %v4089_v15, %v4091_v8 }
 0x330   : > { %v4093_v55 = vrot.slane %v4051_v2, 1  ;;  %v4032_v58 = vmax.f32 %v4000_v37, 0.0  ;;  %v4003_v4 = vadd.f32 %v7631_v9, %v3964_v13  ;;  %v3962_v46 = vadd.f32 %v3909_v26, %v3646_v60 }
 0x331   : > { %v5259_v56 = vpop.f32.mrf.mxu1  ;;  %v4129_v21 = vmax.f32 %v4049_v51, %v4092_v63  ;;  %v8588_v63 = vld [vmem:[#allocation14_spill] sm:$0xff] }
 0x332   : > { %v4052_v61 = vmax.f32 %v4032_v58, %v4034_v42  ;;  %v4001_v18 = vadd.f32 %v7631_v9, %v3962_v46  ;;  %v3967_v22 = vadd.f32 %v5259_v56, %v3651_v30  ;;  %v4035_v5 = vmax.f32 %v4003_v4, 0.0  ;;  %v8587_v42 = vld [vmem:[#allocation15_spill] sm:$0xff]  ;;  %v8589_v58 = vld [vmem:[#allocation18_spill] sm:$0xff] }
 0x333   : > { %v3922_v47 = vpop.f32.mrf.mxu1  ;;  %v4094_v11 = vsel %vm8580_vm5, %v4091_v8, %v4093_v55  ;;  %v4140_v43 = vpack.c.bf16 %v4129_v21, %v4128_v33  ;;  %v4149_v26 = vmul.u32 2, %v8587_v42  ;;  %v4151_v4 = vmul.u32 2, %v8589_v58  ;;  %v8591_v46 = vld [vmem:[#allocation19_spill] sm:$0xff] }
 0x334   : > { %v4095_v53 = vrot.slane %v4052_v61, 1  ;;  %v4033_v1 = vmax.f32 %v4001_v18, 0.0  ;;  %v4006_v28 = vadd.f32 %v7631_v9, %v3967_v22  ;;  %v3965_v16 = vadd.f32 %v3922_v47, %v3649_v35 }
 0x335   : > { %v5260_v57 = vpop.f32.mrf.mxu1  ;;  %v4130_v51 = vmax.f32 %v7740_v54, %v4094_v11  ;;  %vm4157_vm0 = vcmp.eq.s32.totalorder %v7586_v25, %v4149_v26  ;;  %vm4159_vm12 = vcmp.eq.s32.totalorder %v7586_v25, %v4151_v4  ;;  %v4153_v35 = vmul.u32 2, %v8591_v46 }
 0x336   : > { %v4053_v15 = vmax.f32 %v4033_v1, %v4035_v5  ;;  %v4004_v48 = vadd.f32 %v7631_v9, %v3965_v16  ;;  %v3968_v41 = vadd.f32 %v5260_v57, %v3652_v24  ;;  %v4038_v34 = vmax.f32 %v4006_v28, 0.0  ;;  %vm4606_vm10 = vmpackc.low %vm4157_vm0, %vm4156_vm1 }
 0x337   : > { %v3925_v39 = vpop.f32.mrf.mxu1  ;;  %v4096_v7 = vsel %vm8581_vm13, %v4093_v55, %v4095_v53  ;;  %v4150_v55 = vmul.u32 2, %v8588_v63  ;;  %vm4161_vm6 = vcmp.eq.s32.totalorder %v7586_v25, %v4153_v35 }
 0x338   : > { %v4097_v49 = vrot.slane %v4053_v15, 1  ;;  %v4036_v0 = vmax.f32 %v4004_v48, 0.0  ;;  %v4007_v45 = vadd.f32 %v7631_v9, %v3968_v41  ;;  %v3966_v59 = vadd.f32 %v3925_v39, %v3650_v44 }
 0x339   : > { %v4131_v20 = vmax.f32 %v4051_v2, %v4096_v7  ;;  %vm4158_vm15 = vcmp.eq.s32.totalorder %v7586_v25, %v4150_v55 }
 0x33a   : > { %v4054_v52 = vmax.f32 %v4036_v0, %v4038_v34  ;;  %v4005_v10 = vadd.f32 %v7631_v9, %v3966_v59  ;;  %v4098_v54 = vsel %vm8582_vm4, %v4095_v53, %v4097_v49  ;;  %v4039_v38 = vmax.f32 %v4007_v45, 0.0  ;;  %vm4608_vm8 = vmpackc.low %vm4159_vm12, %vm4158_vm15 }
 0x33b   : > { %v4132_v50 = vmax.f32 %v4052_v61, %v4098_v54  ;;  %v4141_v8 = vpack.c.bf16 %v4131_v20, %v4130_v51 }
 0x33c   : > { %v4099_v40 = vrot.slane %v4054_v52, 1  ;;  %v4037_v31 = vmax.f32 %v4005_v10, 0.0 }
 0x33e   : > { %v4055_v23 = vmax.f32 %v4037_v31, %v4039_v38  ;;  %v4100_v3 = vsel %vm8583_vm9, %v4097_v49, %v4099_v40 }
 0x33f   : > { %v4133_v6 = vmax.f32 %v4053_v15, %v4100_v3 }
 0x340   : > { %v4101_v33 = vrot.slane %v4055_v23, 1 }
 0x341   : > { %v4142_v60 = vpack.c.bf16 %v4133_v6, %v4132_v50 }
 0x342   : > { %v4102_v37 = vsel %vm8584_vm7, %v4099_v40, %v4101_v33  ;;  %v4119_v2 = vsel %vm8585_vm11, %v4101_v33, 0.0 }
 0x343   : > { %v4134_v13 = vmax.f32 %v4054_v52, %v4102_v37  ;;  %v4135_v30 = vmax.f32 %v4055_v23, %v4119_v2 }
 0x345   : > { %v4143_v9 = vpack.c.bf16 %v4135_v30, %v4134_v13 }
 0x347   : > { %5261 = vmatprep.subr.bf16.mxu0 %v4143_v9 }
 0x348   : > { %5262 = vmatpush3.bf16.msra.mxu0 %v4143_v9 }
 0x349   : > { %5263 = vmatprep.subr.bf16.mxu0 %v4142_v60 }
 0x34c   : > { %5264 = vmatpush3.bf16.msra.mxu0 %v4142_v60 }
 0x34d   : > { %5265 = vmatprep.subr.bf16.mxu0 %v4141_v8 }
 0x350   : > { %5266 = vmatpush3.bf16.msra.mxu0 %v4141_v8 }
 0x351   : > { %5267 = vmatprep.subr.bf16.mxu0 %v4140_v43 }
 0x354   : > { %5268 = vmatpush3.bf16.msra.mxu0 %v4140_v43 }
 0x355   : > { %5269 = vmatprep.subr.bf16.mxu0 %v7745_v17 }
 0x358   : > { %5270 = vmatpush3.bf16.msra.mxu0 %v7745_v17 }
 0x359   : > { %5271 = vmatprep.subr.bf16.mxu0 %v7728_v14 }
 0x35c   : > { %5272 = vmatpush3.bf16.msra.mxu0 %v7728_v14  ;;  %v8590_v14 = vld [vmem:[#allocation16_spill] sm:$0xff] }
 0x35d   : > { %5273 = vmatprep.subr.bf16.mxu0 %v7708_v36  ;;  %v4152_v17 = vmul.u32 2, %v8590_v14 }
 0x35f   : > { %vm4160_vm3 = vcmp.eq.s32.totalorder %v7586_v25, %v4152_v17 }
 0x360   : > { %5274 = vmatpush3.bf16.msra.mxu0 %v7708_v36  ;;  %vm4610_vm14 = vmpackc.low %vm4161_vm6, %vm4160_vm3 }
 0x361   : > { %5275 = vmatprep.subr.bf16.mxu0 %v7688_v62 }
 0x364   : > { %5276 = vmatpush3.bf16.msra.mxu0 %v7688_v62 }
 0x367   : > { %5278 = vmatmul.mubr.msk.bf16.vlgmr.msra.gmra.mxu0 %vm4606_vm10, %v5525_v12 }
 0x368   : > { %5281 = vmatprep.mubr.msk.bf16.mxu0 %vm4608_vm8, %v5525_v12 }
 0x36f   : > { %5282 = vmatmul.mubr.msk.bf16.gmra.mxu0 %vm4610_vm14, %v5525_v12 }
 0x427   : > { %v5279_v36 = vpop.f32.mrf.mxu0 }
 0x429   : > { %v4208_v62 = vpop.f32.mrf.mxu0 }
 0x42b   : > { %v5280_v56 = vpop.f32.mrf.mxu0 }
 0x42c   : > { %v4640_v21 = vpack.c.bf16 %v5280_v56, %v5279_v36 }
 0x42d   : > { %v4211_v32 = vpop.f32.mrf.mxu0 }
 0x42e   : > { %4652 = vst [vmem:[%s279_s30 + $0x8] sm:$0xff] %v4640_v21   ;;  %v4635_v61 = vpack.c.bf16 %v4211_v32, %v4208_v62 }
 0x42f   : > { %v5283_v18 = vpop.f32.mrf.mxu0 }
 0x430   : > { %4636 = vst [vmem:[%s279_s30] sm:$0xff] %v4635_v61  }
 0x431   : > { %v4224_v22 = vpop.f32.mrf.mxu0 }
 0x433   : > { %v5284_v24 = vpop.f32.mrf.mxu0 }
 0x434   : > { %v4650_v25 = vpack.c.bf16 %v5284_v24, %v5283_v18 }
 0x435   : > { %v4227_v29 = vpop.f32.mrf.mxu0 }
 0x436   : > { %4654 = vst [vmem:[%s279_s30 + $0x18] sm:$0xff] %v4650_v25   ;;  %v4645_v12 = vpack.c.bf16 %v4227_v29, %v4224_v22 }
 0x438   : > { %4653 = vst [vmem:[%s279_s30 + $0x10] sm:$0xff] %v4645_v12  }
 0x439 PF: > { %s18_s18 = sadd.s32 1, %s5515_s18  }
 0x43a   : > { %p15_p2 = scmp.ge.s32.totalorder %s18_s18, 4  }
 0x43c   :  { %17 = sbr.rel (!%p15_p2) target bundleno = 3 (0x3), region = 95 }
 0x441   :  { %4300 = vsyncpa [#allocation3], 1 }
 0x442   :  { %4302 = vsyncpa [#allocation3 + $0x1], 1 }
 0x443   :  { %4303 = vsyncpa [#allocation5], 1 }
 0x444   :  { %4304 = vsyncpa [#allocation8], 1 }

// kernel: forward.3
= control target key start
LH: loop header
LB: loop body
LE: loop exit
PB: predicated region body
PF: predicated region fallthrough
CT: control target
= control target key end

     0   :  { %10 = vsyncpa [#allocation3], 0  ;;  %s8136_s0 = inlined_call_operand.vmem [shape: bf16[2,8192], index: 0, kind: input, shape index: {}]   ;;  %s8137_s1 = inlined_call_operand.hbm [shape: bf16[8192,128], index: 1, kind: input, shape index: {}]   ;;  %s8138_s2 = inlined_call_operand.hbm [shape: f32[1,128], index: 2, kind: input, shape index: {}]   ;;  %s8139_s3 = inlined_call_operand.vmem [shape: bf16[128,4], index: 3, kind: input, shape index: {}]   ;;  %s8140_s4 = inlined_call_operand.hbm [shape: f32[1,4], index: 4, kind: input, shape index: {}]   ;;  %s8141_s5 = inlined_call_operand.hbm [shape: f32[2,4], index: 5, kind: output, shape index: {}]  }
   0x1   :  { %11 = vsyncpa [#allocation6], 0 }
   0x2   :  { %12 = vsyncpa [#allocation4], 0  ;;  %s7923_s18 = smov [#allocation5]   ;;  %s7924_s20 = smov [#allocation2]  }
   0x3   :  { %s33_s19 = sshll.u32 %s7923_s18, 4  ;;  %s20_s21 = sshll.u32 %s7924_s20, 4  ;;  %s34_s19 = int_to_ptr.vmem [resolvable:$true] %s33_s19  ;;  %s21_s21 = int_to_ptr.vmem [resolvable:$true] %s20_s21 }
   0x4   :  { %s7845_s22 = scalar_lea.vmem %s34_s19, 16  ;;  %s7849_s23 = scalar_lea.vmem %s34_s19, 32 }
   0x5   :  { %p7846_p0 = scmp.ne.s32.totalorder %s34_s19, %s7845_s22  ;;  %p7850_p1 = scmp.lt.s32.totalorder %s34_s19, %s34_s19 }
   0x6   :  { %p7851_p2 = scmp.lt.s32.totalorder %s7849_s23, %s7845_s22 }
   0x8   :  { %p7852_p3 = por %p7851_p2, %p7850_p1 }
   0xa   :  { %p7853_p4 = pnand %p7852_p3, %p7846_p0 }
   0xc   :  { %7856 = shalt.err (!%p7853_p4)
}
   0xd   :  { %36 = dma.hbm_to_vmem [thread:$0]  %s8138_s2, 16, %s34_s19, [#allocation6]  }
   0xe   :  { %s7865_s26 = scalar_lea.vmem %s21_s21, 65536  ;;  %p7870_p6 = scmp.lt.s32.totalorder %s21_s21, %s21_s21 }
   0xf   :  { %p7866_p5 = scmp.ne.s32.totalorder %s21_s21, %s7865_s26  ;;  %p7871_p7 = scmp.lt.s32.totalorder %s7865_s26, %s7865_s26 }
  0x11   :  { %p7872_p8 = por %p7871_p7, %p7870_p6 }
  0x13   :  { %p7873_p9 = pnand %p7872_p8, %p7866_p5 }
  0x15   :  { %7876 = shalt.err (!%p7873_p9)
}
  0x16   :  { %s7925_s27 = smov 64   ;;  %s7926_s28 = smov 4  }
  0x17   :  { %26 = dma.hbm_to_vmem [thread:$0]  %s8137_s1, 65536, %s21_s21, [#allocation3], %s7925_s27, %s7925_s27, %s7926_s28  }
  0x18   :  { %s7927_s6 = smov [#allocation7]  }
  0x19   :  { %s45_s7 = sshll.u32 %s7927_s6, 4  ;;  %s46_s7 = int_to_ptr.vmem [resolvable:$true] %s45_s7 }
  0x1a   :  { %s7885_s8 = scalar_lea.vmem %s46_s7, 16  ;;  %s7889_s9 = scalar_lea.vmem %s46_s7, 32 }
  0x1b   :  { %p7886_p10 = scmp.ne.s32.totalorder %s46_s7, %s7885_s8  ;;  %p7890_p11 = scmp.lt.s32.totalorder %s46_s7, %s46_s7 }
  0x1c   :  { %p7891_p12 = scmp.lt.s32.totalorder %s7889_s9, %s7885_s8 }
  0x1e   :  { %p7892_p13 = por %p7891_p12, %p7890_p11 }
  0x20   :  { %p7893_p0 = pnand %p7892_p13, %p7886_p10 }
  0x22   :  { %7896 = shalt.err (!%p7893_p0)
}
  0x23   :  { %48 = dma.hbm_to_vmem [thread:$0]  %s8140_s4, 16, %s46_s7, [#allocation6]  }
  0x24   :  { %7917 = dma.done.wait [#allocation3], 65536  }
  0x25   :  { %7918 = vsyncadd [#allocation3], 4294901760 }
  0x26   :  { %7919 = dma.done.wait [#allocation6], 32  }
  0x27   :  { %7920 = vsyncadd [#allocation6], 4294967264  ;;  %v7309_v0 = vld [vmem:[#allocation2 + $0x78] sm:$0xff]   ;;  %v7313_v4 = vld [vmem:[#allocation2 + $0x70] sm:$0xff]   ;;  %v7928_v22 = vmov 1966171168   ;;  %v1110_v24 = vlaneseq }
  0x28   :  { %v7310_v1 = vld [vmem:[#allocation2 + $0xf8] sm:$0xff]   ;;  %6567 = vmatprep.subr.bf16.mxu0 %v7309_v0  ;;  %v7314_v5 = vld [vmem:[#allocation2 + $0xf0] sm:$0xff]   ;;  %v7317_v8 = vld [vmem:[#allocation2 + $0x68] sm:$0xff]   ;;  %v1108_v23 = vunpack.c.l.s4 %v7928_v22  ;;  %vm7930_vm0 = vmmov 0   ;;  %vm6027_vm1 = vcmask 25600  }
  0x29   :  { %v7311_v2 = vld [vmem:[#allocation2 + $0x38] sm:$0xff]   ;;  %6589 = vmatprep.subr.bf16.mxu1 %v7310_v1  ;;  %v7315_v6 = vld [vmem:[#allocation2 + $0x30] sm:$0xff]   ;;  %v7318_v9 = vld [vmem:[#allocation2 + $0xe8] sm:$0xff]   ;;  %v1111_v30 = vshrl.u32 %v1110_v24, 7 }
  0x2a   :  { %v7312_v3 = vld [vmem:[#allocation2 + $0xb8] sm:$0xff]   ;;  %6568 = vmatpush3.bf16.msra.mxu0 %v7311_v2  ;;  %v7316_v7 = vld [vmem:[#allocation2 + $0xb0] sm:$0xff]   ;;  %v7319_v10 = vld [vmem:[#allocation2 + $0x28] sm:$0xff]   ;;  %v1109_v29 = vunpack.c.0.s8 %v1108_v23 }
  0x2b   :  { %6590 = vmatpush3.bf16.msra.mxu1 %v7312_v3  ;;  %6569 = vmatprep.subr.bf16.mxu0 %v7313_v4  ;;  %v7320_v11 = vld [vmem:[#allocation2 + $0xa8] sm:$0xff]   ;;  %v7321_v12 = vld [vmem:[#allocation2 + $0x60] sm:$0xff]   ;;  %v7325_v16 = vld [vmem:[#allocation2 + $0x58] sm:$0xff]  }
  0x2c   :  { %6591 = vmatprep.subr.bf16.mxu1 %v7314_v5  ;;  %v7322_v13 = vld [vmem:[#allocation2 + $0xe0] sm:$0xff]   ;;  %v7326_v17 = vld [vmem:[#allocation2 + $0xd8] sm:$0xff]   ;;  %v7329_v20 = vld [vmem:[#allocation2 + $0x50] sm:$0xff]   ;;  %v7971_v35 = vsub.s32 %v1109_v29, %v1111_v30 }
  0x2d   :  { %v7323_v14 = vld [vmem:[#allocation2 + $0x20] sm:$0xff]   ;;  %v7327_v18 = vld [vmem:[#allocation2 + $0x18] sm:$0xff]   ;;  %v7330_v21 = vld [vmem:[#allocation2 + $0xd0] sm:$0xff]  }
  0x2e   :  { %6570 = vmatpush3.bf16.msra.mxu0 %v7315_v6  ;;  %v7324_v15 = vld [vmem:[#allocation2 + $0xa0] sm:$0xff]   ;;  %v7328_v19 = vld [vmem:[#allocation2 + $0x98] sm:$0xff]   ;;  %v7331_v25 = vld [vmem:[#allocation2 + $0x10] sm:$0xff]  }
  0x2f   :  { %6592 = vmatpush3.bf16.msra.mxu1 %v7316_v7  ;;  %6571 = vmatprep.subr.bf16.mxu0 %v7317_v8  ;;  %v7332_v26 = vld [vmem:[#allocation2 + $0x90] sm:$0xff]   ;;  %v7333_v27 = vld [vmem:[#allocation2 + $0x48] sm:$0xff]   ;;  %v7337_v33 = vld [vmem:[#allocation2 + $0x40] sm:$0xff]  }
  0x30   :  { %6593 = vmatprep.subr.bf16.mxu1 %v7318_v9  ;;  %v7334_v28 = vld [vmem:[#allocation2 + $0xc8] sm:$0xff]   ;;  %v7338_v34 = vld [vmem:[#allocation2 + $0xc0] sm:$0xff]   ;;  %v7342_v41 = vld [vmem:[#allocation2 + $0x178] sm:$0xff]  }
  0x31   :  { %v7335_v31 = vld [vmem:[#allocation2 + $0x8] sm:$0xff]   ;;  %v7339_v36 = vld [vmem:[#allocation2] sm:$0xff]   ;;  %v7343_v42 = vld [vmem:[#allocation2 + $0x1f8] sm:$0xff]  }
  0x32   :  { %6572 = vmatpush3.bf16.msra.mxu0 %v7319_v10  ;;  %v7336_v32 = vld [vmem:[#allocation2 + $0x88] sm:$0xff]   ;;  %v7340_v37 = vld [vmem:[#allocation2 + $0x80] sm:$0xff]   ;;  %v7344_v46 = vld [vmem:[#allocation2 + $0x138] sm:$0xff]  }
  0x33   :  { %6594 = vmatpush3.bf16.msra.mxu1 %v7320_v11  ;;  %6573 = vmatprep.subr.bf16.mxu0 %v7321_v12  ;;  %v59_v38 = vld [vmem:[%s8136_s0] sm:$0xff]  ;;  %v7345_v48 = vld [vmem:[#allocation2 + $0x1b8] sm:$0xff]   ;;  %v7346_v51 = vld [vmem:[#allocation2 + $0x170] sm:$0xff]  }
  0x34   :  { %6595 = vmatprep.subr.bf16.mxu1 %v7322_v13  ;;  %v1106_v39 = vcombine.high %v59_v38, %v59_v38  ;;  %v1113_v40 = vrot.slane %v59_v38, %v7971_v35  ;;  %v7347_v53 = vld [vmem:[#allocation2 + $0x1f0] sm:$0xff]   ;;  %v7350_v58 = vld [vmem:[#allocation2 + $0x168] sm:$0xff]   ;;  %v7354_v62 = vld [vmem:[#allocation2 + $0x160] sm:$0xff]  }
  0x35   :  { %v7348_v55 = vld [vmem:[#allocation2 + $0x130] sm:$0xff]   ;;  %v7351_v59 = vld [vmem:[#allocation2 + $0x1e8] sm:$0xff]   ;;  %v7355_v63 = vld [vmem:[#allocation2 + $0x1e0] sm:$0xff]  }
  0x36   :  { %6574 = vmatpush3.bf16.msra.mxu0 %v7323_v14  ;;  %v1121_v43 = vcombine.high %v1113_v40, %v1113_v40  ;;  %v1129_v44 = vrot.slane %v1113_v40, %v7971_v35  ;;  %v7979_v45 = vrot.slane %v1106_v39, %v7971_v35  ;;  %v7349_v56 = vld [vmem:[#allocation2 + $0x1b0] sm:$0xff]   ;;  %v7352_v60 = vld [vmem:[#allocation2 + $0x128] sm:$0xff]   ;;  %v7356_v0 = vld [vmem:[#allocation2 + $0x120] sm:$0xff]  }
  0x37   :  { %6596 = vmatpush3.bf16.msra.mxu1 %v7324_v15  ;;  %6575 = vmatprep.subr.bf16.mxu0 %v7325_v16  ;;  %v7353_v61 = vld [vmem:[#allocation2 + $0x1a8] sm:$0xff]   ;;  %v7357_v1 = vld [vmem:[#allocation2 + $0x1a0] sm:$0xff]   ;;  %v7358_v2 = vld [vmem:[#allocation2 + $0x158] sm:$0xff]  }
  0x38   :  { %6597 = vmatprep.subr.bf16.mxu1 %v7326_v17  ;;  %v1143_v47 = vrot.slane %v1121_v43, %v7971_v35  ;;  %v1122_v49 = vcombine.high %v7979_v45, %v7979_v45  ;;  %v1151_v50 = vcombine.high %v1129_v44, %v1129_v44  ;;  %v7359_v3 = vld [vmem:[#allocation2 + $0x1d8] sm:$0xff]   ;;  %v7362_v6 = vld [vmem:[#allocation2 + $0x150] sm:$0xff]   ;;  %v7366_v10 = vld [vmem:[#allocation2 + $0x148] sm:$0xff]  }
  0x39   :  { %v7360_v4 = vld [vmem:[#allocation2 + $0x118] sm:$0xff]   ;;  %v7363_v7 = vld [vmem:[#allocation2 + $0x1d0] sm:$0xff]   ;;  %v7367_v11 = vld [vmem:[#allocation2 + $0x1c8] sm:$0xff]  }
  0x3a   :  { %6576 = vmatpush3.bf16.msra.mxu0 %v7327_v18  ;;  %4666 = vmatprep.mubr.bf16.mxu0 %v1143_v47  ;;  %v1153_v52 = vcombine.high %v1143_v47, %v1143_v47  ;;  %v1150_v54 = vrot.slane %v1122_v49, %v7971_v35  ;;  %v7361_v5 = vld [vmem:[#allocation2 + $0x198] sm:$0xff]   ;;  %v7364_v8 = vld [vmem:[#allocation2 + $0x110] sm:$0xff]   ;;  %v7368_v12 = vld [vmem:[#allocation2 + $0x108] sm:$0xff]   ;;  %v1136_v18 = vrot.slane %v7979_v45, %v7971_v35 }
  0x3b   :  { %6598 = vmatpush3.bf16.msra.mxu1 %v7328_v19  ;;  %6577 = vmatprep.subr.bf16.mxu0 %v7329_v20  ;;  %v7365_v9 = vld [vmem:[#allocation2 + $0x190] sm:$0xff]   ;;  %v7369_v13 = vld [vmem:[#allocation2 + $0x188] sm:$0xff]   ;;  %v7370_v14 = vld [vmem:[#allocation2 + $0x140] sm:$0xff]  }
  0x3c   :  { %6599 = vmatprep.subr.bf16.mxu1 %v7330_v21  ;;  %4706 = vmatprep.mubr.bf16.mxu1 %v1153_v52  ;;  %v1154_v57 = vcombine.high %v1150_v54, %v1150_v54  ;;  %v7371_v15 = vld [vmem:[#allocation2 + $0x1c0] sm:$0xff]   ;;  %v7374_v19 = vld [vmem:[#allocation2 + $0x278] sm:$0xff]   ;;  %v1152_v23 = vcombine.high %v1136_v18, %v1136_v18  ;;  %v7378_v24 = vld [vmem:[#allocation2 + $0x270] sm:$0xff]  }
  0x3d   :  { %v7372_v16 = vld [vmem:[#allocation2 + $0x100] sm:$0xff]   ;;  %v7375_v20 = vld [vmem:[#allocation2 + $0x2f8] sm:$0xff]   ;;  %v7383_v29 = vld [vmem:[#allocation2 + $0x2e8] sm:$0xff]  }
  0x3e   :  { %6578 = vmatpush3.bf16.msra.mxu0 %v7331_v25  ;;  %v7373_v17 = vld [vmem:[#allocation2 + $0x180] sm:$0xff]   ;;  %v7376_v21 = vld [vmem:[#allocation2 + $0x238] sm:$0xff]   ;;  %v7379_v25 = vld [vmem:[#allocation2 + $0x2f0] sm:$0xff]  }
  0x3f   :  { %6600 = vmatpush3.bf16.msra.mxu1 %v7332_v26  ;;  %6579 = vmatprep.subr.bf16.mxu0 %v7333_v27  ;;  %v7377_v22 = vld [vmem:[#allocation2 + $0x2b8] sm:$0xff]   ;;  %v7380_v26 = vld [vmem:[#allocation2 + $0x230] sm:$0xff]   ;;  %v7384_v30 = vld [vmem:[#allocation2 + $0x228] sm:$0xff]  }
  0x40   :  { %6601 = vmatprep.subr.bf16.mxu1 %v7334_v28  ;;  %v7381_v27 = vld [vmem:[#allocation2 + $0x2b0] sm:$0xff]   ;;  %v7382_v28 = vld [vmem:[#allocation2 + $0x268] sm:$0xff]   ;;  %v7391_v38 = vld [vmem:[#allocation2 + $0x2d8] sm:$0xff]  }
  0x41   :  { %v7392_v39 = vld [vmem:[#allocation2 + $0x218] sm:$0xff]   ;;  %v7396_v43 = vld [vmem:[#allocation2 + $0x210] sm:$0xff]   ;;  %v7398_v45 = vld [vmem:[#allocation2 + $0x248] sm:$0xff]  }
  0x42   :  { %6580 = vmatpush3.bf16.msra.mxu0 %v7335_v31  ;;  %v7385_v31 = vld [vmem:[#allocation2 + $0x2a8] sm:$0xff]   ;;  %v7393_v40 = vld [vmem:[#allocation2 + $0x298] sm:$0xff]   ;;  %v7402_v49 = vld [vmem:[#allocation2 + $0x240] sm:$0xff]  }
  0x43   :  { %6602 = vmatpush3.bf16.msra.mxu1 %v7336_v32  ;;  %6581 = vmatprep.subr.bf16.mxu0 %v7337_v33  ;;  %v7386_v32 = vld [vmem:[#allocation2 + $0x260] sm:$0xff]   ;;  %v7400_v47 = vld [vmem:[#allocation2 + $0x208] sm:$0xff]  }
  0x44   :  { %6603 = vmatprep.subr.bf16.mxu1 %v7338_v34  ;;  %v7387_v33 = vld [vmem:[#allocation2 + $0x2e0] sm:$0xff]   ;;  %v60_v52 = vld [vmem:[%s8136_s0 + $0x8] sm:$0xff] }
  0x45   :  { %v7388_v34 = vld [vmem:[#allocation2 + $0x220] sm:$0xff]  }
  0x46   :  { %6582 = vmatpush3.bf16.msra.mxu0 %v7339_v36  ;;  %v7389_v36 = vld [vmem:[#allocation2 + $0x2a0] sm:$0xff]  }
  0x47   :  { %6604 = vmatpush3.bf16.msra.mxu1 %v7340_v37  ;;  %6611 = vmatprep.subr.bf16.mxu0 %v7342_v41  ;;  %v7390_v37 = vld [vmem:[#allocation2 + $0x258] sm:$0xff]   ;;  %v7394_v41 = vld [vmem:[#allocation2 + $0x250] sm:$0xff]  }
  0x48   :  { %6633 = vmatprep.subr.bf16.mxu1 %v7343_v42  ;;  %v7395_v42 = vld [vmem:[#allocation2 + $0x2d0] sm:$0xff]  }
  0x49   :  { %4667 = vmatmul.mubr.bf16.vlgmr.msra.gmra.mxu0 %v1129_v44  ;;  %v7397_v44 = vld [vmem:[#allocation2 + $0x290] sm:$0xff]  }
  0x4a   :  { %6612 = vmatpush3.bf16.msra.mxu0 %v7344_v46  ;;  %4707 = vmatmul.mubr.bf16.vlgmr.msra.gmra.mxu1 %v1151_v50  ;;  %v7399_v46 = vld [vmem:[#allocation2 + $0x2c8] sm:$0xff]   ;;  %v7403_v50 = vld [vmem:[#allocation2 + $0x2c0] sm:$0xff]  }
  0x4b   :  { %6613 = vmatprep.subr.bf16.mxu0 %v7346_v51  ;;  %6634 = vmatpush3.bf16.msra.mxu1 %v7345_v48  ;;  %v7401_v48 = vld [vmem:[#allocation2 + $0x288] sm:$0xff]   ;;  %v7404_v51 = vld [vmem:[#allocation2 + $0x200] sm:$0xff]  }
  0x4c   :  { %4746 = vmatprep.mubr.bf16.mxu0 %v1150_v54  ;;  %6635 = vmatprep.subr.bf16.mxu1 %v7347_v53  ;;  %v7405_v53 = vld [vmem:[#allocation2 + $0x280] sm:$0xff]   ;;  %v1162_v54 = vrot.slane %v60_v52, %v7971_v35 }
  0x4d   :  { %4786 = vmatprep.mubr.bf16.mxu1 %v1154_v57 }
  0x4e   :  { %6614 = vmatpush3.bf16.msra.mxu0 %v7348_v55  ;;  %v1155_v55 = vcombine.high %v60_v52, %v60_v52  ;;  %v1170_v57 = vcombine.high %v1162_v54, %v1162_v54  ;;  %v7455_v52 = vld [vmem:[#allocation2 + $0x458] sm:$0xff]  }
  0x4f   :  { %6615 = vmatprep.subr.bf16.mxu0 %v7350_v58  ;;  %6636 = vmatpush3.bf16.msra.mxu1 %v7349_v56  ;;  %v7406_v56 = vld [vmem:[#allocation2 + $0x378] sm:$0xff]   ;;  %v1178_v58 = vrot.slane %v1162_v54, %v7971_v35 }
  0x50   :  { %6637 = vmatprep.subr.bf16.mxu1 %v7351_v59  ;;  %v7407_v59 = vld [vmem:[#allocation2 + $0x3f8] sm:$0xff]  }
  0x51   :  { %v7457_v54 = vld [vmem:[#allocation2 + $0x418] sm:$0xff]  }
  0x52   :  { %6616 = vmatpush3.bf16.msra.mxu0 %v7352_v60  ;;  %v7993_v60 = vrot.slane %v1155_v55, %v7971_v35  ;;  %v7458_v55 = vld [vmem:[#allocation2 + $0x498] sm:$0xff]  }
  0x53   :  { %6617 = vmatprep.subr.bf16.mxu0 %v7354_v62  ;;  %6638 = vmatpush3.bf16.msra.mxu1 %v7353_v61  ;;  %v7408_v61 = vld [vmem:[#allocation2 + $0x338] sm:$0xff]   ;;  %v1192_v62 = vrot.slane %v1170_v57, %v7971_v35  ;;  %v7460_v57 = vld [vmem:[#allocation2 + $0x4d0] sm:$0xff]  }
  0x54   :  { %6639 = vmatprep.subr.bf16.mxu1 %v7355_v63  ;;  %v7409_v63 = vld [vmem:[#allocation2 + $0x3b8] sm:$0xff]  }
  0x56   :  { %6618 = vmatpush3.bf16.msra.mxu0 %v7356_v0  ;;  %v1171_v0 = vcombine.high %v7993_v60, %v7993_v60 }
  0x57   :  { %6619 = vmatprep.subr.bf16.mxu0 %v7358_v2  ;;  %6640 = vmatpush3.bf16.msra.mxu1 %v7357_v1  ;;  %v1200_v1 = vcombine.high %v1178_v58, %v1178_v58  ;;  %v7410_v2 = vld [vmem:[#allocation2 + $0x370] sm:$0xff]  }
  0x58   :  { %6641 = vmatprep.subr.bf16.mxu1 %v7359_v3  ;;  %v1202_v3 = vcombine.high %v1192_v62, %v1192_v62 }
  0x5a   :  { %6620 = vmatpush3.bf16.msra.mxu0 %v7360_v4  ;;  %v7411_v4 = vld [vmem:[#allocation2 + $0x3f0] sm:$0xff]  }
  0x5b   :  { %6621 = vmatprep.subr.bf16.mxu0 %v7362_v6  ;;  %6642 = vmatpush3.bf16.msra.mxu1 %v7361_v5  ;;  %v1199_v5 = vrot.slane %v1171_v0, %v7971_v35  ;;  %v7412_v6 = vld [vmem:[#allocation2 + $0x330] sm:$0xff]   ;;  %v7467_v0 = vld [vmem:[#allocation2 + $0x440] sm:$0xff]  }
  0x5c   :  { %6643 = vmatprep.subr.bf16.mxu1 %v7363_v7  ;;  %v7413_v7 = vld [vmem:[#allocation2 + $0x3b0] sm:$0xff]  }
  0x5e   :  { %6622 = vmatpush3.bf16.msra.mxu0 %v7364_v8  ;;  %v1203_v8 = vcombine.high %v1199_v5, %v1199_v5 }
  0x5f   :  { %6623 = vmatprep.subr.bf16.mxu0 %v7366_v10  ;;  %6644 = vmatpush3.bf16.msra.mxu1 %v7365_v9  ;;  %v7414_v9 = vld [vmem:[#allocation2 + $0x368] sm:$0xff]  }
  0x60   :  { %6645 = vmatprep.subr.bf16.mxu1 %v7367_v11  ;;  %v7415_v10 = vld [vmem:[#allocation2 + $0x3e8] sm:$0xff]  }
  0x61   :  { %v7416_v11 = vld [vmem:[#allocation2 + $0x328] sm:$0xff]  }
  0x62   :  { %6624 = vmatpush3.bf16.msra.mxu0 %v7368_v12  ;;  %v7417_v12 = vld [vmem:[#allocation2 + $0x3a8] sm:$0xff]  }
  0x63   :  { %6625 = vmatprep.subr.bf16.mxu0 %v7370_v14  ;;  %6646 = vmatpush3.bf16.msra.mxu1 %v7369_v13  ;;  %v7418_v13 = vld [vmem:[#allocation2 + $0x360] sm:$0xff]  }
  0x64   :  { %6647 = vmatprep.subr.bf16.mxu1 %v7371_v15  ;;  %v7419_v14 = vld [vmem:[#allocation2 + $0x3e0] sm:$0xff]  }
  0x65   :  { %v7420_v15 = vld [vmem:[#allocation2 + $0x320] sm:$0xff]  }
  0x66   :  { %6626 = vmatpush3.bf16.msra.mxu0 %v7372_v16  ;;  %v7421_v16 = vld [vmem:[#allocation2 + $0x3a0] sm:$0xff]  }
  0x67   :  { %6655 = vmatprep.subr.bf16.mxu0 %v7374_v19  ;;  %6648 = vmatpush3.bf16.msra.mxu1 %v7373_v17  ;;  %v7422_v17 = vld [vmem:[#allocation2 + $0x358] sm:$0xff]  }
  0x68   :  { %6677 = vmatprep.subr.bf16.mxu1 %v7375_v20  ;;  %v7424_v19 = vld [vmem:[#allocation2 + $0x318] sm:$0xff]  }
  0x69   :  { %4747 = vmatmul.mubr.bf16.vlgmr.msra.gmra.mxu0 %v1136_v18  ;;  %v7423_v18 = vld [vmem:[#allocation2 + $0x3d8] sm:$0xff]  }
  0x6a   :  { %6656 = vmatpush3.bf16.msra.mxu0 %v7376_v21  ;;  %4787 = vmatmul.mubr.bf16.vlgmr.msra.gmra.mxu1 %v1152_v23  ;;  %v7425_v20 = vld [vmem:[#allocation2 + $0x398] sm:$0xff]   ;;  %v7426_v21 = vld [vmem:[#allocation2 + $0x350] sm:$0xff]  }
  0x6b   :  { %6657 = vmatprep.subr.bf16.mxu0 %v7378_v24  ;;  %6678 = vmatpush3.bf16.msra.mxu1 %v7377_v22  ;;  %v7427_v22 = vld [vmem:[#allocation2 + $0x3d0] sm:$0xff]  }
  0x6c   :  { %6679 = vmatprep.subr.bf16.mxu1 %v7379_v25  ;;  %4826 = vmatprep.mubr.bf16.mxu0 %v1192_v62  ;;  %v7428_v23 = vld [vmem:[#allocation2 + $0x310] sm:$0xff]   ;;  %v7430_v25 = vld [vmem:[#allocation2 + $0x348] sm:$0xff]  }
  0x6d   :  { %4866 = vmatprep.mubr.bf16.mxu1 %v1202_v3  ;;  %v7429_v24 = vld [vmem:[#allocation2 + $0x390] sm:$0xff]   ;;  %v7465_v62 = vld [vmem:[#allocation2 + $0x408] sm:$0xff]  }
  0x6e   :  { %6658 = vmatpush3.bf16.msra.mxu0 %v7380_v26  ;;  %v7431_v26 = vld [vmem:[#allocation2 + $0x3c8] sm:$0xff]   ;;  %v61_v3 = vld [vmem:[%s8136_s0 + $0x10] sm:$0xff] }
  0x6f   :  { %6659 = vmatprep.subr.bf16.mxu0 %v7382_v28  ;;  %6680 = vmatpush3.bf16.msra.mxu1 %v7381_v27  ;;  %v7432_v27 = vld [vmem:[#allocation2 + $0x308] sm:$0xff]  }
  0x70   :  { %6681 = vmatprep.subr.bf16.mxu1 %v7383_v29  ;;  %v7433_v28 = vld [vmem:[#allocation2 + $0x388] sm:$0xff]   ;;  %v7434_v29 = vld [vmem:[#allocation2 + $0x340] sm:$0xff]  }
  0x72   :  { %6660 = vmatpush3.bf16.msra.mxu0 %v7384_v30  ;;  %v7435_v30 = vld [vmem:[#allocation2 + $0x3c0] sm:$0xff]  }
  0x73   :  { %6661 = vmatprep.subr.bf16.mxu0 %v7386_v32  ;;  %6682 = vmatpush3.bf16.msra.mxu1 %v7385_v31  ;;  %v7436_v31 = vld [vmem:[#allocation2 + $0x300] sm:$0xff]  }
  0x74   :  { %6683 = vmatprep.subr.bf16.mxu1 %v7387_v33  ;;  %v7437_v32 = vld [vmem:[#allocation2 + $0x380] sm:$0xff]   ;;  %v1185_v33 = vrot.slane %v7993_v60, %v7971_v35  ;;  %v7463_v60 = vld [vmem:[#allocation2 + $0x448] sm:$0xff]  }
  0x76   :  { %6662 = vmatpush3.bf16.msra.mxu0 %v7388_v34  ;;  %v7439_v34 = vld [vmem:[#allocation2 + $0x478] sm:$0xff]  }
  0x77   :  { %6663 = vmatprep.subr.bf16.mxu0 %v7390_v37  ;;  %6684 = vmatpush3.bf16.msra.mxu1 %v7389_v36  ;;  %v7440_v36 = vld [vmem:[#allocation2 + $0x4f8] sm:$0xff]  }
  0x78   :  { %6685 = vmatprep.subr.bf16.mxu1 %v7391_v38  ;;  %v7441_v37 = vld [vmem:[#allocation2 + $0x438] sm:$0xff]  }
  0x79   :  { %v7442_v38 = vld [vmem:[#allocation2 + $0x4b8] sm:$0xff]  }
  0x7a   :  { %6664 = vmatpush3.bf16.msra.mxu0 %v7392_v39  ;;  %v1201_v39 = vcombine.high %v1185_v33, %v1185_v33 }
  0x7b   :  { %6665 = vmatprep.subr.bf16.mxu0 %v7394_v41  ;;  %6686 = vmatpush3.bf16.msra.mxu1 %v7393_v40  ;;  %v7443_v40 = vld [vmem:[#allocation2 + $0x470] sm:$0xff]  }
  0x7c   :  { %6687 = vmatprep.subr.bf16.mxu1 %v7395_v42  ;;  %v7444_v41 = vld [vmem:[#allocation2 + $0x4f0] sm:$0xff]  }
  0x7d   :  { %v7445_v42 = vld [vmem:[#allocation2 + $0x430] sm:$0xff]  }
  0x7e   :  { %6666 = vmatpush3.bf16.msra.mxu0 %v7396_v43  ;;  %v7446_v43 = vld [vmem:[#allocation2 + $0x4b0] sm:$0xff]  }
  0x7f   :  { %6667 = vmatprep.subr.bf16.mxu0 %v7398_v45  ;;  %6688 = vmatpush3.bf16.msra.mxu1 %v7397_v44  ;;  %v7447_v44 = vld [vmem:[#allocation2 + $0x468] sm:$0xff]  }
  0x80   :  { %6689 = vmatprep.subr.bf16.mxu1 %v7399_v46  ;;  %v7448_v45 = vld [vmem:[#allocation2 + $0x4e8] sm:$0xff]  }
  0x81   :  { %v7449_v46 = vld [vmem:[#allocation2 + $0x428] sm:$0xff]  }
  0x82   :  { %6668 = vmatpush3.bf16.msra.mxu0 %v7400_v47  ;;  %v7450_v47 = vld [vmem:[#allocation2 + $0x4a8] sm:$0xff]  }
  0x83   :  { %6669 = vmatprep.subr.bf16.mxu0 %v7402_v49  ;;  %6690 = vmatpush3.bf16.msra.mxu1 %v7401_v48  ;;  %v7451_v48 = vld [vmem:[#allocation2 + $0x460] sm:$0xff]  }
  0x84   :  { %6691 = vmatprep.subr.bf16.mxu1 %v7403_v50  ;;  %v7452_v49 = vld [vmem:[#allocation2 + $0x4e0] sm:$0xff]  }
  0x85   :  { %v7453_v50 = vld [vmem:[#allocation2 + $0x420] sm:$0xff]  }
  0x86   :  { %6670 = vmatpush3.bf16.msra.mxu0 %v7404_v51  ;;  %v7454_v51 = vld [vmem:[#allocation2 + $0x4a0] sm:$0xff]  }
  0x87   :  { %6699 = vmatprep.subr.bf16.mxu0 %v7406_v56  ;;  %6692 = vmatpush3.bf16.msra.mxu1 %v7405_v53  ;;  %v7456_v53 = vld [vmem:[#allocation2 + $0x4d8] sm:$0xff]   ;;  %v7459_v56 = vld [vmem:[#allocation2 + $0x450] sm:$0xff]  }
  0x88   :  { %6721 = vmatprep.subr.bf16.mxu1 %v7407_v59  ;;  %v7462_v59 = vld [vmem:[#allocation2 + $0x490] sm:$0xff]  }
  0x89   :  { %4827 = vmatmul.mubr.bf16.vlgmr.msra.gmra.mxu0 %v1178_v58  ;;  %v7461_v58 = vld [vmem:[#allocation2 + $0x410] sm:$0xff]  }
  0x8a   :  { %6700 = vmatpush3.bf16.msra.mxu0 %v7408_v61  ;;  %4867 = vmatmul.mubr.bf16.vlgmr.msra.gmra.mxu1 %v1200_v1  ;;  %v7464_v61 = vld [vmem:[#allocation2 + $0x4c8] sm:$0xff]   ;;  %v7468_v1 = vld [vmem:[#allocation2 + $0x4c0] sm:$0xff]  }
  0x8b   :  { %6701 = vmatprep.subr.bf16.mxu0 %v7410_v2  ;;  %6722 = vmatpush3.bf16.msra.mxu1 %v7409_v63  ;;  %v7466_v63 = vld [vmem:[#allocation2 + $0x488] sm:$0xff]   ;;  %v7469_v2 = vld [vmem:[#allocation2 + $0x400] sm:$0xff]  }
  0x8c   :  { %4906 = vmatprep.mubr.bf16.mxu0 %v1199_v5  ;;  %6723 = vmatprep.subr.bf16.mxu1 %v7411_v4  ;;  %v7470_v4 = vld [vmem:[#allocation2 + $0x480] sm:$0xff]   ;;  %v1211_v5 = vrot.slane %v61_v3, %v7971_v35 }
  0x8d   :  { %4946 = vmatprep.mubr.bf16.mxu1 %v1203_v8 }
  0x8e   :  { %6702 = vmatpush3.bf16.msra.mxu0 %v7412_v6  ;;  %v1204_v6 = vcombine.high %v61_v3, %v61_v3  ;;  %v1219_v8 = vcombine.high %v1211_v5, %v1211_v5  ;;  %v7520_v3 = vld [vmem:[#allocation2 + $0x658] sm:$0xff]  }
  0x8f   :  { %6703 = vmatprep.subr.bf16.mxu0 %v7414_v9  ;;  %6724 = vmatpush3.bf16.msra.mxu1 %v7413_v7  ;;  %v7471_v7 = vld [vmem:[#allocation2 + $0x578] sm:$0xff]   ;;  %v1227_v9 = vrot.slane %v1211_v5, %v7971_v35 }
  0x90   :  { %6725 = vmatprep.subr.bf16.mxu1 %v7415_v10  ;;  %v7472_v10 = vld [vmem:[#allocation2 + $0x5f8] sm:$0xff]  }
  0x91   :  { %v7522_v5 = vld [vmem:[#allocation2 + $0x618] sm:$0xff]  }
  0x92   :  { %6704 = vmatpush3.bf16.msra.mxu0 %v7416_v11  ;;  %v8007_v11 = vrot.slane %v1204_v6, %v7971_v35  ;;  %v7523_v6 = vld [vmem:[#allocation2 + $0x698] sm:$0xff]  }
  0x93   :  { %6705 = vmatprep.subr.bf16.mxu0 %v7418_v13  ;;  %6726 = vmatpush3.bf16.msra.mxu1 %v7417_v12  ;;  %v7473_v12 = vld [vmem:[#allocation2 + $0x538] sm:$0xff]   ;;  %v1241_v13 = vrot.slane %v1219_v8, %v7971_v35  ;;  %v7525_v8 = vld [vmem:[#allocation2 + $0x6d0] sm:$0xff]  }
  0x94   :  { %6727 = vmatprep.subr.bf16.mxu1 %v7419_v14  ;;  %v7474_v14 = vld [vmem:[#allocation2 + $0x5b8] sm:$0xff]  }
  0x96   :  { %6706 = vmatpush3.bf16.msra.mxu0 %v7420_v15  ;;  %v1220_v15 = vcombine.high %v8007_v11, %v8007_v11 }
  0x97   :  { %6707 = vmatprep.subr.bf16.mxu0 %v7422_v17  ;;  %6728 = vmatpush3.bf16.msra.mxu1 %v7421_v16  ;;  %v1249_v16 = vcombine.high %v1227_v9, %v1227_v9  ;;  %v7475_v17 = vld [vmem:[#allocation2 + $0x570] sm:$0xff]  }
  0x98   :  { %6729 = vmatprep.subr.bf16.mxu1 %v7423_v18  ;;  %v1251_v18 = vcombine.high %v1241_v13, %v1241_v13 }
  0x9a   :  { %6708 = vmatpush3.bf16.msra.mxu0 %v7424_v19  ;;  %v7476_v19 = vld [vmem:[#allocation2 + $0x5f0] sm:$0xff]  }
  0x9b   :  { %6709 = vmatprep.subr.bf16.mxu0 %v7426_v21  ;;  %6730 = vmatpush3.bf16.msra.mxu1 %v7425_v20  ;;  %v1248_v20 = vrot.slane %v1220_v15, %v7971_v35  ;;  %v7477_v21 = vld [vmem:[#allocation2 + $0x530] sm:$0xff]   ;;  %v7532_v15 = vld [vmem:[#allocation2 + $0x640] sm:$0xff]  }
  0x9c   :  { %6731 = vmatprep.subr.bf16.mxu1 %v7427_v22  ;;  %v7478_v22 = vld [vmem:[#allocation2 + $0x5b0] sm:$0xff]  }
  0x9e   :  { %6710 = vmatpush3.bf16.msra.mxu0 %v7428_v23  ;;  %v1252_v23 = vcombine.high %v1248_v20, %v1248_v20 }
  0x9f   :  { %6711 = vmatprep.subr.bf16.mxu0 %v7430_v25  ;;  %6732 = vmatpush3.bf16.msra.mxu1 %v7429_v24  ;;  %v7479_v24 = vld [vmem:[#allocation2 + $0x568] sm:$0xff]  }
  0xa0   :  { %6733 = vmatprep.subr.bf16.mxu1 %v7431_v26  ;;  %v7480_v25 = vld [vmem:[#allocation2 + $0x5e8] sm:$0xff]  }
  0xa1   :  { %v7481_v26 = vld [vmem:[#allocation2 + $0x528] sm:$0xff]  }
  0xa2   :  { %6712 = vmatpush3.bf16.msra.mxu0 %v7432_v27  ;;  %v7482_v27 = vld [vmem:[#allocation2 + $0x5a8] sm:$0xff]  }
  0xa3   :  { %6713 = vmatprep.subr.bf16.mxu0 %v7434_v29  ;;  %6734 = vmatpush3.bf16.msra.mxu1 %v7433_v28  ;;  %v7483_v28 = vld [vmem:[#allocation2 + $0x560] sm:$0xff]  }
  0xa4   :  { %6735 = vmatprep.subr.bf16.mxu1 %v7435_v30  ;;  %v7484_v29 = vld [vmem:[#allocation2 + $0x5e0] sm:$0xff]  }
  0xa5   :  { %v7485_v30 = vld [vmem:[#allocation2 + $0x520] sm:$0xff]  }
  0xa6   :  { %6714 = vmatpush3.bf16.msra.mxu0 %v7436_v31  ;;  %v7486_v31 = vld [vmem:[#allocation2 + $0x5a0] sm:$0xff]  }
  0xa7   :  { %6743 = vmatprep.subr.bf16.mxu0 %v7439_v34  ;;  %6736 = vmatpush3.bf16.msra.mxu1 %v7437_v32  ;;  %v7487_v32 = vld [vmem:[#allocation2 + $0x558] sm:$0xff]  }
  0xa8   :  { %6765 = vmatprep.subr.bf16.mxu1 %v7440_v36  ;;  %v7489_v34 = vld [vmem:[#allocation2 + $0x518] sm:$0xff]  }
  0xa9   :  { %4907 = vmatmul.mubr.bf16.vlgmr.msra.gmra.mxu0 %v1185_v33  ;;  %v7488_v33 = vld [vmem:[#allocation2 + $0x5d8] sm:$0xff]  }
  0xaa   :  { %6744 = vmatpush3.bf16.msra.mxu0 %v7441_v37  ;;  %4947 = vmatmul.mubr.bf16.vlgmr.msra.gmra.mxu1 %v1201_v39  ;;  %v7490_v36 = vld [vmem:[#allocation2 + $0x598] sm:$0xff]   ;;  %v7491_v37 = vld [vmem:[#allocation2 + $0x550] sm:$0xff]  }
  0xab   :  { %6745 = vmatprep.subr.bf16.mxu0 %v7443_v40  ;;  %6766 = vmatpush3.bf16.msra.mxu1 %v7442_v38  ;;  %v7492_v38 = vld [vmem:[#allocation2 + $0x5d0] sm:$0xff]  }
  0xac   :  { %6767 = vmatprep.subr.bf16.mxu1 %v7444_v41  ;;  %4986 = vmatprep.mubr.bf16.mxu0 %v1241_v13  ;;  %v7493_v39 = vld [vmem:[#allocation2 + $0x510] sm:$0xff]   ;;  %v7495_v41 = vld [vmem:[#allocation2 + $0x548] sm:$0xff]  }
  0xad   :  { %5026 = vmatprep.mubr.bf16.mxu1 %v1251_v18  ;;  %v7494_v40 = vld [vmem:[#allocation2 + $0x590] sm:$0xff]   ;;  %v7530_v13 = vld [vmem:[#allocation2 + $0x608] sm:$0xff]   ;;  %v62_v18 = vld [vmem:[%s8136_s0 + $0x18] sm:$0xff] }
  0xae   :  { %6746 = vmatpush3.bf16.msra.mxu0 %v7445_v42  ;;  %v7496_v42 = vld [vmem:[#allocation2 + $0x5c8] sm:$0xff]  }
  0xaf   :  { %6747 = vmatprep.subr.bf16.mxu0 %v7447_v44  ;;  %6768 = vmatpush3.bf16.msra.mxu1 %v7446_v43  ;;  %v7497_v43 = vld [vmem:[#allocation2 + $0x508] sm:$0xff]  }
  0xb0   :  { %6769 = vmatprep.subr.bf16.mxu1 %v7448_v45  ;;  %v7498_v44 = vld [vmem:[#allocation2 + $0x588] sm:$0xff]   ;;  %v7499_v45 = vld [vmem:[#allocation2 + $0x540] sm:$0xff]  }
  0xb2   :  { %6748 = vmatpush3.bf16.msra.mxu0 %v7449_v46  ;;  %v7500_v46 = vld [vmem:[#allocation2 + $0x5c0] sm:$0xff]  }
  0xb3   :  { %6749 = vmatprep.subr.bf16.mxu0 %v7451_v48  ;;  %6770 = vmatpush3.bf16.msra.mxu1 %v7450_v47  ;;  %v7501_v47 = vld [vmem:[#allocation2 + $0x500] sm:$0xff]  }
  0xb4   :  { %6771 = vmatprep.subr.bf16.mxu1 %v7452_v49  ;;  %v7502_v48 = vld [vmem:[#allocation2 + $0x580] sm:$0xff]   ;;  %v1234_v49 = vrot.slane %v8007_v11, %v7971_v35  ;;  %v7528_v11 = vld [vmem:[#allocation2 + $0x648] sm:$0xff]  }
  0xb6   :  { %6750 = vmatpush3.bf16.msra.mxu0 %v7453_v50  ;;  %v7504_v50 = vld [vmem:[#allocation2 + $0x678] sm:$0xff]  }
  0xb7   :  { %6751 = vmatprep.subr.bf16.mxu0 %v7455_v52  ;;  %6772 = vmatpush3.bf16.msra.mxu1 %v7454_v51  ;;  %v7505_v51 = vld [vmem:[#allocation2 + $0x6f8] sm:$0xff]  }
  0xb8   :  { %6773 = vmatprep.subr.bf16.mxu1 %v7456_v53  ;;  %v7506_v52 = vld [vmem:[#allocation2 + $0x638] sm:$0xff]  }
  0xb9   :  { %v7507_v53 = vld [vmem:[#allocation2 + $0x6b8] sm:$0xff]  }
  0xba   :  { %6752 = vmatpush3.bf16.msra.mxu0 %v7457_v54  ;;  %v1250_v54 = vcombine.high %v1234_v49, %v1234_v49 }
  0xbb   :  { %6753 = vmatprep.subr.bf16.mxu0 %v7459_v56  ;;  %6774 = vmatpush3.bf16.msra.mxu1 %v7458_v55  ;;  %v7508_v55 = vld [vmem:[#allocation2 + $0x670] sm:$0xff]  }
  0xbc   :  { %6775 = vmatprep.subr.bf16.mxu1 %v7460_v57  ;;  %v7509_v56 = vld [vmem:[#allocation2 + $0x6f0] sm:$0xff]  }
  0xbd   :  { %v7510_v57 = vld [vmem:[#allocation2 + $0x630] sm:$0xff]  }
  0xbe   :  { %6754 = vmatpush3.bf16.msra.mxu0 %v7461_v58  ;;  %v7511_v58 = vld [vmem:[#allocation2 + $0x6b0] sm:$0xff]  }
  0xbf   :  { %6755 = vmatprep.subr.bf16.mxu0 %v7463_v60  ;;  %6776 = vmatpush3.bf16.msra.mxu1 %v7462_v59  ;;  %v7512_v59 = vld [vmem:[#allocation2 + $0x668] sm:$0xff]  }
  0xc0   :  { %6777 = vmatprep.subr.bf16.mxu1 %v7464_v61  ;;  %v7513_v60 = vld [vmem:[#allocation2 + $0x6e8] sm:$0xff]  }
  0xc1   :  { %v7514_v61 = vld [vmem:[#allocation2 + $0x628] sm:$0xff]  }
  0xc2   :  { %6756 = vmatpush3.bf16.msra.mxu0 %v7465_v62  ;;  %v7515_v62 = vld [vmem:[#allocation2 + $0x6a8] sm:$0xff]  }
  0xc3   :  { %6757 = vmatprep.subr.bf16.mxu0 %v7467_v0  ;;  %6778 = vmatpush3.bf16.msra.mxu1 %v7466_v63  ;;  %v7516_v63 = vld [vmem:[#allocation2 + $0x660] sm:$0xff]  }
  0xc4   :  { %6779 = vmatprep.subr.bf16.mxu1 %v7468_v1  ;;  %v7517_v0 = vld [vmem:[#allocation2 + $0x6e0] sm:$0xff]  }
  0xc5   :  { %v7518_v1 = vld [vmem:[#allocation2 + $0x620] sm:$0xff]  }
  0xc6   :  { %6758 = vmatpush3.bf16.msra.mxu0 %v7469_v2  ;;  %v7519_v2 = vld [vmem:[#allocation2 + $0x6a0] sm:$0xff]  }
  0xc7   :  { %6787 = vmatprep.subr.bf16.mxu0 %v7471_v7  ;;  %6780 = vmatpush3.bf16.msra.mxu1 %v7470_v4  ;;  %v7521_v4 = vld [vmem:[#allocation2 + $0x6d8] sm:$0xff]   ;;  %v7524_v7 = vld [vmem:[#allocation2 + $0x650] sm:$0xff]  }
  0xc8   :  { %6809 = vmatprep.subr.bf16.mxu1 %v7472_v10  ;;  %v7527_v10 = vld [vmem:[#allocation2 + $0x690] sm:$0xff]  }
  0xc9   :  { %4987 = vmatmul.mubr.bf16.vlgmr.msra.gmra.mxu0 %v1227_v9  ;;  %v7526_v9 = vld [vmem:[#allocation2 + $0x610] sm:$0xff]  }
  0xca   :  { %6788 = vmatpush3.bf16.msra.mxu0 %v7473_v12  ;;  %5027 = vmatmul.mubr.bf16.vlgmr.msra.gmra.mxu1 %v1249_v16  ;;  %v7529_v12 = vld [vmem:[#allocation2 + $0x6c8] sm:$0xff]   ;;  %v7533_v16 = vld [vmem:[#allocation2 + $0x6c0] sm:$0xff]  }
  0xcb   :  { %6789 = vmatprep.subr.bf16.mxu0 %v7475_v17  ;;  %6810 = vmatpush3.bf16.msra.mxu1 %v7474_v14  ;;  %v7531_v14 = vld [vmem:[#allocation2 + $0x688] sm:$0xff]   ;;  %v7534_v17 = vld [vmem:[#allocation2 + $0x600] sm:$0xff]  }
  0xcc   :  { %5066 = vmatprep.mubr.bf16.mxu0 %v1248_v20  ;;  %6811 = vmatprep.subr.bf16.mxu1 %v7476_v19  ;;  %v1260_v19 = vrot.slane %v62_v18, %v7971_v35  ;;  %v7536_v20 = vld [vmem:[#allocation2 + $0x778] sm:$0xff]  }
  0xcd   :  { %5106 = vmatprep.mubr.bf16.mxu1 %v1252_v23 }
  0xce   :  { %6790 = vmatpush3.bf16.msra.mxu0 %v7477_v21  ;;  %v1253_v21 = vcombine.high %v62_v18, %v62_v18  ;;  %v1268_v23 = vcombine.high %v1260_v19, %v1260_v19 }
  0xcf   :  { %6791 = vmatprep.subr.bf16.mxu0 %v7479_v24  ;;  %6812 = vmatpush3.bf16.msra.mxu1 %v7478_v22  ;;  %v7535_v22 = vld [vmem:[#allocation2 + $0x680] sm:$0xff]   ;;  %v1276_v24 = vrot.slane %v1260_v19, %v7971_v35  ;;  %v7573_v19 = vld [vmem:[#allocation2 + $0x870] sm:$0xff]  }
  0xd0   :  { %6813 = vmatprep.subr.bf16.mxu1 %v7480_v25  ;;  %v7537_v25 = vld [vmem:[#allocation2 + $0x7f8] sm:$0xff]  }
  0xd2   :  { %6792 = vmatpush3.bf16.msra.mxu0 %v7481_v26  ;;  %v8021_v26 = vrot.slane %v1253_v21, %v7971_v35  ;;  %v7574_v21 = vld [vmem:[#allocation2 + $0x8f0] sm:$0xff]  }
  0xd3   :  { %6793 = vmatprep.subr.bf16.mxu0 %v7483_v28  ;;  %6814 = vmatpush3.bf16.msra.mxu1 %v7482_v27  ;;  %v7538_v27 = vld [vmem:[#allocation2 + $0x738] sm:$0xff]   ;;  %v1290_v28 = vrot.slane %v1268_v23, %v7971_v35 }
  0xd4   :  { %6815 = vmatprep.subr.bf16.mxu1 %v7484_v29  ;;  %v7539_v29 = vld [vmem:[#allocation2 + $0x7b8] sm:$0xff]  }
  0xd6   :  { %6794 = vmatpush3.bf16.msra.mxu0 %v7485_v30  ;;  %v1269_v30 = vcombine.high %v8021_v26, %v8021_v26 }
  0xd7   :  { %6795 = vmatprep.subr.bf16.mxu0 %v7487_v32  ;;  %6816 = vmatpush3.bf16.msra.mxu1 %v7486_v31  ;;  %v1298_v31 = vcombine.high %v1276_v24, %v1276_v24  ;;  %v7540_v32 = vld [vmem:[#allocation2 + $0x770] sm:$0xff]  }
  0xd8   :  { %6817 = vmatprep.subr.bf16.mxu1 %v7488_v33  ;;  %v1300_v33 = vcombine.high %v1290_v28, %v1290_v28 }
  0xda   :  { %6796 = vmatpush3.bf16.msra.mxu0 %v7489_v34 }
  0xdb   :  { %6797 = vmatprep.subr.bf16.mxu0 %v7491_v37  ;;  %6818 = vmatpush3.bf16.msra.mxu1 %v7490_v36  ;;  %v6045_v36 = vld [vmem:[#allocation5] ss:$0 sm:$0xff]  ;;  %v7541_v37 = vld [vmem:[#allocation2 + $0x7f0] sm:$0xff]  }
  0xdc   :  { %6819 = vmatprep.subr.bf16.mxu1 %v7492_v38  ;;  %v1297_v38 = vrot.slane %v1269_v30, %v7971_v35  ;;  %v7578_v30 = vld [vmem:[#allocation2 + $0x8e8] sm:$0xff]  }
  0xde   :  { %6798 = vmatpush3.bf16.msra.mxu0 %v7493_v39  ;;  %v7542_v39 = vld [vmem:[#allocation2 + $0x730] sm:$0xff]  }
  0xdf   :  { %6799 = vmatprep.subr.bf16.mxu0 %v7495_v41  ;;  %6820 = vmatpush3.bf16.msra.mxu1 %v7494_v40 }
  0xe0   :  { %6821 = vmatprep.subr.bf16.mxu1 %v7496_v42  ;;  %v7543_v42 = vld [vmem:[#allocation2 + $0x7b0] sm:$0xff]  }
  0xe2   :  { %6800 = vmatpush3.bf16.msra.mxu0 %v7497_v43  ;;  %v1301_v43 = vcombine.high %v1297_v38, %v1297_v38 }
  0xe3   :  { %6801 = vmatprep.subr.bf16.mxu0 %v7499_v45  ;;  %6822 = vmatpush3.bf16.msra.mxu1 %v7498_v44  ;;  %v7544_v45 = vld [vmem:[#allocation2 + $0x768] sm:$0xff]  }
  0xe4   :  { %6823 = vmatprep.subr.bf16.mxu1 %v7500_v46 }
  0xe6   :  { %6802 = vmatpush3.bf16.msra.mxu0 %v7501_v47 }
  0xe7   :  { %6831 = vmatprep.subr.bf16.mxu0 %v7504_v50  ;;  %6824 = vmatpush3.bf16.msra.mxu1 %v7502_v48  ;;  %v7545_v48 = vld [vmem:[#allocation2 + $0x7e8] sm:$0xff]  }
  0xe8   :  { %6853 = vmatprep.subr.bf16.mxu1 %v7505_v51  ;;  %v7546_v51 = vld [vmem:[#allocation2 + $0x728] sm:$0xff]  }
  0xe9   :  { %5067 = vmatmul.mubr.bf16.vlgmr.msra.gmra.mxu0 %v1234_v49 }
  0xea   :  { %6832 = vmatpush3.bf16.msra.mxu0 %v7506_v52  ;;  %5107 = vmatmul.mubr.bf16.vlgmr.msra.gmra.mxu1 %v1250_v54  ;;  %v7547_v54 = vld [vmem:[#allocation2 + $0x7a8] sm:$0xff]  }
  0xeb   :  { %6833 = vmatprep.subr.bf16.mxu0 %v7508_v55  ;;  %6854 = vmatpush3.bf16.msra.mxu1 %v7507_v53 }
  0xec   :  { %6855 = vmatprep.subr.bf16.mxu1 %v7509_v56  ;;  %5146 = vmatprep.mubr.bf16.mxu0 %v1290_v28  ;;  %v7548_v56 = vld [vmem:[#allocation2 + $0x760] sm:$0xff]  }
  0xed   :  { %5186 = vmatprep.mubr.bf16.mxu1 %v1300_v33  ;;  %v7579_v33 = vld [vmem:[#allocation2 + $0x828] sm:$0xff]  }
  0xee   :  { %6834 = vmatpush3.bf16.msra.mxu0 %v7510_v57 }
  0xef   :  { %6835 = vmatprep.subr.bf16.mxu0 %v7512_v59  ;;  %6856 = vmatpush3.bf16.msra.mxu1 %v7511_v58  ;;  %v7549_v58 = vld [vmem:[#allocation2 + $0x7e0] sm:$0xff]  }
  0xf0   :  { %6857 = vmatprep.subr.bf16.mxu1 %v7513_v60  ;;  %v7550_v59 = vld [vmem:[#allocation2 + $0x720] sm:$0xff]  }
  0xf1   :  { %v7551_v60 = vld [vmem:[#allocation2 + $0x7a0] sm:$0xff]  }
  0xf2   :  { %6836 = vmatpush3.bf16.msra.mxu0 %v7514_v61  ;;  %v7552_v61 = vld [vmem:[#allocation2 + $0x758] sm:$0xff]  }
  0xf3   :  { %6837 = vmatprep.subr.bf16.mxu0 %v7516_v63  ;;  %6858 = vmatpush3.bf16.msra.mxu1 %v7515_v62  ;;  %v7553_v62 = vld [vmem:[#allocation2 + $0x7d8] sm:$0xff]  }
  0xf4   :  { %6859 = vmatprep.subr.bf16.mxu1 %v7517_v0  ;;  %v7554_v63 = vld [vmem:[#allocation2 + $0x718] sm:$0xff]  }
  0xf5   :  { %v7555_v0 = vld [vmem:[#allocation2 + $0x798] sm:$0xff]  }
  0xf6   :  { %6838 = vmatpush3.bf16.msra.mxu0 %v7518_v1  ;;  %v7556_v1 = vld [vmem:[#allocation2 + $0x750] sm:$0xff]  }
  0xf7   :  { %6839 = vmatprep.subr.bf16.mxu0 %v7520_v3  ;;  %6860 = vmatpush3.bf16.msra.mxu1 %v7519_v2  ;;  %v7557_v2 = vld [vmem:[#allocation2 + $0x7d0] sm:$0xff]  }
  0xf8   :  { %6861 = vmatprep.subr.bf16.mxu1 %v7521_v4  ;;  %v7558_v3 = vld [vmem:[#allocation2 + $0x710] sm:$0xff]  }
  0xf9   :  { %v7559_v4 = vld [vmem:[#allocation2 + $0x790] sm:$0xff]  }
  0xfa   :  { %6840 = vmatpush3.bf16.msra.mxu0 %v7522_v5  ;;  %v7560_v5 = vld [vmem:[#allocation2 + $0x748] sm:$0xff]  }
  0xfb   :  { %6841 = vmatprep.subr.bf16.mxu0 %v7524_v7  ;;  %6862 = vmatpush3.bf16.msra.mxu1 %v7523_v6  ;;  %v7561_v6 = vld [vmem:[#allocation2 + $0x7c8] sm:$0xff]  }
  0xfc   :  { %6863 = vmatprep.subr.bf16.mxu1 %v7525_v8  ;;  %v7562_v7 = vld [vmem:[#allocation2 + $0x708] sm:$0xff]  }
  0xfd   :  { %v7563_v8 = vld [vmem:[#allocation2 + $0x788] sm:$0xff]  }
  0xfe   :  { %6842 = vmatpush3.bf16.msra.mxu0 %v7526_v9  ;;  %v7564_v9 = vld [vmem:[#allocation2 + $0x740] sm:$0xff]  }
  0xff   :  { %6843 = vmatprep.subr.bf16.mxu0 %v7528_v11  ;;  %6864 = vmatpush3.bf16.msra.mxu1 %v7527_v10  ;;  %v7565_v10 = vld [vmem:[#allocation2 + $0x7c0] sm:$0xff]  }
 0x100   :  { %6865 = vmatprep.subr.bf16.mxu1 %v7529_v12  ;;  %v7566_v11 = vld [vmem:[#allocation2 + $0x700] sm:$0xff]  }
 0x101   :  { %v7567_v12 = vld [vmem:[#allocation2 + $0x780] sm:$0xff]  }
 0x102   :  { %6844 = vmatpush3.bf16.msra.mxu0 %v7530_v13  ;;  %v1283_v13 = vrot.slane %v8021_v26, %v7971_v35 }
 0x103   :  { %6845 = vmatprep.subr.bf16.mxu0 %v7532_v15  ;;  %6866 = vmatpush3.bf16.msra.mxu1 %v7531_v14  ;;  %v7569_v14 = vld [vmem:[#allocation2 + $0x878] sm:$0xff]  }
 0x104   :  { %6867 = vmatprep.subr.bf16.mxu1 %v7533_v16  ;;  %v7570_v15 = vld [vmem:[#allocation2 + $0x8f8] sm:$0xff]   ;;  %v1299_v18 = vcombine.high %v1283_v13, %v1283_v13 }
 0x105   :  { %v7571_v16 = vld [vmem:[#allocation2 + $0x838] sm:$0xff]  }
 0x106   :  { %6846 = vmatpush3.bf16.msra.mxu0 %v7534_v17  ;;  %v7572_v17 = vld [vmem:[#allocation2 + $0x8b8] sm:$0xff]  }
 0x107   :  { %6875 = vmatprep.subr.bf16.mxu0 %v7536_v20  ;;  %6868 = vmatpush3.bf16.msra.mxu1 %v7535_v22  ;;  %v7575_v22 = vld [vmem:[#allocation2 + $0x830] sm:$0xff]  }
 0x108   :  { %6897 = vmatprep.subr.bf16.mxu1 %v7537_v25  ;;  %v7576_v25 = vld [vmem:[#allocation2 + $0x8b0] sm:$0xff]  }
 0x109   :  { %v6583_v34 = vpop.f32.mrf.mxu0  ;;  %5147 = vmatmul.mubr.bf16.vlgmr.msra.gmra.mxu0 %v1276_v24 }
 0x10a   :  { %v6605_v40 = vpop.f32.mrf.mxu1  ;;  %6876 = vmatpush3.bf16.msra.mxu0 %v7538_v27  ;;  %5187 = vmatmul.mubr.bf16.vlgmr.msra.gmra.mxu1 %v1298_v31  ;;  %v7577_v27 = vld [vmem:[#allocation2 + $0x868] sm:$0xff]  }
 0x10b   :  { %v6584_v41 = vpop.f32.mrf.mxu0  ;;  %6877 = vmatprep.subr.bf16.mxu0 %v7540_v32  ;;  %6898 = vmatpush3.bf16.msra.mxu1 %v7539_v29 }
 0x10c   :  { %v6585_v44 = vadd.f32 %v6584_v41, %v6583_v34  ;;  %v6606_v46 = vpop.f32.mrf.mxu1  ;;  %5226 = vmatprep.mubr.bf16.mxu0 %v1297_v38  ;;  %6899 = vmatprep.subr.bf16.mxu1 %v7541_v37  ;;  %v7580_v37 = vld [vmem:[#allocation2 + $0x8a8] sm:$0xff]   ;;  %v7582_v41 = vld [vmem:[#allocation2 + $0x8e0] sm:$0xff]  }
 0x10d   :  { %v6586_v47 = vpop.f32.mrf.mxu0  ;;  %v6607_v50 = vadd.f32 %v6606_v46, %v6605_v40  ;;  %5266 = vmatprep.mubr.bf16.mxu1 %v1301_v43  ;;  %v7584_v43 = vld [vmem:[#allocation2 + $0x8a0] sm:$0xff]   ;;  %v7587_v46 = vld [vmem:[#allocation2 + $0x818] sm:$0xff]  }
 0x10e   :  { %v4669_v49 = vadd.f32 %v6585_v44, %v6045_v36  ;;  %v6608_v52 = vpop.f32.mrf.mxu1  ;;  %6878 = vmatpush3.bf16.msra.mxu0 %v7542_v39  ;;  %v7581_v39 = vld [vmem:[#allocation2 + $0x860] sm:$0xff]   ;;  %v7585_v44 = vld [vmem:[#allocation2 + $0x858] sm:$0xff]  }
 0x10f   :  { %v6587_v53 = vpop.f32.mrf.mxu0  ;;  %6879 = vmatprep.subr.bf16.mxu0 %v7544_v45  ;;  %6900 = vmatpush3.bf16.msra.mxu1 %v7543_v42  ;;  %v7583_v42 = vld [vmem:[#allocation2 + $0x820] sm:$0xff]   ;;  %v7586_v45 = vld [vmem:[#allocation2 + $0x8d8] sm:$0xff]   ;;  %v7593_v52 = vld [vmem:[#allocation2 + $0x848] sm:$0xff]  }
 0x110   :  { %v8027_v55 = vadd.f32 %v6607_v50, %v4669_v49  ;;  %v6609_v57 = vpop.f32.mrf.mxu1  ;;  %6901 = vmatprep.subr.bf16.mxu1 %v7545_v48  ;;  %v7588_v47 = vld [vmem:[#allocation2 + $0x898] sm:$0xff]   ;;  %v7589_v48 = vld [vmem:[#allocation2 + $0x850] sm:$0xff]   ;;  %v7594_v53 = vld [vmem:[#allocation2 + $0x8c8] sm:$0xff]  }
 0x111   :  { %v7590_v49 = vld [vmem:[#allocation2 + $0x8d0] sm:$0xff]   ;;  %v7598_v57 = vld [vmem:[#allocation2 + $0x8c0] sm:$0xff]  }
 0x112   :  { %6880 = vmatpush3.bf16.msra.mxu0 %v7546_v51  ;;  %v7591_v50 = vld [vmem:[#allocation2 + $0x810] sm:$0xff]  }
 0x113   :  { %6881 = vmatprep.subr.bf16.mxu0 %v7548_v56  ;;  %6902 = vmatpush3.bf16.msra.mxu1 %v7547_v54  ;;  %v7592_v51 = vld [vmem:[#allocation2 + $0x890] sm:$0xff]   ;;  %v7595_v54 = vld [vmem:[#allocation2 + $0x808] sm:$0xff]   ;;  %v7597_v56 = vld [vmem:[#allocation2 + $0x840] sm:$0xff]  }
 0x114   :  { %6903 = vmatprep.subr.bf16.mxu1 %v7549_v58  ;;  %v7599_v58 = vld [vmem:[#allocation2 + $0x800] sm:$0xff]  }
 0x116   :  { %6882 = vmatpush3.bf16.msra.mxu0 %v7550_v59  ;;  %v63_v59 = vld [vmem:[%s8136_s0 + $0x20] sm:$0xff] }
 0x117   :  { %6883 = vmatprep.subr.bf16.mxu0 %v7552_v61  ;;  %6904 = vmatpush3.bf16.msra.mxu1 %v7551_v60  ;;  %v7600_v60 = vld [vmem:[#allocation2 + $0x880] sm:$0xff]   ;;  %v1309_v61 = vrot.slane %v63_v59, %v7971_v35 }
 0x118   :  { %6905 = vmatprep.subr.bf16.mxu1 %v7553_v62  ;;  %v1302_v62 = vcombine.high %v63_v59, %v63_v59  ;;  %v7638_v59 = vld [vmem:[#allocation2 + $0xa70] sm:$0xff]  }
 0x11a   :  { %6884 = vmatpush3.bf16.msra.mxu0 %v7554_v63  ;;  %v7601_v63 = vld [vmem:[#allocation2 + $0x978] sm:$0xff]  }
 0x11b   :  { %6885 = vmatprep.subr.bf16.mxu0 %v7556_v1  ;;  %6906 = vmatpush3.bf16.msra.mxu1 %v7555_v0  ;;  %v1317_v0 = vcombine.high %v1309_v61, %v1309_v61  ;;  %v1325_v1 = vrot.slane %v1309_v61, %v7971_v35  ;;  %v7639_v61 = vld [vmem:[#allocation2 + $0xaf0] sm:$0xff]  }
 0x11c   :  { %6907 = vmatprep.subr.bf16.mxu1 %v7557_v2  ;;  %v7602_v2 = vld [vmem:[#allocation2 + $0x9f8] sm:$0xff]  }
 0x11e   :  { %6886 = vmatpush3.bf16.msra.mxu0 %v7558_v3  ;;  %v8040_v3 = vrot.slane %v1302_v62, %v7971_v35  ;;  %v7640_v62 = vld [vmem:[#allocation2 + $0xa30] sm:$0xff]  }
 0x11f   :  { %6887 = vmatprep.subr.bf16.mxu0 %v7560_v5  ;;  %6908 = vmatpush3.bf16.msra.mxu1 %v7559_v4  ;;  %v7603_v4 = vld [vmem:[#allocation2 + $0x938] sm:$0xff]   ;;  %v1339_v5 = vrot.slane %v1317_v0, %v7971_v35 }
 0x120   :  { %6909 = vmatprep.subr.bf16.mxu1 %v7561_v6  ;;  %v7604_v6 = vld [vmem:[#allocation2 + $0x9b8] sm:$0xff]  }
 0x122   :  { %6888 = vmatpush3.bf16.msra.mxu0 %v7562_v7  ;;  %v1318_v7 = vcombine.high %v8040_v3, %v8040_v3 }
 0x123   :  { %6889 = vmatprep.subr.bf16.mxu0 %v7564_v9  ;;  %6910 = vmatpush3.bf16.msra.mxu1 %v7563_v8  ;;  %v1347_v8 = vcombine.high %v1325_v1, %v1325_v1  ;;  %v7605_v9 = vld [vmem:[#allocation2 + $0x970] sm:$0xff]  }
 0x124   :  { %6911 = vmatprep.subr.bf16.mxu1 %v7565_v10  ;;  %v1349_v10 = vcombine.high %v1339_v5, %v1339_v5 }
 0x126   :  { %6890 = vmatpush3.bf16.msra.mxu0 %v7566_v11 }
 0x127   :  { %6919 = vmatprep.subr.bf16.mxu0 %v7569_v14  ;;  %6912 = vmatpush3.bf16.msra.mxu1 %v7567_v12  ;;  %v7606_v12 = vld [vmem:[#allocation2 + $0x9f0] sm:$0xff]  }
 0x128   :  { %6941 = vmatprep.subr.bf16.mxu1 %v7570_v15  ;;  %v7607_v14 = vld [vmem:[#allocation2 + $0x930] sm:$0xff]  }
 0x129   :  { %v6627_v20 = vpop.f32.mrf.mxu0  ;;  %5227 = vmatmul.mubr.bf16.vlgmr.msra.gmra.mxu0 %v1283_v13  ;;  %v1346_v13 = vrot.slane %v1318_v7, %v7971_v35 }
 0x12a   :  { %v6649_v23 = vpop.f32.mrf.mxu1  ;;  %6920 = vmatpush3.bf16.msra.mxu0 %v7571_v16  ;;  %5267 = vmatmul.mubr.bf16.vlgmr.msra.gmra.mxu1 %v1299_v18 }
 0x12b   :  { %v6628_v24 = vpop.f32.mrf.mxu0  ;;  %6921 = vmatprep.subr.bf16.mxu0 %v7573_v19  ;;  %6942 = vmatpush3.bf16.msra.mxu1 %v7572_v17  ;;  %v7608_v17 = vld [vmem:[#allocation2 + $0x9b0] sm:$0xff]   ;;  %v1350_v18 = vcombine.high %v1346_v13, %v1346_v13 }
 0x12c   :  { %v6629_v26 = vadd.f32 %v6628_v24, %v6627_v20  ;;  %v6650_v28 = vpop.f32.mrf.mxu1  ;;  %6943 = vmatprep.subr.bf16.mxu1 %v7574_v21  ;;  %5306 = vmatprep.mubr.bf16.mxu0 %v1339_v5  ;;  %v7609_v20 = vld [vmem:[#allocation2 + $0x968] sm:$0xff]  }
 0x12d   :  { %v6630_v29 = vpop.f32.mrf.mxu0  ;;  %v6651_v32 = vadd.f32 %v6650_v28, %v6649_v23  ;;  %5346 = vmatprep.mubr.bf16.mxu1 %v1349_v10  ;;  %v7610_v23 = vld [vmem:[#allocation2 + $0x9e8] sm:$0xff]  }
 0x12e   :  { %v4749_v31 = vadd.f32 %v6629_v26, %v8027_v55  ;;  %v6652_v34 = vpop.f32.mrf.mxu1  ;;  %6922 = vmatpush3.bf16.msra.mxu0 %v7575_v22  ;;  %v7596_v55 = vld [vmem:[#allocation2 + $0x888] sm:$0xff]  }
 0x12f   :  { %v6631_v36 = vpop.f32.mrf.mxu0  ;;  %6923 = vmatprep.subr.bf16.mxu0 %v7577_v27  ;;  %6944 = vmatpush3.bf16.msra.mxu1 %v7576_v25  ;;  %v7611_v26 = vld [vmem:[#allocation2 + $0x928] sm:$0xff]   ;;  %v7615_v34 = vld [vmem:[#allocation2 + $0x920] sm:$0xff]  }
 0x130   :  { %v8032_v38 = vadd.f32 %v6651_v32, %v4749_v31  ;;  %v6653_v40 = vpop.f32.mrf.mxu1  ;;  %6945 = vmatprep.subr.bf16.mxu1 %v7578_v30  ;;  %v7612_v29 = vld [vmem:[#allocation2 + $0x9a8] sm:$0xff]   ;;  %v7613_v31 = vld [vmem:[#allocation2 + $0x960] sm:$0xff]  }
 0x131   :  { %v7616_v36 = vld [vmem:[#allocation2 + $0x9a0] sm:$0xff]   ;;  %v7620_v40 = vld [vmem:[#allocation2 + $0x998] sm:$0xff]  }
 0x132   :  { %6924 = vmatpush3.bf16.msra.mxu0 %v7579_v33  ;;  %v7614_v33 = vld [vmem:[#allocation2 + $0x9e0] sm:$0xff]  }
 0x133   :  { %6925 = vmatprep.subr.bf16.mxu0 %v7581_v39  ;;  %6946 = vmatpush3.bf16.msra.mxu1 %v7580_v37  ;;  %v7617_v37 = vld [vmem:[#allocation2 + $0x958] sm:$0xff]  }
 0x134   :  { %6947 = vmatprep.subr.bf16.mxu1 %v7582_v41  ;;  %v7619_v39 = vld [vmem:[#allocation2 + $0x918] sm:$0xff]   ;;  %v7621_v41 = vld [vmem:[#allocation2 + $0x950] sm:$0xff]  }
 0x136   :  { %6926 = vmatpush3.bf16.msra.mxu0 %v7583_v42  ;;  %v7622_v42 = vld [vmem:[#allocation2 + $0x9d0] sm:$0xff]  }
 0x137   :  { %6927 = vmatprep.subr.bf16.mxu0 %v7585_v44  ;;  %6948 = vmatpush3.bf16.msra.mxu1 %v7584_v43  ;;  %v7623_v43 = vld [vmem:[#allocation2 + $0x910] sm:$0xff]  }
 0x138   :  { %6949 = vmatprep.subr.bf16.mxu1 %v7586_v45  ;;  %v7624_v44 = vld [vmem:[#allocation2 + $0x990] sm:$0xff]   ;;  %v7625_v45 = vld [vmem:[#allocation2 + $0x948] sm:$0xff]  }
 0x13a   :  { %6928 = vmatpush3.bf16.msra.mxu0 %v7587_v46  ;;  %v7626_v46 = vld [vmem:[#allocation2 + $0x9c8] sm:$0xff]  }
 0x13b   :  { %6929 = vmatprep.subr.bf16.mxu0 %v7589_v48  ;;  %6950 = vmatpush3.bf16.msra.mxu1 %v7588_v47  ;;  %v7627_v47 = vld [vmem:[#allocation2 + $0x908] sm:$0xff]  }
 0x13c   :  { %6951 = vmatprep.subr.bf16.mxu1 %v7590_v49  ;;  %v7628_v48 = vld [vmem:[#allocation2 + $0x988] sm:$0xff]   ;;  %v7629_v49 = vld [vmem:[#allocation2 + $0x940] sm:$0xff]  }
 0x13e   :  { %6930 = vmatpush3.bf16.msra.mxu0 %v7591_v50  ;;  %v7630_v50 = vld [vmem:[#allocation2 + $0x9c0] sm:$0xff]  }
 0x13f   :  { %6931 = vmatprep.subr.bf16.mxu0 %v7593_v52  ;;  %6952 = vmatpush3.bf16.msra.mxu1 %v7592_v51  ;;  %v7631_v51 = vld [vmem:[#allocation2 + $0x900] sm:$0xff]  }
 0x140   :  { %6953 = vmatprep.subr.bf16.mxu1 %v7594_v53  ;;  %v7632_v52 = vld [vmem:[#allocation2 + $0x980] sm:$0xff]   ;;  %v1332_v53 = vrot.slane %v8040_v3, %v7971_v35  ;;  %v7642_v3 = vld [vmem:[#allocation2 + $0xa68] sm:$0xff]  }
 0x142   :  { %6932 = vmatpush3.bf16.msra.mxu0 %v7595_v54  ;;  %v7634_v54 = vld [vmem:[#allocation2 + $0xa78] sm:$0xff]  }
 0x143   :  { %6933 = vmatprep.subr.bf16.mxu0 %v7597_v56  ;;  %6954 = vmatpush3.bf16.msra.mxu1 %v7596_v55  ;;  %v7635_v55 = vld [vmem:[#allocation2 + $0xaf8] sm:$0xff]  }
 0x144   :  { %6955 = vmatprep.subr.bf16.mxu1 %v7598_v57  ;;  %v7636_v56 = vld [vmem:[#allocation2 + $0xa38] sm:$0xff]  }
 0x145   :  { %v7637_v57 = vld [vmem:[#allocation2 + $0xab8] sm:$0xff]  }
 0x146   :  { %6934 = vmatpush3.bf16.msra.mxu0 %v7599_v58  ;;  %v1348_v58 = vcombine.high %v1332_v53, %v1332_v53 }
 0x147   :  { %6963 = vmatprep.subr.bf16.mxu0 %v7601_v63  ;;  %6956 = vmatpush3.bf16.msra.mxu1 %v7600_v60 }
 0x148   :  { %6985 = vmatprep.subr.bf16.mxu1 %v7602_v2 }
 0x149   :  { %v6671_v11 = vpop.f32.mrf.mxu0  ;;  %5307 = vmatmul.mubr.bf16.vlgmr.msra.gmra.mxu0 %v1325_v1  ;;  %v7641_v1 = vld [vmem:[#allocation2 + $0xab0] sm:$0xff]  }
 0x14a   :  { %v6693_v15 = vpop.f32.mrf.mxu1  ;;  %6964 = vmatpush3.bf16.msra.mxu0 %v7603_v4  ;;  %5347 = vmatmul.mubr.bf16.vlgmr.msra.gmra.mxu1 %v1347_v8 }
 0x14b   :  { %v6672_v16 = vpop.f32.mrf.mxu0  ;;  %6965 = vmatprep.subr.bf16.mxu0 %v7605_v9  ;;  %6986 = vmatpush3.bf16.msra.mxu1 %v7604_v6  ;;  %v7643_v6 = vld [vmem:[#allocation2 + $0xae8] sm:$0xff]  }
 0x14c   :  { %v6673_v19 = vadd.f32 %v6672_v16, %v6671_v11  ;;  %v6694_v21 = vpop.f32.mrf.mxu1  ;;  %5386 = vmatprep.mubr.bf16.mxu0 %v1346_v13  ;;  %6987 = vmatprep.subr.bf16.mxu1 %v7606_v12  ;;  %v7644_v9 = vld [vmem:[#allocation2 + $0xa28] sm:$0xff]   ;;  %v7647_v16 = vld [vmem:[#allocation2 + $0xae0] sm:$0xff]  }
 0x14d   :  { %v6674_v22 = vpop.f32.mrf.mxu0  ;;  %v6695_v25 = vadd.f32 %v6694_v21, %v6693_v15  ;;  %5426 = vmatprep.mubr.bf16.mxu1 %v1350_v18  ;;  %v7645_v12 = vld [vmem:[#allocation2 + $0xaa8] sm:$0xff]   ;;  %v7649_v18 = vld [vmem:[#allocation2 + $0xaa0] sm:$0xff]   ;;  %v7652_v21 = vld [vmem:[#allocation2 + $0xa18] sm:$0xff]  }
 0x14e   :  { %v4829_v24 = vadd.f32 %v6673_v19, %v8032_v38  ;;  %v6696_v27 = vpop.f32.mrf.mxu1  ;;  %6966 = vmatpush3.bf16.msra.mxu0 %v7607_v14  ;;  %v7618_v38 = vld [vmem:[#allocation2 + $0x9d8] sm:$0xff]   ;;  %v7646_v14 = vld [vmem:[#allocation2 + $0xa60] sm:$0xff]  }
 0x14f   :  { %v6675_v28 = vpop.f32.mrf.mxu0  ;;  %6967 = vmatprep.subr.bf16.mxu0 %v7609_v20  ;;  %6988 = vmatpush3.bf16.msra.mxu1 %v7608_v17  ;;  %v7648_v17 = vld [vmem:[#allocation2 + $0xa20] sm:$0xff]   ;;  %v7650_v19 = vld [vmem:[#allocation2 + $0xa58] sm:$0xff]   ;;  %v7658_v27 = vld [vmem:[#allocation2 + $0xa48] sm:$0xff]  }
 0x150   :  { %v8047_v30 = vadd.f32 %v6695_v25, %v4829_v24  ;;  %v6697_v32 = vpop.f32.mrf.mxu1  ;;  %6989 = vmatprep.subr.bf16.mxu1 %v7610_v23  ;;  %v7651_v20 = vld [vmem:[#allocation2 + $0xad8] sm:$0xff]   ;;  %v7654_v23 = vld [vmem:[#allocation2 + $0xa50] sm:$0xff]   ;;  %v7659_v28 = vld [vmem:[#allocation2 + $0xac8] sm:$0xff]  }
 0x151   :  { %v7653_v22 = vld [vmem:[#allocation2 + $0xa98] sm:$0xff]   ;;  %v7655_v24 = vld [vmem:[#allocation2 + $0xad0] sm:$0xff]   ;;  %v7663_v32 = vld [vmem:[#allocation2 + $0xac0] sm:$0xff]  }
 0x152   :  { %6968 = vmatpush3.bf16.msra.mxu0 %v7611_v26  ;;  %v7656_v25 = vld [vmem:[#allocation2 + $0xa10] sm:$0xff]  }
 0x153   :  { %6969 = vmatprep.subr.bf16.mxu0 %v7613_v31  ;;  %6990 = vmatpush3.bf16.msra.mxu1 %v7612_v29  ;;  %v7657_v26 = vld [vmem:[#allocation2 + $0xa90] sm:$0xff]   ;;  %v7660_v29 = vld [vmem:[#allocation2 + $0xa08] sm:$0xff]   ;;  %v7662_v31 = vld [vmem:[#allocation2 + $0xa40] sm:$0xff]  }
 0x154   :  { %6991 = vmatprep.subr.bf16.mxu1 %v7614_v33  ;;  %v7664_v33 = vld [vmem:[#allocation2 + $0xa00] sm:$0xff]  }
 0x156   :  { %6970 = vmatpush3.bf16.msra.mxu0 %v7615_v34  ;;  %v64_v34 = vld [vmem:[%s8136_s0 + $0x28] sm:$0xff] }
 0x157   :  { %6971 = vmatprep.subr.bf16.mxu0 %v7617_v37  ;;  %6992 = vmatpush3.bf16.msra.mxu1 %v7616_v36  ;;  %v1358_v36 = vrot.slane %v64_v34, %v7971_v35  ;;  %v7666_v37 = vld [vmem:[#allocation2 + $0xb78] sm:$0xff]  }
 0x158   :  { %6993 = vmatprep.subr.bf16.mxu1 %v7618_v38  ;;  %v1351_v38 = vcombine.high %v64_v34, %v64_v34 }
 0x15a   :  { %6972 = vmatpush3.bf16.msra.mxu0 %v7619_v39  ;;  %v7665_v39 = vld [vmem:[#allocation2 + $0xa80] sm:$0xff]  }
 0x15b   :  { %6973 = vmatprep.subr.bf16.mxu0 %v7621_v41  ;;  %6994 = vmatpush3.bf16.msra.mxu1 %v7620_v40  ;;  %v1366_v40 = vcombine.high %v1358_v36, %v1358_v36  ;;  %v1374_v41 = vrot.slane %v1358_v36, %v7971_v35  ;;  %v7703_v36 = vld [vmem:[#allocation2 + $0xc70] sm:$0xff]  }
 0x15c   :  { %6995 = vmatprep.subr.bf16.mxu1 %v7622_v42  ;;  %v7667_v42 = vld [vmem:[#allocation2 + $0xbf8] sm:$0xff]  }
 0x15e   :  { %6974 = vmatpush3.bf16.msra.mxu0 %v7623_v43  ;;  %v8060_v43 = vrot.slane %v1351_v38, %v7971_v35 }
 0x15f   :  { %6975 = vmatprep.subr.bf16.mxu0 %v7625_v45  ;;  %6996 = vmatpush3.bf16.msra.mxu1 %v7624_v44  ;;  %v7668_v44 = vld [vmem:[#allocation2 + $0xb38] sm:$0xff]   ;;  %v1388_v45 = vrot.slane %v1366_v40, %v7971_v35  ;;  %v7705_v40 = vld [vmem:[#allocation2 + $0xc30] sm:$0xff]  }
 0x160   :  { %6997 = vmatprep.subr.bf16.mxu1 %v7626_v46  ;;  %v7669_v46 = vld [vmem:[#allocation2 + $0xbb8] sm:$0xff]  }
 0x162   :  { %6976 = vmatpush3.bf16.msra.mxu0 %v7627_v47  ;;  %v1367_v47 = vcombine.high %v8060_v43, %v8060_v43 }
 0x163   :  { %6977 = vmatprep.subr.bf16.mxu0 %v7629_v49  ;;  %6998 = vmatpush3.bf16.msra.mxu1 %v7628_v48  ;;  %v1396_v49 = vcombine.high %v1374_v41, %v1374_v41 }
 0x164   :  { %6999 = vmatprep.subr.bf16.mxu1 %v7630_v50  ;;  %v7670_v50 = vld [vmem:[#allocation2 + $0xb70] sm:$0xff]  }
 0x166   :  { %6978 = vmatpush3.bf16.msra.mxu0 %v7631_v51  ;;  %v1398_v51 = vcombine.high %v1388_v45, %v1388_v45 }
 0x167   :  { %7007 = vmatprep.subr.bf16.mxu0 %v7634_v54  ;;  %7000 = vmatpush3.bf16.msra.mxu1 %v7632_v52  ;;  %v7671_v52 = vld [vmem:[#allocation2 + $0xbf0] sm:$0xff]  }
 0x168   :  { %7029 = vmatprep.subr.bf16.mxu1 %v7635_v55 }
 0x169   :  { %v6715_v60 = vpop.f32.mrf.mxu0  ;;  %5387 = vmatmul.mubr.bf16.vlgmr.msra.gmra.mxu0 %v1332_v53  ;;  %v1395_v53 = vrot.slane %v1367_v47, %v7971_v35 }
 0x16a   :  { %v6737_v63 = vpop.f32.mrf.mxu1  ;;  %7008 = vmatpush3.bf16.msra.mxu0 %v7636_v56  ;;  %5427 = vmatmul.mubr.bf16.vlgmr.msra.gmra.mxu1 %v1348_v58  ;;  %v7672_v56 = vld [vmem:[#allocation2 + $0xb30] sm:$0xff]  }
 0x16b   :  { %v6716_v0 = vpop.f32.mrf.mxu0  ;;  %7009 = vmatprep.subr.bf16.mxu0 %v7638_v59  ;;  %7030 = vmatpush3.bf16.msra.mxu1 %v7637_v57  ;;  %v7673_v58 = vld [vmem:[#allocation2 + $0xbb0] sm:$0xff]   ;;  %v1399_v59 = vcombine.high %v1395_v53, %v1395_v53 }
 0x16c   :  { %v6717_v2 = vadd.f32 %v6716_v0, %v6715_v60  ;;  %v6738_v4 = vpop.f32.mrf.mxu1  ;;  %7031 = vmatprep.subr.bf16.mxu1 %v7639_v61  ;;  %5466 = vmatprep.mubr.bf16.mxu0 %v1388_v45  ;;  %v7707_v45 = vld [vmem:[#allocation2 + $0xc68] sm:$0xff]  }
 0x16d   :  { %v6718_v5 = vpop.f32.mrf.mxu0  ;;  %v6739_v8 = vadd.f32 %v6738_v4, %v6737_v63  ;;  %5506 = vmatprep.mubr.bf16.mxu1 %v1398_v51  ;;  %v7676_v4 = vld [vmem:[#allocation2 + $0xb28] sm:$0xff]  }
 0x16e   :  { %v4909_v7 = vadd.f32 %v6717_v2, %v8047_v30  ;;  %v6740_v10 = vpop.f32.mrf.mxu1  ;;  %7010 = vmatpush3.bf16.msra.mxu0 %v7640_v62  ;;  %v7661_v30 = vld [vmem:[#allocation2 + $0xa88] sm:$0xff]  }
 0x16f   :  { %v6719_v11 = vpop.f32.mrf.mxu0  ;;  %7011 = vmatprep.subr.bf16.mxu0 %v7642_v3  ;;  %7032 = vmatpush3.bf16.msra.mxu1 %v7641_v1  ;;  %v7674_v62 = vld [vmem:[#allocation2 + $0xb68] sm:$0xff]   ;;  %v7680_v10 = vld [vmem:[#allocation2 + $0xb20] sm:$0xff]  }
 0x170   :  { %v8052_v13 = vadd.f32 %v6739_v8, %v4909_v7  ;;  %v6741_v15 = vpop.f32.mrf.mxu1  ;;  %7033 = vmatprep.subr.bf16.mxu1 %v7643_v6  ;;  %v7675_v1 = vld [vmem:[#allocation2 + $0xbe8] sm:$0xff]   ;;  %v7678_v8 = vld [vmem:[#allocation2 + $0xb60] sm:$0xff]  }
 0x171   :  { %v7677_v6 = vld [vmem:[#allocation2 + $0xba8] sm:$0xff]   ;;  %v7681_v11 = vld [vmem:[#allocation2 + $0xba0] sm:$0xff]   ;;  %v7685_v15 = vld [vmem:[#allocation2 + $0xb98] sm:$0xff]  }
 0x172   :  { %7012 = vmatpush3.bf16.msra.mxu0 %v7644_v9  ;;  %v7679_v9 = vld [vmem:[#allocation2 + $0xbe0] sm:$0xff]   ;;  %v7709_v51 = vld [vmem:[#allocation2 + $0xc28] sm:$0xff]  }
 0x173   :  { %7013 = vmatprep.subr.bf16.mxu0 %v7646_v14  ;;  %7034 = vmatpush3.bf16.msra.mxu1 %v7645_v12  ;;  %v7682_v12 = vld [vmem:[#allocation2 + $0xb58] sm:$0xff]  }
 0x174   :  { %7035 = vmatprep.subr.bf16.mxu1 %v7647_v16  ;;  %v7684_v14 = vld [vmem:[#allocation2 + $0xb18] sm:$0xff]   ;;  %v7686_v16 = vld [vmem:[#allocation2 + $0xb50] sm:$0xff]  }
 0x176   :  { %7014 = vmatpush3.bf16.msra.mxu0 %v7648_v17  ;;  %v7687_v17 = vld [vmem:[#allocation2 + $0xbd0] sm:$0xff]  }
 0x177   :  { %7015 = vmatprep.subr.bf16.mxu0 %v7650_v19  ;;  %7036 = vmatpush3.bf16.msra.mxu1 %v7649_v18  ;;  %v7688_v18 = vld [vmem:[#allocation2 + $0xb10] sm:$0xff]  }
 0x178   :  { %7037 = vmatprep.subr.bf16.mxu1 %v7651_v20  ;;  %v7689_v19 = vld [vmem:[#allocation2 + $0xb90] sm:$0xff]   ;;  %v7690_v20 = vld [vmem:[#allocation2 + $0xb48] sm:$0xff]  }
 0x17a   :  { %7016 = vmatpush3.bf16.msra.mxu0 %v7652_v21  ;;  %v7691_v21 = vld [vmem:[#allocation2 + $0xbc8] sm:$0xff]  }
 0x17b   :  { %7017 = vmatprep.subr.bf16.mxu0 %v7654_v23  ;;  %7038 = vmatpush3.bf16.msra.mxu1 %v7653_v22  ;;  %v7692_v22 = vld [vmem:[#allocation2 + $0xb08] sm:$0xff]  }
 0x17c   :  { %7039 = vmatprep.subr.bf16.mxu1 %v7655_v24  ;;  %v7693_v23 = vld [vmem:[#allocation2 + $0xb88] sm:$0xff]   ;;  %v7694_v24 = vld [vmem:[#allocation2 + $0xb40] sm:$0xff]  }
 0x17e   :  { %7018 = vmatpush3.bf16.msra.mxu0 %v7656_v25  ;;  %v7695_v25 = vld [vmem:[#allocation2 + $0xbc0] sm:$0xff]  }
 0x17f   :  { %7019 = vmatprep.subr.bf16.mxu0 %v7658_v27  ;;  %7040 = vmatpush3.bf16.msra.mxu1 %v7657_v26  ;;  %v7696_v26 = vld [vmem:[#allocation2 + $0xb00] sm:$0xff]  }
 0x180   :  { %7041 = vmatprep.subr.bf16.mxu1 %v7659_v28  ;;  %v7697_v27 = vld [vmem:[#allocation2 + $0xb80] sm:$0xff]   ;;  %v1381_v28 = vrot.slane %v8060_v43, %v7971_v35 }
 0x182   :  { %7020 = vmatpush3.bf16.msra.mxu0 %v7660_v29  ;;  %v7699_v29 = vld [vmem:[#allocation2 + $0xc78] sm:$0xff]   ;;  %v1397_v34 = vcombine.high %v1381_v28, %v1381_v28 }
 0x183   :  { %7021 = vmatprep.subr.bf16.mxu0 %v7662_v31  ;;  %7042 = vmatpush3.bf16.msra.mxu1 %v7661_v30  ;;  %v7700_v30 = vld [vmem:[#allocation2 + $0xcf8] sm:$0xff]  }
 0x184   :  { %7043 = vmatprep.subr.bf16.mxu1 %v7663_v32  ;;  %v7701_v31 = vld [vmem:[#allocation2 + $0xc38] sm:$0xff]  }
 0x185   :  { %v7702_v32 = vld [vmem:[#allocation2 + $0xcb8] sm:$0xff]  }
 0x186   :  { %7022 = vmatpush3.bf16.msra.mxu0 %v7664_v33 }
 0x187   :  { %7051 = vmatprep.subr.bf16.mxu0 %v7666_v37  ;;  %7044 = vmatpush3.bf16.msra.mxu1 %v7665_v39  ;;  %v7704_v37 = vld [vmem:[#allocation2 + $0xcf0] sm:$0xff]  }
 0x188   :  { %7073 = vmatprep.subr.bf16.mxu1 %v7667_v42  ;;  %v7706_v42 = vld [vmem:[#allocation2 + $0xcb0] sm:$0xff]  }
 0x189   :  { %v6759_v48 = vpop.f32.mrf.mxu0  ;;  %5467 = vmatmul.mubr.bf16.vlgmr.msra.gmra.mxu0 %v1374_v41 }
 0x18a   :  { %v6781_v54 = vpop.f32.mrf.mxu1  ;;  %7052 = vmatpush3.bf16.msra.mxu0 %v7668_v44  ;;  %5507 = vmatmul.mubr.bf16.vlgmr.msra.gmra.mxu1 %v1396_v49 }
 0x18b   :  { %v6760_v55 = vpop.f32.mrf.mxu0  ;;  %7053 = vmatprep.subr.bf16.mxu0 %v7670_v50  ;;  %7074 = vmatpush3.bf16.msra.mxu1 %v7669_v46 }
 0x18c   :  { %v6761_v57 = vadd.f32 %v6760_v55, %v6759_v48  ;;  %v6782_v60 = vpop.f32.mrf.mxu1  ;;  %5546 = vmatprep.mubr.bf16.mxu0 %v1395_v53  ;;  %7075 = vmatprep.subr.bf16.mxu1 %v7671_v52  ;;  %v7708_v48 = vld [vmem:[#allocation2 + $0xce8] sm:$0xff]   ;;  %v7711_v55 = vld [vmem:[#allocation2 + $0xc60] sm:$0xff]  }
 0x18d   :  { %v6762_v61 = vpop.f32.mrf.mxu0  ;;  %v6783_v0 = vadd.f32 %v6782_v60, %v6781_v54  ;;  %5586 = vmatprep.mubr.bf16.mxu1 %v1399_v59  ;;  %v7710_v53 = vld [vmem:[#allocation2 + $0xca8] sm:$0xff]   ;;  %v7715_v59 = vld [vmem:[#allocation2 + $0xc58] sm:$0xff]  }
 0x18e   :  { %v4989_v63 = vadd.f32 %v6761_v57, %v8052_v13  ;;  %v6784_v2 = vpop.f32.mrf.mxu1  ;;  %7054 = vmatpush3.bf16.msra.mxu0 %v7672_v56  ;;  %v7683_v13 = vld [vmem:[#allocation2 + $0xbd8] sm:$0xff]   ;;  %v7712_v56 = vld [vmem:[#allocation2 + $0xce0] sm:$0xff]  }
 0x18f   :  { %v6763_v3 = vpop.f32.mrf.mxu0  ;;  %7055 = vmatprep.subr.bf16.mxu0 %v7674_v62  ;;  %7076 = vmatpush3.bf16.msra.mxu1 %v7673_v58  ;;  %v7713_v57 = vld [vmem:[#allocation2 + $0xc20] sm:$0xff]   ;;  %v7716_v60 = vld [vmem:[#allocation2 + $0xcd8] sm:$0xff]   ;;  %v7722_v2 = vld [vmem:[#allocation2 + $0xc90] sm:$0xff]  }
 0x190   :  { %v8067_v5 = vadd.f32 %v6783_v0, %v4989_v63  ;;  %v6785_v7 = vpop.f32.mrf.mxu1  ;;  %7077 = vmatprep.subr.bf16.mxu1 %v7675_v1  ;;  %v7714_v58 = vld [vmem:[#allocation2 + $0xca0] sm:$0xff]   ;;  %v7717_v61 = vld [vmem:[#allocation2 + $0xc18] sm:$0xff]   ;;  %v7719_v63 = vld [vmem:[#allocation2 + $0xc50] sm:$0xff]  }
 0x191   :  { %v7718_v62 = vld [vmem:[#allocation2 + $0xc98] sm:$0xff]   ;;  %v7720_v0 = vld [vmem:[#allocation2 + $0xcd0] sm:$0xff]   ;;  %v7723_v3 = vld [vmem:[#allocation2 + $0xc48] sm:$0xff]  }
 0x192   :  { %7056 = vmatpush3.bf16.msra.mxu0 %v7676_v4  ;;  %v7721_v1 = vld [vmem:[#allocation2 + $0xc10] sm:$0xff]   ;;  %v7724_v4 = vld [vmem:[#allocation2 + $0xcc8] sm:$0xff]   ;;  %v7727_v7 = vld [vmem:[#allocation2 + $0xc40] sm:$0xff]  }
 0x193   :  { %7057 = vmatprep.subr.bf16.mxu0 %v7678_v8  ;;  %7078 = vmatpush3.bf16.msra.mxu1 %v7677_v6  ;;  %v7726_v6 = vld [vmem:[#allocation2 + $0xc88] sm:$0xff]   ;;  %v7728_v8 = vld [vmem:[#allocation2 + $0xcc0] sm:$0xff]  }
 0x194   :  { %7079 = vmatprep.subr.bf16.mxu1 %v7679_v9  ;;  %v7729_v9 = vld [vmem:[#allocation2 + $0xc00] sm:$0xff]  }
 0x196   :  { %7058 = vmatpush3.bf16.msra.mxu0 %v7680_v10  ;;  %v65_v10 = vld [vmem:[%s8136_s0 + $0x30] sm:$0xff] }
 0x197   :  { %7059 = vmatprep.subr.bf16.mxu0 %v7682_v12  ;;  %7080 = vmatpush3.bf16.msra.mxu1 %v7681_v11  ;;  %v7730_v11 = vld [vmem:[#allocation2 + $0xc80] sm:$0xff]   ;;  %v1407_v12 = vrot.slane %v65_v10, %v7971_v35 }
 0x198   :  { %7081 = vmatprep.subr.bf16.mxu1 %v7683_v13  ;;  %v1400_v13 = vcombine.high %v65_v10, %v65_v10  ;;  %v7768_v10 = vld [vmem:[#allocation2 + $0xe70] sm:$0xff]  }
 0x19a   :  { %7060 = vmatpush3.bf16.msra.mxu0 %v7684_v14  ;;  %v7731_v14 = vld [vmem:[#allocation2 + $0xd78] sm:$0xff]  }
 0x19b   :  { %7061 = vmatprep.subr.bf16.mxu0 %v7686_v16  ;;  %7082 = vmatpush3.bf16.msra.mxu1 %v7685_v15  ;;  %v1415_v15 = vcombine.high %v1407_v12, %v1407_v12  ;;  %v1423_v16 = vrot.slane %v1407_v12, %v7971_v35  ;;  %v7769_v12 = vld [vmem:[#allocation2 + $0xef0] sm:$0xff]  }
 0x19c   :  { %7083 = vmatprep.subr.bf16.mxu1 %v7687_v17  ;;  %v7732_v17 = vld [vmem:[#allocation2 + $0xdf8] sm:$0xff]  }
 0x19e   :  { %7062 = vmatpush3.bf16.msra.mxu0 %v7688_v18  ;;  %v8080_v18 = vrot.slane %v1400_v13, %v7971_v35  ;;  %v7770_v13 = vld [vmem:[#allocation2 + $0xe30] sm:$0xff]  }
 0x19f   :  { %7063 = vmatprep.subr.bf16.mxu0 %v7690_v20  ;;  %7084 = vmatpush3.bf16.msra.mxu1 %v7689_v19  ;;  %v7733_v19 = vld [vmem:[#allocation2 + $0xd38] sm:$0xff]   ;;  %v1437_v20 = vrot.slane %v1415_v15, %v7971_v35 }
 0x1a0   :  { %7085 = vmatprep.subr.bf16.mxu1 %v7691_v21  ;;  %v7734_v21 = vld [vmem:[#allocation2 + $0xdb8] sm:$0xff]  }
 0x1a2   :  { %7064 = vmatpush3.bf16.msra.mxu0 %v7692_v22  ;;  %v1416_v22 = vcombine.high %v8080_v18, %v8080_v18 }
 0x1a3   :  { %7065 = vmatprep.subr.bf16.mxu0 %v7694_v24  ;;  %7086 = vmatpush3.bf16.msra.mxu1 %v7693_v23  ;;  %v1445_v23 = vcombine.high %v1423_v16, %v1423_v16  ;;  %v7735_v24 = vld [vmem:[#allocation2 + $0xd70] sm:$0xff]  }
 0x1a4   :  { %7087 = vmatprep.subr.bf16.mxu1 %v7695_v25  ;;  %v1447_v25 = vcombine.high %v1437_v20, %v1437_v20 }
 0x1a6   :  { %7066 = vmatpush3.bf16.msra.mxu0 %v7696_v26 }
 0x1a7   :  { %7095 = vmatprep.subr.bf16.mxu0 %v7699_v29  ;;  %7088 = vmatpush3.bf16.msra.mxu1 %v7697_v27  ;;  %v7736_v27 = vld [vmem:[#allocation2 + $0xdf0] sm:$0xff]  }
 0x1a8   :  { %7117 = vmatprep.subr.bf16.mxu1 %v7700_v30  ;;  %v7737_v29 = vld [vmem:[#allocation2 + $0xd30] sm:$0xff]  }
 0x1a9   :  { %v6803_v33 = vpop.f32.mrf.mxu0  ;;  %5547 = vmatmul.mubr.bf16.vlgmr.msra.gmra.mxu0 %v1381_v28  ;;  %v1444_v28 = vrot.slane %v1416_v22, %v7971_v35 }
 0x1aa   :  { %v6825_v38 = vpop.f32.mrf.mxu1  ;;  %7096 = vmatpush3.bf16.msra.mxu0 %v7701_v31  ;;  %5587 = vmatmul.mubr.bf16.vlgmr.msra.gmra.mxu1 %v1397_v34 }
 0x1ab   :  { %v6804_v39 = vpop.f32.mrf.mxu0  ;;  %7097 = vmatprep.subr.bf16.mxu0 %v7703_v36  ;;  %7118 = vmatpush3.bf16.msra.mxu1 %v7702_v32  ;;  %v7738_v32 = vld [vmem:[#allocation2 + $0xdb0] sm:$0xff]   ;;  %v7739_v36 = vld [vmem:[#allocation2 + $0xd68] sm:$0xff]  }
 0x1ac   :  { %v6805_v41 = vadd.f32 %v6804_v39, %v6803_v33  ;;  %v6826_v43 = vpop.f32.mrf.mxu1  ;;  %7119 = vmatprep.subr.bf16.mxu1 %v7704_v37  ;;  %5626 = vmatprep.mubr.bf16.mxu0 %v1437_v20  ;;  %v1448_v33 = vcombine.high %v1444_v28, %v1444_v28  ;;  %v7740_v39 = vld [vmem:[#allocation2 + $0xde8] sm:$0xff]  }
 0x1ad   :  { %v6806_v44 = vpop.f32.mrf.mxu0  ;;  %v6827_v47 = vadd.f32 %v6826_v43, %v6825_v38  ;;  %5666 = vmatprep.mubr.bf16.mxu1 %v1447_v25 }
 0x1ae   :  { %v5069_v46 = vadd.f32 %v6805_v41, %v8067_v5  ;;  %v6828_v49 = vpop.f32.mrf.mxu1  ;;  %7098 = vmatpush3.bf16.msra.mxu0 %v7705_v40  ;;  %v7725_v5 = vld [vmem:[#allocation2 + $0xc08] sm:$0xff]  }
 0x1af   :  { %v6807_v50 = vpop.f32.mrf.mxu0  ;;  %7099 = vmatprep.subr.bf16.mxu0 %v7707_v45  ;;  %7120 = vmatpush3.bf16.msra.mxu1 %v7706_v42  ;;  %v7741_v42 = vld [vmem:[#allocation2 + $0xd28] sm:$0xff]   ;;  %v7744_v49 = vld [vmem:[#allocation2 + $0xde0] sm:$0xff]  }
 0x1b0   :  { %v8072_v52 = vadd.f32 %v6827_v47, %v5069_v46  ;;  %v6829_v54 = vpop.f32.mrf.mxu1  ;;  %7121 = vmatprep.subr.bf16.mxu1 %v7708_v48  ;;  %v7742_v45 = vld [vmem:[#allocation2 + $0xda8] sm:$0xff]   ;;  %v7743_v47 = vld [vmem:[#allocation2 + $0xd60] sm:$0xff]  }
 0x1b1   :  { %v7745_v50 = vld [vmem:[#allocation2 + $0xd20] sm:$0xff]   ;;  %v7749_v54 = vld [vmem:[#allocation2 + $0xd18] sm:$0xff]  }
 0x1b2   :  { %7100 = vmatpush3.bf16.msra.mxu0 %v7709_v51  ;;  %v7746_v51 = vld [vmem:[#allocation2 + $0xda0] sm:$0xff]  }
 0x1b3   :  { %7101 = vmatprep.subr.bf16.mxu0 %v7711_v55  ;;  %7122 = vmatpush3.bf16.msra.mxu1 %v7710_v53  ;;  %v7748_v53 = vld [vmem:[#allocation2 + $0xdd8] sm:$0xff]  }
 0x1b4   :  { %7123 = vmatprep.subr.bf16.mxu1 %v7712_v56  ;;  %v7750_v55 = vld [vmem:[#allocation2 + $0xd98] sm:$0xff]   ;;  %v7751_v56 = vld [vmem:[#allocation2 + $0xd50] sm:$0xff]  }
 0x1b6   :  { %7102 = vmatpush3.bf16.msra.mxu0 %v7713_v57  ;;  %v7752_v57 = vld [vmem:[#allocation2 + $0xdd0] sm:$0xff]  }
 0x1b7   :  { %7103 = vmatprep.subr.bf16.mxu0 %v7715_v59  ;;  %7124 = vmatpush3.bf16.msra.mxu1 %v7714_v58  ;;  %v7753_v58 = vld [vmem:[#allocation2 + $0xd10] sm:$0xff]  }
 0x1b8   :  { %7125 = vmatprep.subr.bf16.mxu1 %v7716_v60  ;;  %v7754_v59 = vld [vmem:[#allocation2 + $0xd90] sm:$0xff]   ;;  %v7755_v60 = vld [vmem:[#allocation2 + $0xd48] sm:$0xff]  }
 0x1ba   :  { %7104 = vmatpush3.bf16.msra.mxu0 %v7717_v61  ;;  %v7756_v61 = vld [vmem:[#allocation2 + $0xdc8] sm:$0xff]  }
 0x1bb   :  { %7105 = vmatprep.subr.bf16.mxu0 %v7719_v63  ;;  %7126 = vmatpush3.bf16.msra.mxu1 %v7718_v62  ;;  %v7757_v62 = vld [vmem:[#allocation2 + $0xd08] sm:$0xff]  }
 0x1bc   :  { %7127 = vmatprep.subr.bf16.mxu1 %v7720_v0  ;;  %v7758_v63 = vld [vmem:[#allocation2 + $0xd88] sm:$0xff]   ;;  %v7759_v0 = vld [vmem:[#allocation2 + $0xd40] sm:$0xff]  }
 0x1be   :  { %7106 = vmatpush3.bf16.msra.mxu0 %v7721_v1  ;;  %v7760_v1 = vld [vmem:[#allocation2 + $0xdc0] sm:$0xff]  }
 0x1bf   :  { %7107 = vmatprep.subr.bf16.mxu0 %v7723_v3  ;;  %7128 = vmatpush3.bf16.msra.mxu1 %v7722_v2  ;;  %v7761_v2 = vld [vmem:[#allocation2 + $0xd00] sm:$0xff]  }
 0x1c0   :  { %7129 = vmatprep.subr.bf16.mxu1 %v7724_v4  ;;  %v7762_v3 = vld [vmem:[#allocation2 + $0xd80] sm:$0xff]   ;;  %v1430_v4 = vrot.slane %v8080_v18, %v7971_v35  ;;  %v7772_v18 = vld [vmem:[#allocation2 + $0xe68] sm:$0xff]  }
 0x1c2   :  { %7108 = vmatpush3.bf16.msra.mxu0 %v7725_v5  ;;  %v7764_v5 = vld [vmem:[#allocation2 + $0xe78] sm:$0xff]  }
 0x1c3   :  { %7109 = vmatprep.subr.bf16.mxu0 %v7727_v7  ;;  %7130 = vmatpush3.bf16.msra.mxu1 %v7726_v6  ;;  %v7765_v6 = vld [vmem:[#allocation2 + $0xef8] sm:$0xff]  }
 0x1c4   :  { %7131 = vmatprep.subr.bf16.mxu1 %v7728_v8  ;;  %v7766_v7 = vld [vmem:[#allocation2 + $0xe38] sm:$0xff]  }
 0x1c5   :  { %v7767_v8 = vld [vmem:[#allocation2 + $0xeb8] sm:$0xff]  }
 0x1c6   :  { %7110 = vmatpush3.bf16.msra.mxu0 %v7729_v9  ;;  %v1446_v9 = vcombine.high %v1430_v4, %v1430_v4 }
 0x1c7   :  { %7139 = vmatprep.subr.bf16.mxu0 %v7731_v14  ;;  %7132 = vmatpush3.bf16.msra.mxu1 %v7730_v11 }
 0x1c8   :  { %7161 = vmatprep.subr.bf16.mxu1 %v7732_v17 }
 0x1c9   :  { %v6847_v26 = vpop.f32.mrf.mxu0  ;;  %5627 = vmatmul.mubr.bf16.vlgmr.msra.gmra.mxu0 %v1423_v16  ;;  %v7771_v16 = vld [vmem:[#allocation2 + $0xeb0] sm:$0xff]  }
 0x1ca   :  { %v6869_v30 = vpop.f32.mrf.mxu1  ;;  %7140 = vmatpush3.bf16.msra.mxu0 %v7733_v19  ;;  %5667 = vmatmul.mubr.bf16.vlgmr.msra.gmra.mxu1 %v1445_v23 }
 0x1cb   :  { %v6848_v31 = vpop.f32.mrf.mxu0  ;;  %7141 = vmatprep.subr.bf16.mxu0 %v7735_v24  ;;  %7162 = vmatpush3.bf16.msra.mxu1 %v7734_v21  ;;  %v7773_v21 = vld [vmem:[#allocation2 + $0xee8] sm:$0xff]  }
 0x1cc   :  { %v6849_v34 = vadd.f32 %v6848_v31, %v6847_v26  ;;  %v6870_v37 = vpop.f32.mrf.mxu1  ;;  %5706 = vmatprep.mubr.bf16.mxu0 %v1444_v28  ;;  %7163 = vmatprep.subr.bf16.mxu1 %v7736_v27  ;;  %v7774_v24 = vld [vmem:[#allocation2 + $0xe28] sm:$0xff]   ;;  %v7777_v31 = vld [vmem:[#allocation2 + $0xee0] sm:$0xff]  }
 0x1cd   :  { %v6850_v38 = vpop.f32.mrf.mxu0  ;;  %v6871_v41 = vadd.f32 %v6870_v37, %v6869_v30  ;;  %5746 = vmatprep.mubr.bf16.mxu1 %v1448_v33  ;;  %v7775_v27 = vld [vmem:[#allocation2 + $0xea8] sm:$0xff]   ;;  %v7779_v33 = vld [vmem:[#allocation2 + $0xea0] sm:$0xff]   ;;  %v7782_v37 = vld [vmem:[#allocation2 + $0xe18] sm:$0xff]  }
 0x1ce   :  { %v5149_v40 = vadd.f32 %v6849_v34, %v8072_v52  ;;  %v6872_v43 = vpop.f32.mrf.mxu1  ;;  %7142 = vmatpush3.bf16.msra.mxu0 %v7737_v29  ;;  %v7747_v52 = vld [vmem:[#allocation2 + $0xd58] sm:$0xff]   ;;  %v7776_v29 = vld [vmem:[#allocation2 + $0xe60] sm:$0xff]  }
 0x1cf   :  { %v6851_v44 = vpop.f32.mrf.mxu0  ;;  %7143 = vmatprep.subr.bf16.mxu0 %v7739_v36  ;;  %7164 = vmatpush3.bf16.msra.mxu1 %v7738_v32  ;;  %v7778_v32 = vld [vmem:[#allocation2 + $0xe20] sm:$0xff]   ;;  %v7780_v34 = vld [vmem:[#allocation2 + $0xe58] sm:$0xff]   ;;  %v7788_v43 = vld [vmem:[#allocation2 + $0xe48] sm:$0xff]  }
 0x1d0   :  { %v8087_v46 = vadd.f32 %v6871_v41, %v5149_v40  ;;  %v6873_v48 = vpop.f32.mrf.mxu1  ;;  %7165 = vmatprep.subr.bf16.mxu1 %v7740_v39  ;;  %v7781_v36 = vld [vmem:[#allocation2 + $0xed8] sm:$0xff]   ;;  %v7784_v39 = vld [vmem:[#allocation2 + $0xe50] sm:$0xff]   ;;  %v7789_v44 = vld [vmem:[#allocation2 + $0xec8] sm:$0xff]  }
 0x1d1   :  { %v7783_v38 = vld [vmem:[#allocation2 + $0xe98] sm:$0xff]   ;;  %v7785_v40 = vld [vmem:[#allocation2 + $0xed0] sm:$0xff]   ;;  %v7793_v48 = vld [vmem:[#allocation2 + $0xec0] sm:$0xff]  }
 0x1d2   :  { %7144 = vmatpush3.bf16.msra.mxu0 %v7741_v42  ;;  %v7786_v41 = vld [vmem:[#allocation2 + $0xe10] sm:$0xff]  }
 0x1d3   :  { %7145 = vmatprep.subr.bf16.mxu0 %v7743_v47  ;;  %7166 = vmatpush3.bf16.msra.mxu1 %v7742_v45  ;;  %v7787_v42 = vld [vmem:[#allocation2 + $0xe90] sm:$0xff]   ;;  %v7790_v45 = vld [vmem:[#allocation2 + $0xe08] sm:$0xff]   ;;  %v7792_v47 = vld [vmem:[#allocation2 + $0xe40] sm:$0xff]  }
 0x1d4   :  { %7167 = vmatprep.subr.bf16.mxu1 %v7744_v49  ;;  %v7794_v49 = vld [vmem:[#allocation2 + $0xe00] sm:$0xff]  }
 0x1d6   :  { %7146 = vmatpush3.bf16.msra.mxu0 %v7745_v50  ;;  %v66_v50 = vld [vmem:[%s8136_s0 + $0x38] sm:$0xff] }
 0x1d7   :  { %7147 = vmatprep.subr.bf16.mxu0 %v7747_v52  ;;  %7168 = vmatpush3.bf16.msra.mxu1 %v7746_v51  ;;  %v7795_v51 = vld [vmem:[#allocation2 + $0xe80] sm:$0xff]   ;;  %v1456_v52 = vrot.slane %v66_v50, %v7971_v35 }
 0x1d8   :  { %7169 = vmatprep.subr.bf16.mxu1 %v7748_v53  ;;  %v1449_v53 = vcombine.high %v66_v50, %v66_v50 }
 0x1da   :  { %7148 = vmatpush3.bf16.msra.mxu0 %v7749_v54  ;;  %v7796_v54 = vld [vmem:[#allocation2 + $0xf78] sm:$0xff]  }
 0x1db   :  { %7149 = vmatprep.subr.bf16.mxu0 %v7751_v56  ;;  %7170 = vmatpush3.bf16.msra.mxu1 %v7750_v55  ;;  %v1464_v55 = vcombine.high %v1456_v52, %v1456_v52  ;;  %v1472_v56 = vrot.slane %v1456_v52, %v7971_v35 }
 0x1dc   :  { %7171 = vmatprep.subr.bf16.mxu1 %v7752_v57  ;;  %v7797_v57 = vld [vmem:[#allocation2 + $0xff8] sm:$0xff]  }
 0x1de   :  { %7150 = vmatpush3.bf16.msra.mxu0 %v7753_v58  ;;  %v8100_v58 = vrot.slane %v1449_v53, %v7971_v35 }
 0x1df   :  { %7151 = vmatprep.subr.bf16.mxu0 %v7755_v60  ;;  %7172 = vmatpush3.bf16.msra.mxu1 %v7754_v59  ;;  %v7798_v59 = vld [vmem:[#allocation2 + $0xf38] sm:$0xff]   ;;  %v1486_v60 = vrot.slane %v1464_v55, %v7971_v35 }
 0x1e0   :  { %7173 = vmatprep.subr.bf16.mxu1 %v7756_v61  ;;  %v7799_v61 = vld [vmem:[#allocation2 + $0xfb8] sm:$0xff]  }
 0x1e2   :  { %7152 = vmatpush3.bf16.msra.mxu0 %v7757_v62  ;;  %v1465_v62 = vcombine.high %v8100_v58, %v8100_v58 }
 0x1e3   :  { %7153 = vmatprep.subr.bf16.mxu0 %v7759_v0  ;;  %7174 = vmatpush3.bf16.msra.mxu1 %v7758_v63  ;;  %v1494_v63 = vcombine.high %v1472_v56, %v1472_v56  ;;  %v7800_v0 = vld [vmem:[#allocation2 + $0xf70] sm:$0xff]  }
 0x1e4   :  { %7175 = vmatprep.subr.bf16.mxu1 %v7760_v1  ;;  %v1496_v1 = vcombine.high %v1486_v60, %v1486_v60 }
 0x1e6   :  { %7154 = vmatpush3.bf16.msra.mxu0 %v7761_v2 }
 0x1e7   :  { %7183 = vmatprep.subr.bf16.mxu0 %v7764_v5  ;;  %7176 = vmatpush3.bf16.msra.mxu1 %v7762_v3  ;;  %v7801_v3 = vld [vmem:[#allocation2 + $0xff0] sm:$0xff]  }
 0x1e8   :  { %7205 = vmatprep.subr.bf16.mxu1 %v7765_v6  ;;  %v7802_v5 = vld [vmem:[#allocation2 + $0xf30] sm:$0xff]  }
 0x1e9   :  { %v6891_v11 = vpop.f32.mrf.mxu0  ;;  %5707 = vmatmul.mubr.bf16.vlgmr.msra.gmra.mxu0 %v1430_v4  ;;  %v1493_v4 = vrot.slane %v1465_v62, %v7971_v35 }
 0x1ea   :  { %v6913_v14 = vpop.f32.mrf.mxu1  ;;  %7184 = vmatpush3.bf16.msra.mxu0 %v7766_v7  ;;  %5747 = vmatmul.mubr.bf16.vlgmr.msra.gmra.mxu1 %v1446_v9 }
 0x1eb   :  { %v6892_v15 = vpop.f32.mrf.mxu0  ;;  %7185 = vmatprep.subr.bf16.mxu0 %v7768_v10  ;;  %7206 = vmatpush3.bf16.msra.mxu1 %v7767_v8  ;;  %v7803_v8 = vld [vmem:[#allocation2 + $0xfb0] sm:$0xff]   ;;  %v1497_v9 = vcombine.high %v1493_v4, %v1493_v4 }
 0x1ec   :  { %v6893_v17 = vadd.f32 %v6892_v15, %v6891_v11  ;;  %v6914_v19 = vpop.f32.mrf.mxu1  ;;  %7207 = vmatprep.subr.bf16.mxu1 %v7769_v12  ;;  %5786 = vmatprep.mubr.bf16.mxu0 %v1486_v60  ;;  %v7804_v11 = vld [vmem:[#allocation2 + $0xf68] sm:$0xff]  }
 0x1ed   :  { %v6894_v20 = vpop.f32.mrf.mxu0  ;;  %v6915_v23 = vadd.f32 %v6914_v19, %v6913_v14  ;;  %5826 = vmatprep.mubr.bf16.mxu1 %v1496_v1  ;;  %v7805_v14 = vld [vmem:[#allocation2 + $0xfe8] sm:$0xff]  }
 0x1ee   :  { %v5229_v22 = vadd.f32 %v6893_v17, %v8087_v46  ;;  %v6916_v25 = vpop.f32.mrf.mxu1  ;;  %7186 = vmatpush3.bf16.msra.mxu0 %v7770_v13  ;;  %v7791_v46 = vld [vmem:[#allocation2 + $0xe88] sm:$0xff]  }
 0x1ef   :  { %v6895_v26 = vpop.f32.mrf.mxu0  ;;  %7187 = vmatprep.subr.bf16.mxu0 %v7772_v18  ;;  %7208 = vmatpush3.bf16.msra.mxu1 %v7771_v16  ;;  %v7806_v17 = vld [vmem:[#allocation2 + $0xf28] sm:$0xff]   ;;  %v7810_v25 = vld [vmem:[#allocation2 + $0xf20] sm:$0xff]  }
 0x1f0   :  { %v8092_v28 = vadd.f32 %v6915_v23, %v5229_v22  ;;  %v6917_v30 = vpop.f32.mrf.mxu1  ;;  %7209 = vmatprep.subr.bf16.mxu1 %v7773_v21  ;;  %v7807_v20 = vld [vmem:[#allocation2 + $0xfa8] sm:$0xff]   ;;  %v7808_v22 = vld [vmem:[#allocation2 + $0xf60] sm:$0xff]  }
 0x1f1   :  { %v7811_v26 = vld [vmem:[#allocation2 + $0xfa0] sm:$0xff]   ;;  %v7815_v30 = vld [vmem:[#allocation2 + $0xf98] sm:$0xff]  }
 0x1f2   :  { %7188 = vmatpush3.bf16.msra.mxu0 %v7774_v24  ;;  %v7809_v24 = vld [vmem:[#allocation2 + $0xfe0] sm:$0xff]  }
 0x1f3   :  { %7189 = vmatprep.subr.bf16.mxu0 %v7776_v29  ;;  %7210 = vmatpush3.bf16.msra.mxu1 %v7775_v27  ;;  %v7812_v27 = vld [vmem:[#allocation2 + $0xf58] sm:$0xff]  }
 0x1f4   :  { %7211 = vmatprep.subr.bf16.mxu1 %v7777_v31  ;;  %v7814_v29 = vld [vmem:[#allocation2 + $0xf18] sm:$0xff]   ;;  %v7816_v31 = vld [vmem:[#allocation2 + $0xf50] sm:$0xff]  }
 0x1f6   :  { %7190 = vmatpush3.bf16.msra.mxu0 %v7778_v32  ;;  %v7817_v32 = vld [vmem:[#allocation2 + $0xfd0] sm:$0xff]  }
 0x1f7   :  { %7191 = vmatprep.subr.bf16.mxu0 %v7780_v34  ;;  %7212 = vmatpush3.bf16.msra.mxu1 %v7779_v33  ;;  %v7818_v33 = vld [vmem:[#allocation2 + $0xf10] sm:$0xff]  }
 0x1f8   :  { %7213 = vmatprep.subr.bf16.mxu1 %v7781_v36  ;;  %v7819_v34 = vld [vmem:[#allocation2 + $0xf90] sm:$0xff]   ;;  %v7820_v36 = vld [vmem:[#allocation2 + $0xf48] sm:$0xff]  }
 0x1fa   :  { %7192 = vmatpush3.bf16.msra.mxu0 %v7782_v37  ;;  %v7821_v37 = vld [vmem:[#allocation2 + $0xfc8] sm:$0xff]  }
 0x1fb   :  { %7193 = vmatprep.subr.bf16.mxu0 %v7784_v39  ;;  %7214 = vmatpush3.bf16.msra.mxu1 %v7783_v38  ;;  %v7822_v38 = vld [vmem:[#allocation2 + $0xf08] sm:$0xff]  }
 0x1fc   :  { %7215 = vmatprep.subr.bf16.mxu1 %v7785_v40  ;;  %v7823_v39 = vld [vmem:[#allocation2 + $0xf88] sm:$0xff]   ;;  %v7824_v40 = vld [vmem:[#allocation2 + $0xf40] sm:$0xff]  }
 0x1fe   :  { %7194 = vmatpush3.bf16.msra.mxu0 %v7786_v41  ;;  %v7825_v41 = vld [vmem:[#allocation2 + $0xfc0] sm:$0xff]  }
 0x1ff   :  { %7195 = vmatprep.subr.bf16.mxu0 %v7788_v43  ;;  %7216 = vmatpush3.bf16.msra.mxu1 %v7787_v42  ;;  %v7826_v42 = vld [vmem:[#allocation2 + $0xf00] sm:$0xff]  }
 0x200   :  { %7217 = vmatprep.subr.bf16.mxu1 %v7789_v44  ;;  %v7827_v43 = vld [vmem:[#allocation2 + $0xf80] sm:$0xff]   ;;  %v1479_v44 = vrot.slane %v8100_v58, %v7971_v35 }
 0x202   :  { %7196 = vmatpush3.bf16.msra.mxu0 %v7790_v45  ;;  %v1495_v45 = vcombine.high %v1479_v44, %v1479_v44 }
 0x203   :  { %7197 = vmatprep.subr.bf16.mxu0 %v7792_v47  ;;  %7218 = vmatpush3.bf16.msra.mxu1 %v7791_v46 }
 0x204   :  { %7219 = vmatprep.subr.bf16.mxu1 %v7793_v48 }
 0x206   :  { %7198 = vmatpush3.bf16.msra.mxu0 %v7794_v49 }
 0x207   :  { %7227 = vmatprep.subr.bf16.mxu0 %v7796_v54  ;;  %7220 = vmatpush3.bf16.msra.mxu1 %v7795_v51 }
 0x208   :  { %7249 = vmatprep.subr.bf16.mxu1 %v7797_v57 }
 0x209   :  { %v6935_v2 = vpop.f32.mrf.mxu0  ;;  %5787 = vmatmul.mubr.bf16.vlgmr.msra.gmra.mxu0 %v1472_v56 }
 0x20a   :  { %v6957_v6 = vpop.f32.mrf.mxu1  ;;  %7228 = vmatpush3.bf16.msra.mxu0 %v7798_v59  ;;  %5827 = vmatmul.mubr.bf16.vlgmr.msra.gmra.mxu1 %v1494_v63 }
 0x20b   :  { %v6936_v7 = vpop.f32.mrf.mxu0  ;;  %7229 = vmatprep.subr.bf16.mxu0 %v7800_v0  ;;  %7250 = vmatpush3.bf16.msra.mxu1 %v7799_v61 }
 0x20c   :  { %v6937_v10 = vadd.f32 %v6936_v7, %v6935_v2  ;;  %v6958_v12 = vpop.f32.mrf.mxu1  ;;  %5866 = vmatprep.mubr.bf16.mxu0 %v1493_v4  ;;  %7251 = vmatprep.subr.bf16.mxu1 %v7801_v3  ;;  %v7830_v7 = vld [vmem:[%s8139_s3 + $0x30] sm:$0xff]  }
 0x20d   :  { %v6938_v13 = vpop.f32.mrf.mxu0  ;;  %v6959_v16 = vadd.f32 %v6958_v12, %v6957_v6  ;;  %5906 = vmatprep.mubr.bf16.mxu1 %v1497_v9  ;;  %v7929_v6 = vmov 0.0   ;;  %v7832_v9 = vld [vmem:[%s8139_s3 + $0x20] sm:$0xff]  }
 0x20e   :  { %v5309_v15 = vadd.f32 %v6937_v10, %v8092_v28  ;;  %v6960_v18 = vpop.f32.mrf.mxu1  ;;  %7230 = vmatpush3.bf16.msra.mxu0 %v7802_v5  ;;  %v7813_v28 = vld [vmem:[#allocation2 + $0xfd8] sm:$0xff]  }
 0x20f   :  { %v6939_v19 = vpop.f32.mrf.mxu0  ;;  %7231 = vmatprep.subr.bf16.mxu0 %v7804_v11  ;;  %7252 = vmatpush3.bf16.msra.mxu1 %v7803_v8  ;;  %v7829_v5 = vld [vmem:[%s8139_s3 + $0x38] sm:$0xff]   ;;  %v7831_v8 = vld [vmem:[%s8139_s3 + $0x28] sm:$0xff]  }
 0x210   :  { %v5349_v21 = vadd.f32 %v6959_v16, %v5309_v15  ;;  %v6961_v23 = vpop.f32.mrf.mxu1  ;;  %7253 = vmatprep.subr.bf16.mxu1 %v7805_v14  ;;  %v7833_v10 = vld [vmem:[%s8139_s3 + $0x18] sm:$0xff]   ;;  %v7834_v14 = vld [vmem:[%s8139_s3 + $0x10] sm:$0xff]  }
 0x212   :  { %7232 = vmatpush3.bf16.msra.mxu0 %v7806_v17 }
 0x213   :  { %7233 = vmatprep.subr.bf16.mxu0 %v7808_v22  ;;  %7254 = vmatpush3.bf16.msra.mxu1 %v7807_v20  ;;  %v7835_v22 = vld [vmem:[%s8139_s3 + $0x8] sm:$0xff]  }
 0x214   :  { %7255 = vmatprep.subr.bf16.mxu1 %v7809_v24 }
 0x216   :  { %7234 = vmatpush3.bf16.msra.mxu0 %v7810_v25  ;;  %v7836_v25 = vld [vmem:[%s8139_s3] sm:$0xff]   ;;  %s7931_s3 = smov [#allocation8]  }
 0x217   :  { %7235 = vmatprep.subr.bf16.mxu0 %v7812_v27  ;;  %7256 = vmatpush3.bf16.msra.mxu1 %v7811_v26  ;;  %s6035_s12 = sshll.u32 %s7931_s3, 4  ;;  %s6036_s12 = int_to_ptr.vmem [resolvable:$true] %s6035_s12 }
 0x218   :  { %7257 = vmatprep.subr.bf16.mxu1 %v7813_v28  ;;  %s7897_s13 = scalar_lea.vmem %s6036_s12, 32  ;;  %p7902_p2 = scmp.lt.s32.totalorder %s6036_s12, %s6036_s12 }
 0x219   :  { %p7898_p1 = scmp.ne.s32.totalorder %s6036_s12, %s7897_s13  ;;  %p7903_p3 = scmp.lt.s32.totalorder %s7897_s13, %s7897_s13 }
 0x21a   :  { %7236 = vmatpush3.bf16.msra.mxu0 %v7814_v29 }
 0x21b   :  { %7237 = vmatprep.subr.bf16.mxu0 %v7816_v31  ;;  %7258 = vmatpush3.bf16.msra.mxu1 %v7815_v30  ;;  %p7904_p4 = por %p7903_p3, %p7902_p2 }
 0x21c   :  { %7259 = vmatprep.subr.bf16.mxu1 %v7817_v32 }
 0x21d   :  { %p7905_p5 = pnand %p7904_p4, %p7898_p1 }
 0x21e   :  { %7238 = vmatpush3.bf16.msra.mxu0 %v7818_v33 }
 0x21f   :  { %7239 = vmatprep.subr.bf16.mxu0 %v7820_v36  ;;  %7260 = vmatpush3.bf16.msra.mxu1 %v7819_v34 }
 0x220   :  { %7261 = vmatprep.subr.bf16.mxu1 %v7821_v37 }
 0x222   :  { %7240 = vmatpush3.bf16.msra.mxu0 %v7822_v38 }
 0x223   :  { %7241 = vmatprep.subr.bf16.mxu0 %v7824_v40  ;;  %7262 = vmatpush3.bf16.msra.mxu1 %v7823_v39 }
 0x224   :  { %7263 = vmatprep.subr.bf16.mxu1 %v7825_v41 }
 0x226   :  { %7242 = vmatpush3.bf16.msra.mxu0 %v7826_v42 }
 0x227   :  { %7264 = vmatpush3.bf16.msra.mxu1 %v7827_v43  ;;  %7280 = vmatprep.subr.bf16.mxu0 %v7929_v6 }
 0x229   :  { %v6979_v46 = vpop.f32.mrf.mxu0  ;;  %5867 = vmatmul.mubr.bf16.vlgmr.msra.gmra.mxu0 %v1479_v44 }
 0x22a   :  { %v7001_v47 = vpop.f32.mrf.mxu1  ;;  %5907 = vmatmul.mubr.bf16.vlgmr.msra.gmra.mxu1 %v1495_v45  ;;  %7281 = vmatpush3.bf16.msra.mxu0 %v7829_v5 }
 0x22b   :  { %v6980_v48 = vpop.f32.mrf.mxu0  ;;  %7282 = vmatprep.subr.bf16.mxu0 %v7929_v6  ;;  %7296 = vmatprep.mubr.msk.bf16.mxu0 %vm7930_vm0, %v7929_v6 }
 0x22c   :  { %v6981_v49 = vadd.f32 %v6980_v48, %v6979_v46  ;;  %v7002_v50 = vpop.f32.mrf.mxu1 }
 0x22d   :  { %v6982_v51 = vpop.f32.mrf.mxu0  ;;  %v7003_v53 = vadd.f32 %v7002_v50, %v7001_v47 }
 0x22e   :  { %v5389_v52 = vadd.f32 %v6981_v49, %v5349_v21  ;;  %v7004_v54 = vpop.f32.mrf.mxu1  ;;  %7283 = vmatpush3.bf16.msra.mxu0 %v7830_v7 }
 0x22f   :  { %v6983_v55 = vpop.f32.mrf.mxu0  ;;  %7284 = vmatprep.subr.bf16.mxu0 %v7929_v6 }
 0x230   :  { %v5429_v56 = vadd.f32 %v7003_v53, %v5389_v52  ;;  %v7005_v57 = vpop.f32.mrf.mxu1 }
 0x232   :  { %7285 = vmatpush3.bf16.msra.mxu0 %v7831_v8 }
 0x233   :  { %7286 = vmatprep.subr.bf16.mxu0 %v7929_v6 }
 0x236   :  { %7287 = vmatpush3.bf16.msra.mxu0 %v7832_v9 }
 0x237   :  { %7288 = vmatprep.subr.bf16.mxu0 %v7929_v6 }
 0x23a   :  { %7289 = vmatpush3.bf16.msra.mxu0 %v7833_v10 }
 0x23b   :  { %7290 = vmatprep.subr.bf16.mxu0 %v7929_v6 }
 0x23e   :  { %7291 = vmatpush3.bf16.msra.mxu0 %v7834_v14 }
 0x23f   :  { %7292 = vmatprep.subr.bf16.mxu0 %v7929_v6 }
 0x242   :  { %7293 = vmatpush3.bf16.msra.mxu0 %v7835_v22 }
 0x243   :  { %7294 = vmatprep.subr.bf16.mxu0 %v7929_v6 }
 0x246   :  { %7295 = vmatpush3.bf16.msra.mxu0 %v7836_v25 }
 0x249   :  { %v7023_v35 = vpop.f32.mrf.mxu0 }
 0x24a   :  { %v7045_v58 = vpop.f32.mrf.mxu1 }
 0x24b   :  { %v7024_v59 = vpop.f32.mrf.mxu0 }
 0x24c   :  { %v7025_v60 = vadd.f32 %v7024_v59, %v7023_v35  ;;  %v7046_v61 = vpop.f32.mrf.mxu1 }
 0x24d   :  { %v7026_v62 = vpop.f32.mrf.mxu0  ;;  %v7047_v0 = vadd.f32 %v7046_v61, %v7045_v58 }
 0x24e   :  { %v5469_v63 = vadd.f32 %v7025_v60, %v5429_v56  ;;  %v7048_v1 = vpop.f32.mrf.mxu1 }
 0x24f   :  { %v7027_v2 = vpop.f32.mrf.mxu0 }
 0x250   :  { %v5509_v3 = vadd.f32 %v7047_v0, %v5469_v63  ;;  %v7049_v4 = vpop.f32.mrf.mxu1 }
 0x269   :  { %v7067_v11 = vpop.f32.mrf.mxu0 }
 0x26a   :  { %v7089_v12 = vpop.f32.mrf.mxu1 }
 0x26b   :  { %v7068_v13 = vpop.f32.mrf.mxu0 }
 0x26c   :  { %v7069_v15 = vadd.f32 %v7068_v13, %v7067_v11  ;;  %v7090_v16 = vpop.f32.mrf.mxu1 }
 0x26d   :  { %v7070_v17 = vpop.f32.mrf.mxu0  ;;  %v7091_v19 = vadd.f32 %v7090_v16, %v7089_v12  ;;  %v6558_v12 = vld [vmem:[#allocation7] ss:$0 sm:$0xff] }
 0x26e   :  { %v5549_v18 = vadd.f32 %v7069_v15, %v5509_v3  ;;  %v7092_v20 = vpop.f32.mrf.mxu1 }
 0x26f   :  { %v7071_v21 = vpop.f32.mrf.mxu0 }
 0x270   :  { %v5589_v23 = vadd.f32 %v7091_v19, %v5549_v18  ;;  %v7093_v24 = vpop.f32.mrf.mxu1 }
 0x289   :  { %v7111_v26 = vpop.f32.mrf.mxu0 }
 0x28a   :  { %v7133_v27 = vpop.f32.mrf.mxu1 }
 0x28b   :  { %v7112_v28 = vpop.f32.mrf.mxu0 }
 0x28c   :  { %v7113_v29 = vadd.f32 %v7112_v28, %v7111_v26  ;;  %v7134_v30 = vpop.f32.mrf.mxu1 }
 0x28d   :  { %v7114_v31 = vpop.f32.mrf.mxu0  ;;  %v7135_v33 = vadd.f32 %v7134_v30, %v7133_v27 }
 0x28e   :  { %v5629_v32 = vadd.f32 %v7113_v29, %v5589_v23  ;;  %v7136_v34 = vpop.f32.mrf.mxu1 }
 0x28f   :  { %v7115_v36 = vpop.f32.mrf.mxu0 }
 0x290   :  { %v5669_v37 = vadd.f32 %v7135_v33, %v5629_v32  ;;  %v7137_v38 = vpop.f32.mrf.mxu1 }
 0x2a9   :  { %v7155_v39 = vpop.f32.mrf.mxu0 }
 0x2aa   :  { %v7177_v40 = vpop.f32.mrf.mxu1 }
 0x2ab   :  { %v7156_v41 = vpop.f32.mrf.mxu0 }
 0x2ac   :  { %v7178_v42 = vpop.f32.mrf.mxu1  ;;  %v7157_v55 = vadd.f32 %v7156_v41, %v7155_v39 }
 0x2ad   :  { %v7158_v43 = vpop.f32.mrf.mxu0  ;;  %v7179_v57 = vadd.f32 %v7178_v42, %v7177_v40 }
 0x2ae   :  { %v7180_v44 = vpop.f32.mrf.mxu1  ;;  %v5709_v56 = vadd.f32 %v7157_v55, %v5669_v37 }
 0x2af   :  { %v7159_v45 = vpop.f32.mrf.mxu0 }
 0x2b0   :  { %v7181_v46 = vpop.f32.mrf.mxu1  ;;  %v5749_v58 = vadd.f32 %v7179_v57, %v5709_v56 }
 0x2c9   :  { %v7199_v47 = vpop.f32.mrf.mxu0 }
 0x2ca   :  { %v7221_v48 = vpop.f32.mrf.mxu1 }
 0x2cb   :  { %v7200_v49 = vpop.f32.mrf.mxu0 }
 0x2cc   :  { %v7222_v50 = vpop.f32.mrf.mxu1  ;;  %v7201_v35 = vadd.f32 %v7200_v49, %v7199_v47 }
 0x2cd   :  { %v7202_v51 = vpop.f32.mrf.mxu0  ;;  %v7223_v60 = vadd.f32 %v7222_v50, %v7221_v48 }
 0x2ce   :  { %v7224_v52 = vpop.f32.mrf.mxu1  ;;  %v5789_v59 = vadd.f32 %v7201_v35, %v5749_v58 }
 0x2cf   :  { %v7203_v53 = vpop.f32.mrf.mxu0 }
 0x2d0   :  { %v7225_v54 = vpop.f32.mrf.mxu1  ;;  %v5829_v0 = vadd.f32 %v7223_v60, %v5789_v59 }
 0x2e9   :  { %v7243_v61 = vpop.f32.mrf.mxu0 }
 0x2ea   :  { %v7265_v62 = vpop.f32.mrf.mxu1 }
 0x2eb   :  { %v7244_v63 = vpop.f32.mrf.mxu0 }
 0x2ec   :  { %v7245_v1 = vadd.f32 %v7244_v63, %v7243_v61  ;;  %v7266_v2 = vpop.f32.mrf.mxu1 }
 0x2ed   :  { %v7246_v3 = vpop.f32.mrf.mxu0  ;;  %v7267_v5 = vadd.f32 %v7266_v2, %v7265_v62 }
 0x2ee   :  { %v5869_v4 = vadd.f32 %v7245_v1, %v5829_v0  ;;  %v7268_v6 = vpop.f32.mrf.mxu1 }
 0x2ef   :  { %v7247_v7 = vpop.f32.mrf.mxu0 }
 0x2f0   :  { %v5909_v8 = vadd.f32 %v7267_v5, %v5869_v4  ;;  %v7269_v9 = vpop.f32.mrf.mxu1 }
 0x2f2   :  { %v5914_v10 = vmax.f32 %v5909_v8, 0.0 }
 0x2f4   :  { %v5915_v11 = vpack.c.bf16 %v5914_v10, %v5914_v10 }
 0x2f6   :  { %7297 = vmatmul.mubr.bf16.vlgmr.msra.gmra.mxu0 %v5915_v11 }
 0x3b6   :  { %v6021_v13 = vpop.f32.mrf.mxu0 }
 0x3b7   :  { %v6022_v14 = vadd.f32 %v6558_v12, %v6021_v13 }
 0x3b8   :  { %v7298_v15 = vpop.f32.mrf.mxu0 }
 0x3b9   :  { %6028 = vst.msk [vmem:[#allocation8] sm:$0x3] %vm6027_vm1, %v6022_v14 }
 0x3ba   :  { %v6024_v16 = vpop.f32.mrf.mxu0 }
 0x3bb   :  { %7908 = shalt.err (!%p7905_p5)
}
 0x3bc   :  { %6038 = dma.vmem_to_hbm [thread:$0]  %s6036_s12, 32, %s8141_s5, [#allocation4]   ;;  %v7299_v17 = vpop.f32.mrf.mxu0 }
 0x3bd   :  { %7921 = dma.done.wait [#allocation4], 32  }
 0x3be   :  { %7922 = vsyncadd [#allocation4], 4294967264 }
 0x3bf   :  { %6042 = vsyncpa [#allocation3], 1 }
 0x3c0   :  { %6043 = vsyncpa [#allocation6], 1 }
 0x3c1   :  { %6044 = vsyncpa [#allocation4], 1 }

</bundles_post_ra>
